<compile_context>
chip_gen: v7x
topology: tpu7x:2x2x1
jax: 0.10.0
libtpu: 0.0.40
codegen_flags: <defaults>
</compile_context>

<pallas_src>
import functools
import math

import jax
import jax.numpy as jnp
from jax.experimental import pallas as pl
from jax.experimental.pallas import tpu as pltpu

LN_EPS = 1e-6      # MCAN LayerNorm eps
NEG_INF = -1e9     # masked_fill value used in MHAtt.att


def _layer_norm_ref(z, gamma, beta, eps=LN_EPS):
    """MCAN LayerNorm (reference): gamma*(z-mean)/(unbiased_std+eps)+beta."""
    h = z.shape[-1]
    mean = jnp.mean(z, axis=-1, keepdims=True)
    var = jnp.sum((z - mean) ** 2, axis=-1, keepdims=True) / (h - 1)
    return gamma * (z - mean) / (jnp.sqrt(var) + eps) + beta


# ----------------------------------------------------------------------------
# Fused SGA kernel: one batch element per grid step.
# ----------------------------------------------------------------------------
def _sga_kernel(x_ref, y_ref, xbias_ref, ybias_ref,
                wq1_ref, bq1_ref, wk1_ref, bk1_ref, wv1_ref, bv1_ref,
                wm1_ref, bm1_ref, g1_ref, be1_ref,
                wq2_ref, bq2_ref, wk2_ref, bk2_ref, wv2_ref, bv2_ref,
                wm2_ref, bm2_ref, g2_ref, be2_ref,
                w1_ref, b1_ref, w2_ref, b2_ref, g3_ref, be3_ref,
                o_ref,
                qh_s, kh_s, vh_s, at_s,
                *, n_heads, head_dim):
    nh, dh = n_heads, head_dim
    scale = 1.0 / math.sqrt(dh)

    def layer_norm(z, gamma, beta):
        hdim = z.shape[-1]
        mean = jnp.mean(z, axis=-1, keepdims=True)
        d = z - mean
        var = jnp.sum(d * d, axis=-1, keepdims=True) / (hdim - 1)   # unbiased
        inv = pl.reciprocal(jnp.sqrt(var) + LN_EPS, approx=True)    # EUP, not VALU div
        return gamma * d * inv + beta

    def attention(q_in, kv_in, bias,
                  wq_r, bq_r, wk_r, bk_r, wv_r, bv_r, wm_r, bm_r):
        Sq, Skv = q_in.shape[0], kv_in.shape[0]
        qb = q_in.astype(jnp.bfloat16)
        kvb = kv_in.astype(jnp.bfloat16)
        # Full-width QKV projections: bf16 MXU operands, f32 accumulation + bias.
        q = jnp.dot(qb, wq_r[...], preferred_element_type=jnp.float32) + bq_r[...]
        k = jnp.dot(kvb, wk_r[...], preferred_element_type=jnp.float32) + bk_r[...]
        v = jnp.dot(kvb, wv_r[...], preferred_element_type=jnp.float32) + bv_r[...]
        # Layout plumbing only: scatter per-head slices into head-major VMEM
        # slabs so the scores / P@V matmuls and softmax run ONCE, batched.
        for h in range(nh):
            lo = h * dh
            qh_s[h, :Sq, :] = q[:, lo:lo + dh]
            kh_s[h, :Skv, :] = k[:, lo:lo + dh]
            vh_s[h, :Skv, :] = v[:, lo:lo + dh]
        qh = qh_s[:, :Sq, :]          # (nh, Sq, dh)
        kh = kh_s[:, :Skv, :]         # (nh, Skv, dh)
        vh = vh_s[:, :Skv, :]         # (nh, Skv, dh)
        # One batched scores matmul over all heads.
        s = jnp.einsum("hqd,hkd->hqk", qh, kh,
                       preferred_element_type=jnp.float32) * scale
        s = s + bias[None, :, :]      # additive key-padding mask (0 / -1e9)
        # One softmax pass over the whole (nh, Sq, Skv) block.
        s = s - jnp.max(s, axis=-1, keepdims=True)
        p = jnp.exp(s)
        p = p * pl.reciprocal(jnp.sum(p, axis=-1, keepdims=True), approx=True)
        # TODO(synk): attention-map dropout omitted (identity in eval mode).
        # One batched P@V.
        o = jnp.einsum("hqk,hkd->hqd", p, vh, preferred_element_type=jnp.float32)
        # Gather heads back into a lane-dense (Sq, H) slab -> single K=H merge matmul.
        for h in range(nh):
            at_s[:Sq, h * dh:(h + 1) * dh] = o[h]
        merged = jnp.dot(at_s[:Sq, :].astype(jnp.bfloat16), wm_r[...],
                         preferred_element_type=jnp.float32) + bm_r[...]
        return merged

    x = x_ref[0]                      # (Sx, H) f32
    y = y_ref[0]                      # (Sy, H) f32
    x_bias = xbias_ref[0]             # (1, Sx) additive mask bias
    y_bias = ybias_ref[0]             # (1, Sy)

    # x = norm1(x + mhatt1(v=x, k=x, q=x, x_mask))   (dropout1 = identity, eval)
    a1 = attention(x, x, x_bias, wq1_ref, bq1_ref, wk1_ref, bk1_ref,
                   wv1_ref, bv1_ref, wm1_ref, bm1_ref)
    x1 = layer_norm(x + a1, g1_ref[...], be1_ref[...])

    # x = norm2(x + mhatt2(v=y, k=y, q=x, y_mask))   (dropout2 = identity, eval)
    a2 = attention(x1, y, y_bias, wq2_ref, bq2_ref, wk2_ref, bk2_ref,
                   wv2_ref, bv2_ref, wm2_ref, bm2_ref)
    x2 = layer_norm(x1 + a2, g2_ref[...], be2_ref[...])

    # x = norm3(x + FFN(x))                          (dropout3 / MLP dropout = identity)
    hmid = jnp.dot(x2.astype(jnp.bfloat16), w1_ref[...],
                   preferred_element_type=jnp.float32) + b1_ref[...]
    hmid = jnp.maximum(hmid, 0.0)     # ReLU in f32
    f = jnp.dot(hmid.astype(jnp.bfloat16), w2_ref[...],
                preferred_element_type=jnp.float32) + b2_ref[...]
    x3 = layer_norm(x2 + f, g3_ref[...], be3_ref[...])

    o_ref[0] = x3.astype(o_ref.dtype)


# ----------------------------------------------------------------------------
# Wrapper
# ----------------------------------------------------------------------------
def sga_forward(x, y, x_mask, y_mask, params, *, n_heads):
    """Full SGA block: one fused pallas_call, grid=(B,)."""
    B, Sx, H = x.shape
    Sy = y.shape[1]
    dh = H // n_heads
    assert n_heads * dh == H
    F = params["ffn"]["w1"].shape[1]

    # Additive key-padding bias (0 where visible, -1e9 where masked).
    x_bias = x_mask.reshape(B, 1, Sx).astype(jnp.float32) * NEG_INF
    y_bias = y_mask.reshape(B, 1, Sy).astype(jnp.float32) * NEG_INF

    def bf(w):
        return w.astype(jnp.bfloat16)

    def row(v):
        return v.reshape(1, -1).astype(jnp.float32)

    p1, p2, pf = params["mhatt1"], params["mhatt2"], params["ffn"]
    operands = [
        x, y, x_bias, y_bias,
        bf(p1["wq"]), row(p1["bq"]), bf(p1["wk"]), row(p1["bk"]),
        bf(p1["wv"]), row(p1["bv"]), bf(p1["wm"]), row(p1["bm"]),
        row(params["ln1_g"]), row(params["ln1_b"]),
        bf(p2["wq"]), row(p2["bq"]), bf(p2["wk"]), row(p2["bk"]),
        bf(p2["wv"]), row(p2["bv"]), bf(p2["wm"]), row(p2["bm"]),
        row(params["ln2_g"]), row(params["ln2_b"]),
        bf(pf["w1"]), row(pf["b1"]), bf(pf["w2"]), row(pf["b2"]),
        row(params["ln3_g"]), row(params["ln3_b"]),
    ]

    act_specs = [
        pl.BlockSpec((1, Sx, H), lambda b: (b, 0, 0)),   # x (residual + q/kv of layer 1)
        pl.BlockSpec((1, Sy, H), lambda b: (b, 0, 0)),   # y (k/v of layer 2)
        pl.BlockSpec((1, 1, Sx), lambda b: (b, 0, 0)),   # x additive mask bias
        pl.BlockSpec((1, 1, Sy), lambda b: (b, 0, 0)),   # y additive mask bias
    ]
    # All weights / biases / LN params are 2-D and resident across the grid.
    wgt_specs = [pl.BlockSpec(op.shape, lambda b: (0, 0)) for op in operands[4:]]

    kernel = functools.partial(_sga_kernel, n_heads=n_heads, head_dim=dh)

    flops = B * (2 * H * H * (6 * Sx + 2 * Sy) + 4 * Sx * H * (Sx + Sy + F))
    bytes_accessed = (4 * B * (2 * Sx * H + Sy * H + Sx + Sy)
                      + 2 * (8 * H * H + 2 * H * F) + 4 * (16 * H + F))

    Smax = max(Sx, Sy)
    out = pl.pallas_call(
        kernel,
        out_shape=jax.ShapeDtypeStruct((B, Sx, H), x.dtype),
        grid_spec=pltpu.PrefetchScalarGridSpec(
            num_scalar_prefetch=0,
            grid=(B,),
            in_specs=act_specs + wgt_specs,
            out_specs=pl.BlockSpec((1, Sx, H), lambda b: (b, 0, 0)),
            scratch_shapes=[
                pltpu.VMEM((n_heads, Sx, dh), jnp.float32),    # Q heads slab
                pltpu.VMEM((n_heads, Smax, dh), jnp.float32),  # K heads slab
                pltpu.VMEM((n_heads, Smax, dh), jnp.float32),  # V heads slab
                pltpu.VMEM((Sx, H), jnp.float32),              # merged-heads slab
            ]),
        compiler_params=pltpu.CompilerParams(
            dimension_semantics=("parallel",)),
        cost_estimate=pl.CostEstimate(
            flops=flops,
            transcendentals=B * n_heads * Sx * (Sx + Sy),
            bytes_accessed=bytes_accessed),
    )(*operands)
    return out


# ----------------------------------------------------------------------------
# Pure-JAX reference (mirrors the PyTorch module in eval mode)
# ----------------------------------------------------------------------------
def _mhatt_ref(v_in, k_in, q_in, mask, p, n_heads):
    B, Sq, H = q_in.shape
    dh = H // n_heads
    q = q_in @ p["wq"] + p["bq"]
    k = k_in @ p["wk"] + p["bk"]
    v = v_in @ p["wv"] + p["bv"]

    def split(t):
        return jnp.transpose(t.reshape(B, -1, n_heads, dh), (0, 2, 1, 3))

    q, k, v = split(q), split(k), split(v)
    s = (q @ jnp.swapaxes(k, -2, -1)) / math.sqrt(dh)
    s = jnp.where(mask, NEG_INF, s)
    a = jax.nn.softmax(s, axis=-1)
    o = jnp.transpose(a @ v, (0, 2, 1, 3)).reshape(B, Sq, H)
    return o @ p["wm"] + p["bm"]


def sga_reference(x, y, x_mask, y_mask, params, *, n_heads):
    x = _layer_norm_ref(x + _mhatt_ref(x, x, x, x_mask, params["mhatt1"], n_heads),
                        params["ln1_g"], params["ln1_b"])
    x = _layer_norm_ref(x + _mhatt_ref(y, y, x, y_mask, params["mhatt2"], n_heads),
                        params["ln2_g"], params["ln2_b"])
    f = jnp.maximum(x @ params["ffn"]["w1"] + params["ffn"]["b1"], 0.0)
    f = f @ params["ffn"]["w2"] + params["ffn"]["b2"]
    return _layer_norm_ref(x + f, params["ln3_g"], params["ln3_b"])


# ----------------------------------------------------------------------------
# Parameter init (matches nn.Linear default U(-1/sqrt(in), 1/sqrt(in)))
# ----------------------------------------------------------------------------
def _init_linear(key, in_size, out_size, dtype=jnp.float32):
    kw, kb = jax.random.split(key)
    bound = 1.0 / math.sqrt(in_size)
    w = jax.random.uniform(kw, (in_size, out_size), dtype, -bound, bound)
    b = jax.random.uniform(kb, (out_size,), dtype, -bound, bound)
    return w, b


def init_sga_params(key, hidden, ff_size):
    keys = jax.random.split(key, 4)

    def mhatt_params(k):
        ks = jax.random.split(k, 4)
        wq, bq = _init_linear(ks[0], hidden, hidden)
        wk, bk = _init_linear(ks[1], hidden, hidden)
        wv, bv = _init_linear(ks[2], hidden, hidden)
        wm, bm = _init_linear(ks[3], hidden, hidden)
        return dict(wq=wq, bq=bq, wk=wk, bk=bk, wv=wv, bv=bv, wm=wm, bm=bm)

    w1, b1 = _init_linear(keys[2], hidden, ff_size)
    w2, b2 = _init_linear(keys[3], ff_size, hidden)
    ones = jnp.ones((hidden,), jnp.float32)
    zeros = jnp.zeros((hidden,), jnp.float32)
    return dict(
        mhatt1=mhatt_params(keys[0]),
        mhatt2=mhatt_params(keys[1]),
        ffn=dict(w1=w1, b1=b1, w2=w2, b2=b2),
        ln1_g=ones, ln1_b=zeros,
        ln2_g=ones, ln2_b=zeros,
        ln3_g=ones, ln3_b=zeros,
    )


if __name__ == "__main__":
    # Config: HIDDEN_SIZE=128, MULTI_HEAD=8 (HIDDEN_SIZE_HEAD=16), FF_SIZE=256,
    # DROPOUT_R=0.1 (identity in eval mode).
    HIDDEN_SIZE = 128
    FF_SIZE = 256
    MULTI_HEAD = 8
    B, Sx, Sy = 2, 16, 8

    key = jax.random.PRNGKey(0)
    kx, ky, kp = jax.random.split(key, 3)
    x = jax.random.normal(kx, (B, Sx, HIDDEN_SIZE), jnp.float32)
    y = jax.random.normal(ky, (B, Sy, HIDDEN_SIZE), jnp.float32)

    # PyTorch-style key-padding masks (True => masked / filled with -1e9).
    # Every sequence has >=1 valid token, so the additive-bias mask matches
    # masked_fill semantics exactly.
    x_lens = jnp.array([Sx, Sx - 3])
    y_lens = jnp.array([Sy - 2, Sy])
    x_mask = (jnp.arange(Sx)[None, :] >= x_lens[:, None]).reshape(B, 1, 1, Sx)
    y_mask = (jnp.arange(Sy)[None, :] >= y_lens[:, None]).reshape(B, 1, 1, Sy)

    params = init_sga_params(kp, HIDDEN_SIZE, FF_SIZE)

    out = sga_forward(x, y, x_mask, y_mask, params, n_heads=MULTI_HEAD)
    out = jax.block_until_ready(out)

    ref = sga_reference(x, y, x_mask, y_mask, params, n_heads=MULTI_HEAD)
    assert out.shape == (B, Sx, HIDDEN_SIZE)
    max_err = float(jnp.max(jnp.abs(out - ref)))
    # bf16 MXU operands + approx EUP reciprocals vs an all-f32 reference.
    assert jnp.allclose(out, ref, atol=3e-2, rtol=3e-2), f"max_err={max_err}"

    print("KERNEL_OK")
</pallas_src>

<mosaic_0001>
module attributes {stable_mosaic.version = 11 : i64} {
  func.func @_sga_kernel(%arg0: i32, %arg1: memref<1x16x128xf32, #tpu.memory_space<vmem>>, %arg2: memref<1x8x128xf32, #tpu.memory_space<vmem>>, %arg3: memref<1x1x16xf32, #tpu.memory_space<vmem>>, %arg4: memref<1x1x8xf32, #tpu.memory_space<vmem>>, %arg5: memref<128x128xbf16, #tpu.memory_space<vmem>>, %arg6: memref<1x128xf32, #tpu.memory_space<vmem>>, %arg7: memref<128x128xbf16, #tpu.memory_space<vmem>>, %arg8: memref<1x128xf32, #tpu.memory_space<vmem>>, %arg9: memref<128x128xbf16, #tpu.memory_space<vmem>>, %arg10: memref<1x128xf32, #tpu.memory_space<vmem>>, %arg11: memref<128x128xbf16, #tpu.memory_space<vmem>>, %arg12: memref<1x128xf32, #tpu.memory_space<vmem>>, %arg13: memref<1x128xf32, #tpu.memory_space<vmem>>, %arg14: memref<1x128xf32, #tpu.memory_space<vmem>>, %arg15: memref<128x128xbf16, #tpu.memory_space<vmem>>, %arg16: memref<1x128xf32, #tpu.memory_space<vmem>>, %arg17: memref<128x128xbf16, #tpu.memory_space<vmem>>, %arg18: memref<1x128xf32, #tpu.memory_space<vmem>>, %arg19: memref<128x128xbf16, #tpu.memory_space<vmem>>, %arg20: memref<1x128xf32, #tpu.memory_space<vmem>>, %arg21: memref<128x128xbf16, #tpu.memory_space<vmem>>, %arg22: memref<1x128xf32, #tpu.memory_space<vmem>>, %arg23: memref<1x128xf32, #tpu.memory_space<vmem>>, %arg24: memref<1x128xf32, #tpu.memory_space<vmem>>, %arg25: memref<128x256xbf16, #tpu.memory_space<vmem>>, %arg26: memref<1x256xf32, #tpu.memory_space<vmem>>, %arg27: memref<256x128xbf16, #tpu.memory_space<vmem>>, %arg28: memref<1x128xf32, #tpu.memory_space<vmem>>, %arg29: memref<1x128xf32, #tpu.memory_space<vmem>>, %arg30: memref<1x128xf32, #tpu.memory_space<vmem>>, %arg31: memref<1x16x128xf32, #tpu.memory_space<vmem>>, %arg32: memref<8x16x16xf32, #tpu.memory_space<vmem>>, %arg33: memref<8x16x16xf32, #tpu.memory_space<vmem>>, %arg34: memref<8x16x16xf32, #tpu.memory_space<vmem>>, %arg35: memref<16x128xf32, #tpu.memory_space<vmem>>) attributes {dimension_semantics = [#tpu.dimension_semantics<parallel>], iteration_bounds = array<i64: 2>, scalar_prefetch = 0 : i64, scratch_operands = 4 : i64, tpu.core_type = #tpu.core_type<tc>, window_params = [{transform_indices = @transform_0, window_bounds = array<i64: 1, 16, 128>}, {transform_indices = @transform_1, window_bounds = array<i64: 1, 8, 128>}, {transform_indices = @transform_2, window_bounds = array<i64: 1, 1, 16>}, {transform_indices = @transform_3, window_bounds = array<i64: 1, 1, 8>}, {pipeline_mode = #tpu.pipeline_mode<synchronous>, transform_indices = @transform_4, window_bounds = array<i64: 128, 128>}, {pipeline_mode = #tpu.pipeline_mode<synchronous>, transform_indices = @transform_5, window_bounds = array<i64: 1, 128>}, {pipeline_mode = #tpu.pipeline_mode<synchronous>, transform_indices = @transform_6, window_bounds = array<i64: 128, 128>}, {pipeline_mode = #tpu.pipeline_mode<synchronous>, transform_indices = @transform_7, window_bounds = array<i64: 1, 128>}, {pipeline_mode = #tpu.pipeline_mode<synchronous>, transform_indices = @transform_8, window_bounds = array<i64: 128, 128>}, {pipeline_mode = #tpu.pipeline_mode<synchronous>, transform_indices = @transform_9, window_bounds = array<i64: 1, 128>}, {pipeline_mode = #tpu.pipeline_mode<synchronous>, transform_indices = @transform_10, window_bounds = array<i64: 128, 128>}, {pipeline_mode = #tpu.pipeline_mode<synchronous>, transform_indices = @transform_11, window_bounds = array<i64: 1, 128>}, {pipeline_mode = #tpu.pipeline_mode<synchronous>, transform_indices = @transform_12, window_bounds = array<i64: 1, 128>}, {pipeline_mode = #tpu.pipeline_mode<synchronous>, transform_indices = @transform_13, window_bounds = array<i64: 1, 128>}, {pipeline_mode = #tpu.pipeline_mode<synchronous>, transform_indices = @transform_14, window_bounds = array<i64: 128, 128>}, {pipeline_mode = #tpu.pipeline_mode<synchronous>, transform_indices = @transform_15, window_bounds = array<i64: 1, 128>}, {pipeline_mode = #tpu.pipeline_mode<synchronous>, transform_indices = @transform_16, window_bounds = array<i64: 128, 128>}, {pipeline_mode = #tpu.pipeline_mode<synchronous>, transform_indices = @transform_17, window_bounds = array<i64: 1, 128>}, {pipeline_mode = #tpu.pipeline_mode<synchronous>, transform_indices = @transform_18, window_bounds = array<i64: 128, 128>}, {pipeline_mode = #tpu.pipeline_mode<synchronous>, transform_indices = @transform_19, window_bounds = array<i64: 1, 128>}, {pipeline_mode = #tpu.pipeline_mode<synchronous>, transform_indices = @transform_20, window_bounds = array<i64: 128, 128>}, {pipeline_mode = #tpu.pipeline_mode<synchronous>, transform_indices = @transform_21, window_bounds = array<i64: 1, 128>}, {pipeline_mode = #tpu.pipeline_mode<synchronous>, transform_indices = @transform_22, window_bounds = array<i64: 1, 128>}, {pipeline_mode = #tpu.pipeline_mode<synchronous>, transform_indices = @transform_23, window_bounds = array<i64: 1, 128>}, {pipeline_mode = #tpu.pipeline_mode<synchronous>, transform_indices = @transform_24, window_bounds = array<i64: 128, 256>}, {pipeline_mode = #tpu.pipeline_mode<synchronous>, transform_indices = @transform_25, window_bounds = array<i64: 1, 256>}, {pipeline_mode = #tpu.pipeline_mode<synchronous>, transform_indices = @transform_26, window_bounds = array<i64: 256, 128>}, {pipeline_mode = #tpu.pipeline_mode<synchronous>, transform_indices = @transform_27, window_bounds = array<i64: 1, 128>}, {pipeline_mode = #tpu.pipeline_mode<synchronous>, transform_indices = @transform_28, window_bounds = array<i64: 1, 128>}, {pipeline_mode = #tpu.pipeline_mode<synchronous>, transform_indices = @transform_29, window_bounds = array<i64: 1, 128>}, {transform_indices = @transform_30, window_bounds = array<i64: 1, 16, 128>}]} {
    %c0 = arith.constant 0 : index
    %c0_0 = arith.constant 0 : index
    %c0_1 = arith.constant 0 : index
    %0 = vector.load %arg1[%c0, %c0_0, %c0_1] : memref<1x16x128xf32, #tpu.memory_space<vmem>>, vector<1x16x128xf32>
    %1 = vector.shape_cast %0 : vector<1x16x128xf32> to vector<16x128xf32>
    %c0_2 = arith.constant 0 : index
    %c0_3 = arith.constant 0 : index
    %c0_4 = arith.constant 0 : index
    %2 = vector.load %arg2[%c0_2, %c0_3, %c0_4] : memref<1x8x128xf32, #tpu.memory_space<vmem>>, vector<1x8x128xf32>
    %3 = vector.shape_cast %2 : vector<1x8x128xf32> to vector<8x128xf32>
    %c0_5 = arith.constant 0 : index
    %c0_6 = arith.constant 0 : index
    %c0_7 = arith.constant 0 : index
    %4 = vector.load %arg3[%c0_5, %c0_6, %c0_7] : memref<1x1x16xf32, #tpu.memory_space<vmem>>, vector<1x1x16xf32>
    %5 = vector.shape_cast %4 : vector<1x1x16xf32> to vector<1x16xf32>
    %c0_8 = arith.constant 0 : index
    %c0_9 = arith.constant 0 : index
    %c0_10 = arith.constant 0 : index
    %6 = vector.load %arg4[%c0_8, %c0_9, %c0_10] : memref<1x1x8xf32, #tpu.memory_space<vmem>>, vector<1x1x8xf32>
    %7 = vector.shape_cast %6 : vector<1x1x8xf32> to vector<1x8xf32>
    %8 = arith.truncf %1 : vector<16x128xf32> to vector<16x128xbf16>
    %9 = arith.truncf %1 : vector<16x128xf32> to vector<16x128xbf16>
    %c0_11 = arith.constant 0 : index
    %c0_12 = arith.constant 0 : index
    %10 = vector.load %arg5[%c0_11, %c0_12] : memref<128x128xbf16, #tpu.memory_space<vmem>>, vector<128x128xbf16>
    %cst = arith.constant dense<0.000000e+00> : vector<16x128xf32>
    %11 = tpu.matmul %8, %10, %cst {dimension_numbers = #tpu.dot_dimension_numbers<[1], [0], [0], [1], [0, 0, 1, 1], [], []>} : vector<16x128xbf16>, vector<128x128xbf16>, vector<16x128xf32> -> vector<16x128xf32>
    %c0_13 = arith.constant 0 : index
    %c0_14 = arith.constant 0 : index
    %12 = vector.load %arg6[%c0_13, %c0_14] : memref<1x128xf32, #tpu.memory_space<vmem>>, vector<1x128xf32>
    %13 = vector.broadcast %12 : vector<1x128xf32> to vector<16x128xf32>
    %14 = arith.addf %11, %13 : vector<16x128xf32>
    %c0_15 = arith.constant 0 : index
    %c0_16 = arith.constant 0 : index
    %15 = vector.load %arg7[%c0_15, %c0_16] : memref<128x128xbf16, #tpu.memory_space<vmem>>, vector<128x128xbf16>
    %cst_17 = arith.constant dense<0.000000e+00> : vector<16x128xf32>
    %16 = tpu.matmul %9, %15, %cst_17 {dimension_numbers = #tpu.dot_dimension_numbers<[1], [0], [0], [1], [0, 0, 1, 1], [], []>} : vector<16x128xbf16>, vector<128x128xbf16>, vector<16x128xf32> -> vector<16x128xf32>
    %c0_18 = arith.constant 0 : index
    %c0_19 = arith.constant 0 : index
    %17 = vector.load %arg8[%c0_18, %c0_19] : memref<1x128xf32, #tpu.memory_space<vmem>>, vector<1x128xf32>
    %18 = vector.broadcast %17 : vector<1x128xf32> to vector<16x128xf32>
    %19 = arith.addf %16, %18 : vector<16x128xf32>
    %c0_20 = arith.constant 0 : index
    %c0_21 = arith.constant 0 : index
    %20 = vector.load %arg9[%c0_20, %c0_21] : memref<128x128xbf16, #tpu.memory_space<vmem>>, vector<128x128xbf16>
    %cst_22 = arith.constant dense<0.000000e+00> : vector<16x128xf32>
    %21 = tpu.matmul %9, %20, %cst_22 {dimension_numbers = #tpu.dot_dimension_numbers<[1], [0], [0], [1], [0, 0, 1, 1], [], []>} : vector<16x128xbf16>, vector<128x128xbf16>, vector<16x128xf32> -> vector<16x128xf32>
    %c0_23 = arith.constant 0 : index
    %c0_24 = arith.constant 0 : index
    %22 = vector.load %arg10[%c0_23, %c0_24] : memref<1x128xf32, #tpu.memory_space<vmem>>, vector<1x128xf32>
    %23 = vector.broadcast %22 : vector<1x128xf32> to vector<16x128xf32>
    %24 = arith.addf %21, %23 : vector<16x128xf32>
    %25 = vector.extract_strided_slice %14 {offsets = [0, 0], sizes = [16, 16], strides = [1, 1]} : vector<16x128xf32> to vector<16x16xf32>
    %c0_25 = arith.constant 0 : index
    %c0_26 = arith.constant 0 : index
    %c0_27 = arith.constant 0 : index
    %26 = vector.load %arg32[%c0_25, %c0_26, %c0_27] : memref<8x16x16xf32, #tpu.memory_space<vmem>>, vector<1x16x16xf32>
    %27 = vector.shape_cast %26 : vector<1x16x16xf32> to vector<16x16xf32>
    %28 = vector.shape_cast %25 : vector<16x16xf32> to vector<1x16x16xf32>
    tpu.vector_store %arg32[%c0_25, %c0_26, %c0_27], %28 {strides = array<i32>} : memref<8x16x16xf32, #tpu.memory_space<vmem>>, vector<1x16x16xf32>,
    %29 = vector.extract_strided_slice %19 {offsets = [0, 0], sizes = [16, 16], strides = [1, 1]} : vector<16x128xf32> to vector<16x16xf32>
    %c0_28 = arith.constant 0 : index
    %c0_29 = arith.constant 0 : index
    %c0_30 = arith.constant 0 : index
    %30 = vector.load %arg33[%c0_28, %c0_29, %c0_30] : memref<8x16x16xf32, #tpu.memory_space<vmem>>, vector<1x16x16xf32>
    %31 = vector.shape_cast %30 : vector<1x16x16xf32> to vector<16x16xf32>
    %32 = vector.shape_cast %29 : vector<16x16xf32> to vector<1x16x16xf32>
    tpu.vector_store %arg33[%c0_28, %c0_29, %c0_30], %32 {strides = array<i32>} : memref<8x16x16xf32, #tpu.memory_space<vmem>>, vector<1x16x16xf32>,
    %33 = vector.extract_strided_slice %24 {offsets = [0, 0], sizes = [16, 16], strides = [1, 1]} : vector<16x128xf32> to vector<16x16xf32>
    %c0_31 = arith.constant 0 : index
    %c0_32 = arith.constant 0 : index
    %c0_33 = arith.constant 0 : index
    %34 = vector.load %arg34[%c0_31, %c0_32, %c0_33] : memref<8x16x16xf32, #tpu.memory_space<vmem>>, vector<1x16x16xf32>
    %35 = vector.shape_cast %34 : vector<1x16x16xf32> to vector<16x16xf32>
    %36 = vector.shape_cast %33 : vector<16x16xf32> to vector<1x16x16xf32>
    tpu.vector_store %arg34[%c0_31, %c0_32, %c0_33], %36 {strides = array<i32>} : memref<8x16x16xf32, #tpu.memory_space<vmem>>, vector<1x16x16xf32>,
    %37 = vector.extract_strided_slice %14 {offsets = [0, 16], sizes = [16, 16], strides = [1, 1]} : vector<16x128xf32> to vector<16x16xf32>
    %c1 = arith.constant 1 : index
    %c0_34 = arith.constant 0 : index
    %c0_35 = arith.constant 0 : index
    %38 = vector.load %arg32[%c1, %c0_34, %c0_35] : memref<8x16x16xf32, #tpu.memory_space<vmem>>, vector<1x16x16xf32>
    %39 = vector.shape_cast %38 : vector<1x16x16xf32> to vector<16x16xf32>
    %40 = vector.shape_cast %37 : vector<16x16xf32> to vector<1x16x16xf32>
    tpu.vector_store %arg32[%c1, %c0_34, %c0_35], %40 {strides = array<i32>} : memref<8x16x16xf32, #tpu.memory_space<vmem>>, vector<1x16x16xf32>,
    %41 = vector.extract_strided_slice %19 {offsets = [0, 16], sizes = [16, 16], strides = [1, 1]} : vector<16x128xf32> to vector<16x16xf32>
    %c1_36 = arith.constant 1 : index
    %c0_37 = arith.constant 0 : index
    %c0_38 = arith.constant 0 : index
    %42 = vector.load %arg33[%c1_36, %c0_37, %c0_38] : memref<8x16x16xf32, #tpu.memory_space<vmem>>, vector<1x16x16xf32>
    %43 = vector.shape_cast %42 : vector<1x16x16xf32> to vector<16x16xf32>
    %44 = vector.shape_cast %41 : vector<16x16xf32> to vector<1x16x16xf32>
    tpu.vector_store %arg33[%c1_36, %c0_37, %c0_38], %44 {strides = array<i32>} : memref<8x16x16xf32, #tpu.memory_space<vmem>>, vector<1x16x16xf32>,
    %45 = vector.extract_strided_slice %24 {offsets = [0, 16], sizes = [16, 16], strides = [1, 1]} : vector<16x128xf32> to vector<16x16xf32>
    %c1_39 = arith.constant 1 : index
    %c0_40 = arith.constant 0 : index
    %c0_41 = arith.constant 0 : index
    %46 = vector.load %arg34[%c1_39, %c0_40, %c0_41] : memref<8x16x16xf32, #tpu.memory_space<vmem>>, vector<1x16x16xf32>
    %47 = vector.shape_cast %46 : vector<1x16x16xf32> to vector<16x16xf32>
    %48 = vector.shape_cast %45 : vector<16x16xf32> to vector<1x16x16xf32>
    tpu.vector_store %arg34[%c1_39, %c0_40, %c0_41], %48 {strides = array<i32>} : memref<8x16x16xf32, #tpu.memory_space<vmem>>, vector<1x16x16xf32>,
    %49 = vector.extract_strided_slice %14 {offsets = [0, 32], sizes = [16, 16], strides = [1, 1]} : vector<16x128xf32> to vector<16x16xf32>
    %c2 = arith.constant 2 : index
    %c0_42 = arith.constant 0 : index
    %c0_43 = arith.constant 0 : index
    %50 = vector.load %arg32[%c2, %c0_42, %c0_43] : memref<8x16x16xf32, #tpu.memory_space<vmem>>, vector<1x16x16xf32>
    %51 = vector.shape_cast %50 : vector<1x16x16xf32> to vector<16x16xf32>
    %52 = vector.shape_cast %49 : vector<16x16xf32> to vector<1x16x16xf32>
    tpu.vector_store %arg32[%c2, %c0_42, %c0_43], %52 {strides = array<i32>} : memref<8x16x16xf32, #tpu.memory_space<vmem>>, vector<1x16x16xf32>,
    %53 = vector.extract_strided_slice %19 {offsets = [0, 32], sizes = [16, 16], strides = [1, 1]} : vector<16x128xf32> to vector<16x16xf32>
    %c2_44 = arith.constant 2 : index
    %c0_45 = arith.constant 0 : index
    %c0_46 = arith.constant 0 : index
    %54 = vector.load %arg33[%c2_44, %c0_45, %c0_46] : memref<8x16x16xf32, #tpu.memory_space<vmem>>, vector<1x16x16xf32>
    %55 = vector.shape_cast %54 : vector<1x16x16xf32> to vector<16x16xf32>
    %56 = vector.shape_cast %53 : vector<16x16xf32> to vector<1x16x16xf32>
    tpu.vector_store %arg33[%c2_44, %c0_45, %c0_46], %56 {strides = array<i32>} : memref<8x16x16xf32, #tpu.memory_space<vmem>>, vector<1x16x16xf32>,
    %57 = vector.extract_strided_slice %24 {offsets = [0, 32], sizes = [16, 16], strides = [1, 1]} : vector<16x128xf32> to vector<16x16xf32>
    %c2_47 = arith.constant 2 : index
    %c0_48 = arith.constant 0 : index
    %c0_49 = arith.constant 0 : index
    %58 = vector.load %arg34[%c2_47, %c0_48, %c0_49] : memref<8x16x16xf32, #tpu.memory_space<vmem>>, vector<1x16x16xf32>
    %59 = vector.shape_cast %58 : vector<1x16x16xf32> to vector<16x16xf32>
    %60 = vector.shape_cast %57 : vector<16x16xf32> to vector<1x16x16xf32>
    tpu.vector_store %arg34[%c2_47, %c0_48, %c0_49], %60 {strides = array<i32>} : memref<8x16x16xf32, #tpu.memory_space<vmem>>, vector<1x16x16xf32>,
    %61 = vector.extract_strided_slice %14 {offsets = [0, 48], sizes = [16, 16], strides = [1, 1]} : vector<16x128xf32> to vector<16x16xf32>
    %c3 = arith.constant 3 : index
    %c0_50 = arith.constant 0 : index
    %c0_51 = arith.constant 0 : index
    %62 = vector.load %arg32[%c3, %c0_50, %c0_51] : memref<8x16x16xf32, #tpu.memory_space<vmem>>, vector<1x16x16xf32>
    %63 = vector.shape_cast %62 : vector<1x16x16xf32> to vector<16x16xf32>
    %64 = vector.shape_cast %61 : vector<16x16xf32> to vector<1x16x16xf32>
    tpu.vector_store %arg32[%c3, %c0_50, %c0_51], %64 {strides = array<i32>} : memref<8x16x16xf32, #tpu.memory_space<vmem>>, vector<1x16x16xf32>,
    %65 = vector.extract_strided_slice %19 {offsets = [0, 48], sizes = [16, 16], strides = [1, 1]} : vector<16x128xf32> to vector<16x16xf32>
    %c3_52 = arith.constant 3 : index
    %c0_53 = arith.constant 0 : index
    %c0_54 = arith.constant 0 : index
    %66 = vector.load %arg33[%c3_52, %c0_53, %c0_54] : memref<8x16x16xf32, #tpu.memory_space<vmem>>, vector<1x16x16xf32>
    %67 = vector.shape_cast %66 : vector<1x16x16xf32> to vector<16x16xf32>
    %68 = vector.shape_cast %65 : vector<16x16xf32> to vector<1x16x16xf32>
    tpu.vector_store %arg33[%c3_52, %c0_53, %c0_54], %68 {strides = array<i32>} : memref<8x16x16xf32, #tpu.memory_space<vmem>>, vector<1x16x16xf32>,
    %69 = vector.extract_strided_slice %24 {offsets = [0, 48], sizes = [16, 16], strides = [1, 1]} : vector<16x128xf32> to vector<16x16xf32>
    %c3_55 = arith.constant 3 : index
    %c0_56 = arith.constant 0 : index
    %c0_57 = arith.constant 0 : index
    %70 = vector.load %arg34[%c3_55, %c0_56, %c0_57] : memref<8x16x16xf32, #tpu.memory_space<vmem>>, vector<1x16x16xf32>
    %71 = vector.shape_cast %70 : vector<1x16x16xf32> to vector<16x16xf32>
    %72 = vector.shape_cast %69 : vector<16x16xf32> to vector<1x16x16xf32>
    tpu.vector_store %arg34[%c3_55, %c0_56, %c0_57], %72 {strides = array<i32>} : memref<8x16x16xf32, #tpu.memory_space<vmem>>, vector<1x16x16xf32>,
    %73 = vector.extract_strided_slice %14 {offsets = [0, 64], sizes = [16, 16], strides = [1, 1]} : vector<16x128xf32> to vector<16x16xf32>
    %c4 = arith.constant 4 : index
    %c0_58 = arith.constant 0 : index
    %c0_59 = arith.constant 0 : index
    %74 = vector.load %arg32[%c4, %c0_58, %c0_59] : memref<8x16x16xf32, #tpu.memory_space<vmem>>, vector<1x16x16xf32>
    %75 = vector.shape_cast %74 : vector<1x16x16xf32> to vector<16x16xf32>
    %76 = vector.shape_cast %73 : vector<16x16xf32> to vector<1x16x16xf32>
    tpu.vector_store %arg32[%c4, %c0_58, %c0_59], %76 {strides = array<i32>} : memref<8x16x16xf32, #tpu.memory_space<vmem>>, vector<1x16x16xf32>,
    %77 = vector.extract_strided_slice %19 {offsets = [0, 64], sizes = [16, 16], strides = [1, 1]} : vector<16x128xf32> to vector<16x16xf32>
    %c4_60 = arith.constant 4 : index
    %c0_61 = arith.constant 0 : index
    %c0_62 = arith.constant 0 : index
    %78 = vector.load %arg33[%c4_60, %c0_61, %c0_62] : memref<8x16x16xf32, #tpu.memory_space<vmem>>, vector<1x16x16xf32>
    %79 = vector.shape_cast %78 : vector<1x16x16xf32> to vector<16x16xf32>
    %80 = vector.shape_cast %77 : vector<16x16xf32> to vector<1x16x16xf32>
    tpu.vector_store %arg33[%c4_60, %c0_61, %c0_62], %80 {strides = array<i32>} : memref<8x16x16xf32, #tpu.memory_space<vmem>>, vector<1x16x16xf32>,
    %81 = vector.extract_strided_slice %24 {offsets = [0, 64], sizes = [16, 16], strides = [1, 1]} : vector<16x128xf32> to vector<16x16xf32>
    %c4_63 = arith.constant 4 : index
    %c0_64 = arith.constant 0 : index
    %c0_65 = arith.constant 0 : index
    %82 = vector.load %arg34[%c4_63, %c0_64, %c0_65] : memref<8x16x16xf32, #tpu.memory_space<vmem>>, vector<1x16x16xf32>
    %83 = vector.shape_cast %82 : vector<1x16x16xf32> to vector<16x16xf32>
    %84 = vector.shape_cast %81 : vector<16x16xf32> to vector<1x16x16xf32>
    tpu.vector_store %arg34[%c4_63, %c0_64, %c0_65], %84 {strides = array<i32>} : memref<8x16x16xf32, #tpu.memory_space<vmem>>, vector<1x16x16xf32>,
    %85 = vector.extract_strided_slice %14 {offsets = [0, 80], sizes = [16, 16], strides = [1, 1]} : vector<16x128xf32> to vector<16x16xf32>
    %c5 = arith.constant 5 : index
    %c0_66 = arith.constant 0 : index
    %c0_67 = arith.constant 0 : index
    %86 = vector.load %arg32[%c5, %c0_66, %c0_67] : memref<8x16x16xf32, #tpu.memory_space<vmem>>, vector<1x16x16xf32>
    %87 = vector.shape_cast %86 : vector<1x16x16xf32> to vector<16x16xf32>
    %88 = vector.shape_cast %85 : vector<16x16xf32> to vector<1x16x16xf32>
    tpu.vector_store %arg32[%c5, %c0_66, %c0_67], %88 {strides = array<i32>} : memref<8x16x16xf32, #tpu.memory_space<vmem>>, vector<1x16x16xf32>,
    %89 = vector.extract_strided_slice %19 {offsets = [0, 80], sizes = [16, 16], strides = [1, 1]} : vector<16x128xf32> to vector<16x16xf32>
    %c5_68 = arith.constant 5 : index
    %c0_69 = arith.constant 0 : index
    %c0_70 = arith.constant 0 : index
    %90 = vector.load %arg33[%c5_68, %c0_69, %c0_70] : memref<8x16x16xf32, #tpu.memory_space<vmem>>, vector<1x16x16xf32>
    %91 = vector.shape_cast %90 : vector<1x16x16xf32> to vector<16x16xf32>
    %92 = vector.shape_cast %89 : vector<16x16xf32> to vector<1x16x16xf32>
    tpu.vector_store %arg33[%c5_68, %c0_69, %c0_70], %92 {strides = array<i32>} : memref<8x16x16xf32, #tpu.memory_space<vmem>>, vector<1x16x16xf32>,
    %93 = vector.extract_strided_slice %24 {offsets = [0, 80], sizes = [16, 16], strides = [1, 1]} : vector<16x128xf32> to vector<16x16xf32>
    %c5_71 = arith.constant 5 : index
    %c0_72 = arith.constant 0 : index
    %c0_73 = arith.constant 0 : index
    %94 = vector.load %arg34[%c5_71, %c0_72, %c0_73] : memref<8x16x16xf32, #tpu.memory_space<vmem>>, vector<1x16x16xf32>
    %95 = vector.shape_cast %94 : vector<1x16x16xf32> to vector<16x16xf32>
    %96 = vector.shape_cast %93 : vector<16x16xf32> to vector<1x16x16xf32>
    tpu.vector_store %arg34[%c5_71, %c0_72, %c0_73], %96 {strides = array<i32>} : memref<8x16x16xf32, #tpu.memory_space<vmem>>, vector<1x16x16xf32>,
    %97 = vector.extract_strided_slice %14 {offsets = [0, 96], sizes = [16, 16], strides = [1, 1]} : vector<16x128xf32> to vector<16x16xf32>
    %c6 = arith.constant 6 : index
    %c0_74 = arith.constant 0 : index
    %c0_75 = arith.constant 0 : index
    %98 = vector.load %arg32[%c6, %c0_74, %c0_75] : memref<8x16x16xf32, #tpu.memory_space<vmem>>, vector<1x16x16xf32>
    %99 = vector.shape_cast %98 : vector<1x16x16xf32> to vector<16x16xf32>
    %100 = vector.shape_cast %97 : vector<16x16xf32> to vector<1x16x16xf32>
    tpu.vector_store %arg32[%c6, %c0_74, %c0_75], %100 {strides = array<i32>} : memref<8x16x16xf32, #tpu.memory_space<vmem>>, vector<1x16x16xf32>,
    %101 = vector.extract_strided_slice %19 {offsets = [0, 96], sizes = [16, 16], strides = [1, 1]} : vector<16x128xf32> to vector<16x16xf32>
    %c6_76 = arith.constant 6 : index
    %c0_77 = arith.constant 0 : index
    %c0_78 = arith.constant 0 : index
    %102 = vector.load %arg33[%c6_76, %c0_77, %c0_78] : memref<8x16x16xf32, #tpu.memory_space<vmem>>, vector<1x16x16xf32>
    %103 = vector.shape_cast %102 : vector<1x16x16xf32> to vector<16x16xf32>
    %104 = vector.shape_cast %101 : vector<16x16xf32> to vector<1x16x16xf32>
    tpu.vector_store %arg33[%c6_76, %c0_77, %c0_78], %104 {strides = array<i32>} : memref<8x16x16xf32, #tpu.memory_space<vmem>>, vector<1x16x16xf32>,
    %105 = vector.extract_strided_slice %24 {offsets = [0, 96], sizes = [16, 16], strides = [1, 1]} : vector<16x128xf32> to vector<16x16xf32>
    %c6_79 = arith.constant 6 : index
    %c0_80 = arith.constant 0 : index
    %c0_81 = arith.constant 0 : index
    %106 = vector.load %arg34[%c6_79, %c0_80, %c0_81] : memref<8x16x16xf32, #tpu.memory_space<vmem>>, vector<1x16x16xf32>
    %107 = vector.shape_cast %106 : vector<1x16x16xf32> to vector<16x16xf32>
    %108 = vector.shape_cast %105 : vector<16x16xf32> to vector<1x16x16xf32>
    tpu.vector_store %arg34[%c6_79, %c0_80, %c0_81], %108 {strides = array<i32>} : memref<8x16x16xf32, #tpu.memory_space<vmem>>, vector<1x16x16xf32>,
    %109 = vector.extract_strided_slice %14 {offsets = [0, 112], sizes = [16, 16], strides = [1, 1]} : vector<16x128xf32> to vector<16x16xf32>
    %c7 = arith.constant 7 : index
    %c0_82 = arith.constant 0 : index
    %c0_83 = arith.constant 0 : index
    %110 = vector.load %arg32[%c7, %c0_82, %c0_83] : memref<8x16x16xf32, #tpu.memory_space<vmem>>, vector<1x16x16xf32>
    %111 = vector.shape_cast %110 : vector<1x16x16xf32> to vector<16x16xf32>
    %112 = vector.shape_cast %109 : vector<16x16xf32> to vector<1x16x16xf32>
    tpu.vector_store %arg32[%c7, %c0_82, %c0_83], %112 {strides = array<i32>} : memref<8x16x16xf32, #tpu.memory_space<vmem>>, vector<1x16x16xf32>,
    %113 = vector.extract_strided_slice %19 {offsets = [0, 112], sizes = [16, 16], strides = [1, 1]} : vector<16x128xf32> to vector<16x16xf32>
    %c7_84 = arith.constant 7 : index
    %c0_85 = arith.constant 0 : index
    %c0_86 = arith.constant 0 : index
    %114 = vector.load %arg33[%c7_84, %c0_85, %c0_86] : memref<8x16x16xf32, #tpu.memory_space<vmem>>, vector<1x16x16xf32>
    %115 = vector.shape_cast %114 : vector<1x16x16xf32> to vector<16x16xf32>
    %116 = vector.shape_cast %113 : vector<16x16xf32> to vector<1x16x16xf32>
    tpu.vector_store %arg33[%c7_84, %c0_85, %c0_86], %116 {strides = array<i32>} : memref<8x16x16xf32, #tpu.memory_space<vmem>>, vector<1x16x16xf32>,
    %117 = vector.extract_strided_slice %24 {offsets = [0, 112], sizes = [16, 16], strides = [1, 1]} : vector<16x128xf32> to vector<16x16xf32>
    %c7_87 = arith.constant 7 : index
    %c0_88 = arith.constant 0 : index
    %c0_89 = arith.constant 0 : index
    %118 = vector.load %arg34[%c7_87, %c0_88, %c0_89] : memref<8x16x16xf32, #tpu.memory_space<vmem>>, vector<1x16x16xf32>
    %119 = vector.shape_cast %118 : vector<1x16x16xf32> to vector<16x16xf32>
    %120 = vector.shape_cast %117 : vector<16x16xf32> to vector<1x16x16xf32>
    tpu.vector_store %arg34[%c7_87, %c0_88, %c0_89], %120 {strides = array<i32>} : memref<8x16x16xf32, #tpu.memory_space<vmem>>, vector<1x16x16xf32>,
    %c0_90 = arith.constant 0 : index
    %c0_91 = arith.constant 0 : index
    %c0_92 = arith.constant 0 : index
    %121 = vector.load %arg32[%c0_90, %c0_91, %c0_92] : memref<8x16x16xf32, #tpu.memory_space<vmem>>, vector<8x16x16xf32>
    %c0_93 = arith.constant 0 : index
    %c0_94 = arith.constant 0 : index
    %c0_95 = arith.constant 0 : index
    %122 = vector.load %arg33[%c0_93, %c0_94, %c0_95] : memref<8x16x16xf32, #tpu.memory_space<vmem>>, vector<8x16x16xf32>
    %c0_96 = arith.constant 0 : index
    %c0_97 = arith.constant 0 : index
    %c0_98 = arith.constant 0 : index
    %123 = vector.load %arg34[%c0_96, %c0_97, %c0_98] : memref<8x16x16xf32, #tpu.memory_space<vmem>>, vector<8x16x16xf32>
    "tpu.trace_start"() <{level = 10 : i32, message = "hqd,hkd->hqk"}> : () -> ()
    %cst_99 = arith.constant dense<0.000000e+00> : vector<8x16x16xf32>
    %124 = tpu.matmul %121, %122, %cst_99 {dimension_numbers = #tpu.dot_dimension_numbers<[2], [2], [1], [1], [0, 0, 0, 1, 1, 1], [0], [0]>} : vector<8x16x16xf32>, vector<8x16x16xf32>, vector<8x16x16xf32> -> vector<8x16x16xf32>
    "tpu.trace_stop"() : () -> ()
    %cst_100 = arith.constant 2.500000e-01 : f32
    %125 = vector.broadcast %cst_100 : f32 to vector<8x16x16xf32>
    %126 = arith.mulf %124, %125 : vector<8x16x16xf32>
    %127 = vector.shape_cast %5 : vector<1x16xf32> to vector<1x1x16xf32>
    %128 = vector.broadcast %127 : vector<1x1x16xf32> to vector<8x16x16xf32>
    %129 = arith.addf %126, %128 : vector<8x16x16xf32>
    %cst_101 = arith.constant dense<0xFF800000> : vector<8x16xf32>
    %130 = vector.multi_reduction <maximumf>, %129, %cst_101 [2] : vector<8x16x16xf32> to vector<8x16xf32>
    %131 = vector.shape_cast %130 : vector<8x16xf32> to vector<8x16x1xf32>
    %132 = vector.broadcast %131 : vector<8x16x1xf32> to vector<8x16x16xf32>
    %133 = arith.subf %129, %132 : vector<8x16x16xf32>
    %134 = math.exp %133 : vector<8x16x16xf32>
    %cst_102 = arith.constant dense<0.000000e+00> : vector<8x16xf32>
    %135 = vector.multi_reduction <add>, %134, %cst_102 [2] : vector<8x16x16xf32> to vector<8x16xf32>
    %136 = vector.shape_cast %135 : vector<8x16xf32> to vector<8x16x1xf32>
    %137 = tpu.reciprocal %136 {approx = true} : vector<8x16x1xf32> -> vector<8x16x1xf32>
    %138 = vector.broadcast %137 : vector<8x16x1xf32> to vector<8x16x16xf32>
    %139 = arith.mulf %134, %138 : vector<8x16x16xf32>
    "tpu.trace_start"() <{level = 10 : i32, message = "hqk,hkd->hqd"}> : () -> ()
    %cst_103 = arith.constant dense<0.000000e+00> : vector<8x16x16xf32>
    %140 = tpu.matmul %139, %123, %cst_103 {dimension_numbers = #tpu.dot_dimension_numbers<[2], [1], [1], [2], [0, 0, 0, 1, 1, 2], [0], [0]>} : vector<8x16x16xf32>, vector<8x16x16xf32>, vector<8x16x16xf32> -> vector<8x16x16xf32>
    "tpu.trace_stop"() : () -> ()
    %141 = vector.extract_strided_slice %140 {offsets = [0, 0, 0], sizes = [1, 16, 16], strides = [1, 1, 1]} : vector<8x16x16xf32> to vector<1x16x16xf32>
    %142 = vector.shape_cast %141 : vector<1x16x16xf32> to vector<16x16xf32>
    %c0_104 = arith.constant 0 : index
    %c0_105 = arith.constant 0 : index
    %143 = vector.load %arg35[%c0_104, %c0_105] : memref<16x128xf32, #tpu.memory_space<vmem>>, vector<16x16xf32>
    tpu.vector_store %arg35[%c0_104, %c0_105], %142 {strides = array<i32>} : memref<16x128xf32, #tpu.memory_space<vmem>>, vector<16x16xf32>,
    %144 = vector.extract_strided_slice %140 {offsets = [1, 0, 0], sizes = [1, 16, 16], strides = [1, 1, 1]} : vector<8x16x16xf32> to vector<1x16x16xf32>
    %145 = vector.shape_cast %144 : vector<1x16x16xf32> to vector<16x16xf32>
    %c0_106 = arith.constant 0 : index
    %c16 = arith.constant 16 : index
    %146 = vector.load %arg35[%c0_106, %c16] : memref<16x128xf32, #tpu.memory_space<vmem>>, vector<16x16xf32>
    tpu.vector_store %arg35[%c0_106, %c16], %145 {strides = array<i32>} : memref<16x128xf32, #tpu.memory_space<vmem>>, vector<16x16xf32>,
    %147 = vector.extract_strided_slice %140 {offsets = [2, 0, 0], sizes = [1, 16, 16], strides = [1, 1, 1]} : vector<8x16x16xf32> to vector<1x16x16xf32>
    %148 = vector.shape_cast %147 : vector<1x16x16xf32> to vector<16x16xf32>
    %c0_107 = arith.constant 0 : index
    %c32 = arith.constant 32 : index
    %149 = vector.load %arg35[%c0_107, %c32] : memref<16x128xf32, #tpu.memory_space<vmem>>, vector<16x16xf32>
    tpu.vector_store %arg35[%c0_107, %c32], %148 {strides = array<i32>} : memref<16x128xf32, #tpu.memory_space<vmem>>, vector<16x16xf32>,
    %150 = vector.extract_strided_slice %140 {offsets = [3, 0, 0], sizes = [1, 16, 16], strides = [1, 1, 1]} : vector<8x16x16xf32> to vector<1x16x16xf32>
    %151 = vector.shape_cast %150 : vector<1x16x16xf32> to vector<16x16xf32>
    %c0_108 = arith.constant 0 : index
    %c48 = arith.constant 48 : index
    %152 = vector.load %arg35[%c0_108, %c48] : memref<16x128xf32, #tpu.memory_space<vmem>>, vector<16x16xf32>
    tpu.vector_store %arg35[%c0_108, %c48], %151 {strides = array<i32>} : memref<16x128xf32, #tpu.memory_space<vmem>>, vector<16x16xf32>,
    %153 = vector.extract_strided_slice %140 {offsets = [4, 0, 0], sizes = [1, 16, 16], strides = [1, 1, 1]} : vector<8x16x16xf32> to vector<1x16x16xf32>
    %154 = vector.shape_cast %153 : vector<1x16x16xf32> to vector<16x16xf32>
    %c0_109 = arith.constant 0 : index
    %c64 = arith.constant 64 : index
    %155 = vector.load %arg35[%c0_109, %c64] : memref<16x128xf32, #tpu.memory_space<vmem>>, vector<16x16xf32>
    tpu.vector_store %arg35[%c0_109, %c64], %154 {strides = array<i32>} : memref<16x128xf32, #tpu.memory_space<vmem>>, vector<16x16xf32>,
    %156 = vector.extract_strided_slice %140 {offsets = [5, 0, 0], sizes = [1, 16, 16], strides = [1, 1, 1]} : vector<8x16x16xf32> to vector<1x16x16xf32>
    %157 = vector.shape_cast %156 : vector<1x16x16xf32> to vector<16x16xf32>
    %c0_110 = arith.constant 0 : index
    %c80 = arith.constant 80 : index
    %158 = vector.load %arg35[%c0_110, %c80] : memref<16x128xf32, #tpu.memory_space<vmem>>, vector<16x16xf32>
    tpu.vector_store %arg35[%c0_110, %c80], %157 {strides = array<i32>} : memref<16x128xf32, #tpu.memory_space<vmem>>, vector<16x16xf32>,
    %159 = vector.extract_strided_slice %140 {offsets = [6, 0, 0], sizes = [1, 16, 16], strides = [1, 1, 1]} : vector<8x16x16xf32> to vector<1x16x16xf32>
    %160 = vector.shape_cast %159 : vector<1x16x16xf32> to vector<16x16xf32>
    %c0_111 = arith.constant 0 : index
    %c96 = arith.constant 96 : index
    %161 = vector.load %arg35[%c0_111, %c96] : memref<16x128xf32, #tpu.memory_space<vmem>>, vector<16x16xf32>
    tpu.vector_store %arg35[%c0_111, %c96], %160 {strides = array<i32>} : memref<16x128xf32, #tpu.memory_space<vmem>>, vector<16x16xf32>,
    %162 = vector.extract_strided_slice %140 {offsets = [7, 0, 0], sizes = [1, 16, 16], strides = [1, 1, 1]} : vector<8x16x16xf32> to vector<1x16x16xf32>
    %163 = vector.shape_cast %162 : vector<1x16x16xf32> to vector<16x16xf32>
    %c0_112 = arith.constant 0 : index
    %c112 = arith.constant 112 : index
    %164 = vector.load %arg35[%c0_112, %c112] : memref<16x128xf32, #tpu.memory_space<vmem>>, vector<16x16xf32>
    tpu.vector_store %arg35[%c0_112, %c112], %163 {strides = array<i32>} : memref<16x128xf32, #tpu.memory_space<vmem>>, vector<16x16xf32>,
    %c0_113 = arith.constant 0 : index
    %c0_114 = arith.constant 0 : index
    %165 = vector.load %arg35[%c0_113, %c0_114] : memref<16x128xf32, #tpu.memory_space<vmem>>, vector<16x128xf32>
    %166 = arith.truncf %165 : vector<16x128xf32> to vector<16x128xbf16>
    %c0_115 = arith.constant 0 : index
    %c0_116 = arith.constant 0 : index
    %167 = vector.load %arg11[%c0_115, %c0_116] : memref<128x128xbf16, #tpu.memory_space<vmem>>, vector<128x128xbf16>
    %cst_117 = arith.constant dense<0.000000e+00> : vector<16x128xf32>
    %168 = tpu.matmul %166, %167, %cst_117 {dimension_numbers = #tpu.dot_dimension_numbers<[1], [0], [0], [1], [0, 0, 1, 1], [], []>} : vector<16x128xbf16>, vector<128x128xbf16>, vector<16x128xf32> -> vector<16x128xf32>
    %c0_118 = arith.constant 0 : index
    %c0_119 = arith.constant 0 : index
    %169 = vector.load %arg12[%c0_118, %c0_119] : memref<1x128xf32, #tpu.memory_space<vmem>>, vector<1x128xf32>
    %170 = vector.broadcast %169 : vector<1x128xf32> to vector<16x128xf32>
    %171 = arith.addf %168, %170 : vector<16x128xf32>
    %172 = arith.addf %1, %171 : vector<16x128xf32>
    %c0_120 = arith.constant 0 : index
    %c0_121 = arith.constant 0 : index
    %173 = vector.load %arg13[%c0_120, %c0_121] : memref<1x128xf32, #tpu.memory_space<vmem>>, vector<1x128xf32>
    %c0_122 = arith.constant 0 : index
    %c0_123 = arith.constant 0 : index
    %174 = vector.load %arg14[%c0_122, %c0_123] : memref<1x128xf32, #tpu.memory_space<vmem>>, vector<1x128xf32>
    %cst_124 = arith.constant dense<0.000000e+00> : vector<16xf32>
    %175 = vector.multi_reduction <add>, %172, %cst_124 [1] : vector<16x128xf32> to vector<16xf32>
    %176 = vector.shape_cast %175 : vector<16xf32> to vector<16x1xf32>
    %cst_125 = arith.constant 1.280000e+02 : f32
    %177 = vector.broadcast %cst_125 : f32 to vector<16x1xf32>
    %178 = arith.divf %176, %177 : vector<16x1xf32>
    %179 = vector.broadcast %178 : vector<16x1xf32> to vector<16x128xf32>
    %180 = arith.subf %172, %179 : vector<16x128xf32>
    %181 = arith.mulf %180, %180 : vector<16x128xf32>
    %cst_126 = arith.constant dense<0.000000e+00> : vector<16xf32>
    %182 = vector.multi_reduction <add>, %181, %cst_126 [1] : vector<16x128xf32> to vector<16xf32>
    %183 = vector.shape_cast %182 : vector<16xf32> to vector<16x1xf32>
    %cst_127 = arith.constant 1.270000e+02 : f32
    %184 = vector.broadcast %cst_127 : f32 to vector<16x1xf32>
    %185 = arith.divf %183, %184 : vector<16x1xf32>
    %186 = math.sqrt %185 : vector<16x1xf32>
    %cst_128 = arith.constant 9.99999997E-7 : f32
    %187 = vector.broadcast %cst_128 : f32 to vector<16x1xf32>
    %188 = arith.addf %186, %187 : vector<16x1xf32>
    %189 = tpu.reciprocal %188 {approx = true} : vector<16x1xf32> -> vector<16x1xf32>
    %190 = vector.broadcast %173 : vector<1x128xf32> to vector<16x128xf32>
    %191 = arith.mulf %190, %180 : vector<16x128xf32>
    %192 = vector.broadcast %189 : vector<16x1xf32> to vector<16x128xf32>
    %193 = arith.mulf %191, %192 : vector<16x128xf32>
    %194 = vector.broadcast %174 : vector<1x128xf32> to vector<16x128xf32>
    %195 = arith.addf %193, %194 : vector<16x128xf32>
    %196 = arith.truncf %195 : vector<16x128xf32> to vector<16x128xbf16>
    %197 = arith.truncf %3 : vector<8x128xf32> to vector<8x128xbf16>
    %c0_129 = arith.constant 0 : index
    %c0_130 = arith.constant 0 : index
    %198 = vector.load %arg15[%c0_129, %c0_130] : memref<128x128xbf16, #tpu.memory_space<vmem>>, vector<128x128xbf16>
    %cst_131 = arith.constant dense<0.000000e+00> : vector<16x128xf32>
    %199 = tpu.matmul %196, %198, %cst_131 {dimension_numbers = #tpu.dot_dimension_numbers<[1], [0], [0], [1], [0, 0, 1, 1], [], []>} : vector<16x128xbf16>, vector<128x128xbf16>, vector<16x128xf32> -> vector<16x128xf32>
    %c0_132 = arith.constant 0 : index
    %c0_133 = arith.constant 0 : index
    %200 = vector.load %arg16[%c0_132, %c0_133] : memref<1x128xf32, #tpu.memory_space<vmem>>, vector<1x128xf32>
    %201 = vector.broadcast %200 : vector<1x128xf32> to vector<16x128xf32>
    %202 = arith.addf %199, %201 : vector<16x128xf32>
    %c0_134 = arith.constant 0 : index
    %c0_135 = arith.constant 0 : index
    %203 = vector.load %arg17[%c0_134, %c0_135] : memref<128x128xbf16, #tpu.memory_space<vmem>>, vector<128x128xbf16>
    %cst_136 = arith.constant dense<0.000000e+00> : vector<8x128xf32>
    %204 = tpu.matmul %197, %203, %cst_136 {dimension_numbers = #tpu.dot_dimension_numbers<[1], [0], [0], [1], [0, 0, 1, 1], [], []>} : vector<8x128xbf16>, vector<128x128xbf16>, vector<8x128xf32> -> vector<8x128xf32>
    %c0_137 = arith.constant 0 : index
    %c0_138 = arith.constant 0 : index
    %205 = vector.load %arg18[%c0_137, %c0_138] : memref<1x128xf32, #tpu.memory_space<vmem>>, vector<1x128xf32>
    %206 = vector.broadcast %205 : vector<1x128xf32> to vector<8x128xf32>
    %207 = arith.addf %204, %206 : vector<8x128xf32>
    %c0_139 = arith.constant 0 : index
    %c0_140 = arith.constant 0 : index
    %208 = vector.load %arg19[%c0_139, %c0_140] : memref<128x128xbf16, #tpu.memory_space<vmem>>, vector<128x128xbf16>
    %cst_141 = arith.constant dense<0.000000e+00> : vector<8x128xf32>
    %209 = tpu.matmul %197, %208, %cst_141 {dimension_numbers = #tpu.dot_dimension_numbers<[1], [0], [0], [1], [0, 0, 1, 1], [], []>} : vector<8x128xbf16>, vector<128x128xbf16>, vector<8x128xf32> -> vector<8x128xf32>
    %c0_142 = arith.constant 0 : index
    %c0_143 = arith.constant 0 : index
    %210 = vector.load %arg20[%c0_142, %c0_143] : memref<1x128xf32, #tpu.memory_space<vmem>>, vector<1x128xf32>
    %211 = vector.broadcast %210 : vector<1x128xf32> to vector<8x128xf32>
    %212 = arith.addf %209, %211 : vector<8x128xf32>
    %213 = vector.extract_strided_slice %202 {offsets = [0, 0], sizes = [16, 16], strides = [1, 1]} : vector<16x128xf32> to vector<16x16xf32>
    %c0_144 = arith.constant 0 : index
    %c0_145 = arith.constant 0 : index
    %c0_146 = arith.constant 0 : index
    %214 = vector.load %arg32[%c0_144, %c0_145, %c0_146] : memref<8x16x16xf32, #tpu.memory_space<vmem>>, vector<1x16x16xf32>
    %215 = vector.shape_cast %214 : vector<1x16x16xf32> to vector<16x16xf32>
    %216 = vector.shape_cast %213 : vector<16x16xf32> to vector<1x16x16xf32>
    tpu.vector_store %arg32[%c0_144, %c0_145, %c0_146], %216 {strides = array<i32>} : memref<8x16x16xf32, #tpu.memory_space<vmem>>, vector<1x16x16xf32>,
    %217 = vector.extract_strided_slice %207 {offsets = [0, 0], sizes = [8, 16], strides = [1, 1]} : vector<8x128xf32> to vector<8x16xf32>
    %c0_147 = arith.constant 0 : index
    %c0_148 = arith.constant 0 : index
    %c0_149 = arith.constant 0 : index
    %218 = vector.load %arg33[%c0_147, %c0_148, %c0_149] : memref<8x16x16xf32, #tpu.memory_space<vmem>>, vector<1x8x16xf32>
    %219 = vector.shape_cast %218 : vector<1x8x16xf32> to vector<8x16xf32>
    %220 = vector.shape_cast %217 : vector<8x16xf32> to vector<1x8x16xf32>
    tpu.vector_store %arg33[%c0_147, %c0_148, %c0_149], %220 {strides = array<i32>} : memref<8x16x16xf32, #tpu.memory_space<vmem>>, vector<1x8x16xf32>,
    %221 = vector.extract_strided_slice %212 {offsets = [0, 0], sizes = [8, 16], strides = [1, 1]} : vector<8x128xf32> to vector<8x16xf32>
    %c0_150 = arith.constant 0 : index
    %c0_151 = arith.constant 0 : index
    %c0_152 = arith.constant 0 : index
    %222 = vector.load %arg34[%c0_150, %c0_151, %c0_152] : memref<8x16x16xf32, #tpu.memory_space<vmem>>, vector<1x8x16xf32>
    %223 = vector.shape_cast %222 : vector<1x8x16xf32> to vector<8x16xf32>
    %224 = vector.shape_cast %221 : vector<8x16xf32> to vector<1x8x16xf32>
    tpu.vector_store %arg34[%c0_150, %c0_151, %c0_152], %224 {strides = array<i32>} : memref<8x16x16xf32, #tpu.memory_space<vmem>>, vector<1x8x16xf32>,
    %225 = vector.extract_strided_slice %202 {offsets = [0, 16], sizes = [16, 16], strides = [1, 1]} : vector<16x128xf32> to vector<16x16xf32>
    %c1_153 = arith.constant 1 : index
    %c0_154 = arith.constant 0 : index
    %c0_155 = arith.constant 0 : index
    %226 = vector.load %arg32[%c1_153, %c0_154, %c0_155] : memref<8x16x16xf32, #tpu.memory_space<vmem>>, vector<1x16x16xf32>
    %227 = vector.shape_cast %226 : vector<1x16x16xf32> to vector<16x16xf32>
    %228 = vector.shape_cast %225 : vector<16x16xf32> to vector<1x16x16xf32>
    tpu.vector_store %arg32[%c1_153, %c0_154, %c0_155], %228 {strides = array<i32>} : memref<8x16x16xf32, #tpu.memory_space<vmem>>, vector<1x16x16xf32>,
    %229 = vector.extract_strided_slice %207 {offsets = [0, 16], sizes = [8, 16], strides = [1, 1]} : vector<8x128xf32> to vector<8x16xf32>
    %c1_156 = arith.constant 1 : index
    %c0_157 = arith.constant 0 : index
    %c0_158 = arith.constant 0 : index
    %230 = vector.load %arg33[%c1_156, %c0_157, %c0_158] : memref<8x16x16xf32, #tpu.memory_space<vmem>>, vector<1x8x16xf32>
    %231 = vector.shape_cast %230 : vector<1x8x16xf32> to vector<8x16xf32>
    %232 = vector.shape_cast %229 : vector<8x16xf32> to vector<1x8x16xf32>
    tpu.vector_store %arg33[%c1_156, %c0_157, %c0_158], %232 {strides = array<i32>} : memref<8x16x16xf32, #tpu.memory_space<vmem>>, vector<1x8x16xf32>,
    %233 = vector.extract_strided_slice %212 {offsets = [0, 16], sizes = [8, 16], strides = [1, 1]} : vector<8x128xf32> to vector<8x16xf32>
    %c1_159 = arith.constant 1 : index
    %c0_160 = arith.constant 0 : index
    %c0_161 = arith.constant 0 : index
    %234 = vector.load %arg34[%c1_159, %c0_160, %c0_161] : memref<8x16x16xf32, #tpu.memory_space<vmem>>, vector<1x8x16xf32>
    %235 = vector.shape_cast %234 : vector<1x8x16xf32> to vector<8x16xf32>
    %236 = vector.shape_cast %233 : vector<8x16xf32> to vector<1x8x16xf32>
    tpu.vector_store %arg34[%c1_159, %c0_160, %c0_161], %236 {strides = array<i32>} : memref<8x16x16xf32, #tpu.memory_space<vmem>>, vector<1x8x16xf32>,
    %237 = vector.extract_strided_slice %202 {offsets = [0, 32], sizes = [16, 16], strides = [1, 1]} : vector<16x128xf32> to vector<16x16xf32>
    %c2_162 = arith.constant 2 : index
    %c0_163 = arith.constant 0 : index
    %c0_164 = arith.constant 0 : index
    %238 = vector.load %arg32[%c2_162, %c0_163, %c0_164] : memref<8x16x16xf32, #tpu.memory_space<vmem>>, vector<1x16x16xf32>
    %239 = vector.shape_cast %238 : vector<1x16x16xf32> to vector<16x16xf32>
    %240 = vector.shape_cast %237 : vector<16x16xf32> to vector<1x16x16xf32>
    tpu.vector_store %arg32[%c2_162, %c0_163, %c0_164], %240 {strides = array<i32>} : memref<8x16x16xf32, #tpu.memory_space<vmem>>, vector<1x16x16xf32>,
    %241 = vector.extract_strided_slice %207 {offsets = [0, 32], sizes = [8, 16], strides = [1, 1]} : vector<8x128xf32> to vector<8x16xf32>
    %c2_165 = arith.constant 2 : index
    %c0_166 = arith.constant 0 : index
    %c0_167 = arith.constant 0 : index
    %242 = vector.load %arg33[%c2_165, %c0_166, %c0_167] : memref<8x16x16xf32, #tpu.memory_space<vmem>>, vector<1x8x16xf32>
    %243 = vector.shape_cast %242 : vector<1x8x16xf32> to vector<8x16xf32>
    %244 = vector.shape_cast %241 : vector<8x16xf32> to vector<1x8x16xf32>
    tpu.vector_store %arg33[%c2_165, %c0_166, %c0_167], %244 {strides = array<i32>} : memref<8x16x16xf32, #tpu.memory_space<vmem>>, vector<1x8x16xf32>,
    %245 = vector.extract_strided_slice %212 {offsets = [0, 32], sizes = [8, 16], strides = [1, 1]} : vector<8x128xf32> to vector<8x16xf32>
    %c2_168 = arith.constant 2 : index
    %c0_169 = arith.constant 0 : index
    %c0_170 = arith.constant 0 : index
    %246 = vector.load %arg34[%c2_168, %c0_169, %c0_170] : memref<8x16x16xf32, #tpu.memory_space<vmem>>, vector<1x8x16xf32>
    %247 = vector.shape_cast %246 : vector<1x8x16xf32> to vector<8x16xf32>
    %248 = vector.shape_cast %245 : vector<8x16xf32> to vector<1x8x16xf32>
    tpu.vector_store %arg34[%c2_168, %c0_169, %c0_170], %248 {strides = array<i32>} : memref<8x16x16xf32, #tpu.memory_space<vmem>>, vector<1x8x16xf32>,
    %249 = vector.extract_strided_slice %202 {offsets = [0, 48], sizes = [16, 16], strides = [1, 1]} : vector<16x128xf32> to vector<16x16xf32>
    %c3_171 = arith.constant 3 : index
    %c0_172 = arith.constant 0 : index
    %c0_173 = arith.constant 0 : index
    %250 = vector.load %arg32[%c3_171, %c0_172, %c0_173] : memref<8x16x16xf32, #tpu.memory_space<vmem>>, vector<1x16x16xf32>
    %251 = vector.shape_cast %250 : vector<1x16x16xf32> to vector<16x16xf32>
    %252 = vector.shape_cast %249 : vector<16x16xf32> to vector<1x16x16xf32>
    tpu.vector_store %arg32[%c3_171, %c0_172, %c0_173], %252 {strides = array<i32>} : memref<8x16x16xf32, #tpu.memory_space<vmem>>, vector<1x16x16xf32>,
    %253 = vector.extract_strided_slice %207 {offsets = [0, 48], sizes = [8, 16], strides = [1, 1]} : vector<8x128xf32> to vector<8x16xf32>
    %c3_174 = arith.constant 3 : index
    %c0_175 = arith.constant 0 : index
    %c0_176 = arith.constant 0 : index
    %254 = vector.load %arg33[%c3_174, %c0_175, %c0_176] : memref<8x16x16xf32, #tpu.memory_space<vmem>>, vector<1x8x16xf32>
    %255 = vector.shape_cast %254 : vector<1x8x16xf32> to vector<8x16xf32>
    %256 = vector.shape_cast %253 : vector<8x16xf32> to vector<1x8x16xf32>
    tpu.vector_store %arg33[%c3_174, %c0_175, %c0_176], %256 {strides = array<i32>} : memref<8x16x16xf32, #tpu.memory_space<vmem>>, vector<1x8x16xf32>,
    %257 = vector.extract_strided_slice %212 {offsets = [0, 48], sizes = [8, 16], strides = [1, 1]} : vector<8x128xf32> to vector<8x16xf32>
    %c3_177 = arith.constant 3 : index
    %c0_178 = arith.constant 0 : index
    %c0_179 = arith.constant 0 : index
    %258 = vector.load %arg34[%c3_177, %c0_178, %c0_179] : memref<8x16x16xf32, #tpu.memory_space<vmem>>, vector<1x8x16xf32>
    %259 = vector.shape_cast %258 : vector<1x8x16xf32> to vector<8x16xf32>
    %260 = vector.shape_cast %257 : vector<8x16xf32> to vector<1x8x16xf32>
    tpu.vector_store %arg34[%c3_177, %c0_178, %c0_179], %260 {strides = array<i32>} : memref<8x16x16xf32, #tpu.memory_space<vmem>>, vector<1x8x16xf32>,
    %261 = vector.extract_strided_slice %202 {offsets = [0, 64], sizes = [16, 16], strides = [1, 1]} : vector<16x128xf32> to vector<16x16xf32>
    %c4_180 = arith.constant 4 : index
    %c0_181 = arith.constant 0 : index
    %c0_182 = arith.constant 0 : index
    %262 = vector.load %arg32[%c4_180, %c0_181, %c0_182] : memref<8x16x16xf32, #tpu.memory_space<vmem>>, vector<1x16x16xf32>
    %263 = vector.shape_cast %262 : vector<1x16x16xf32> to vector<16x16xf32>
    %264 = vector.shape_cast %261 : vector<16x16xf32> to vector<1x16x16xf32>
    tpu.vector_store %arg32[%c4_180, %c0_181, %c0_182], %264 {strides = array<i32>} : memref<8x16x16xf32, #tpu.memory_space<vmem>>, vector<1x16x16xf32>,
    %265 = vector.extract_strided_slice %207 {offsets = [0, 64], sizes = [8, 16], strides = [1, 1]} : vector<8x128xf32> to vector<8x16xf32>
    %c4_183 = arith.constant 4 : index
    %c0_184 = arith.constant 0 : index
    %c0_185 = arith.constant 0 : index
    %266 = vector.load %arg33[%c4_183, %c0_184, %c0_185] : memref<8x16x16xf32, #tpu.memory_space<vmem>>, vector<1x8x16xf32>
    %267 = vector.shape_cast %266 : vector<1x8x16xf32> to vector<8x16xf32>
    %268 = vector.shape_cast %265 : vector<8x16xf32> to vector<1x8x16xf32>
    tpu.vector_store %arg33[%c4_183, %c0_184, %c0_185], %268 {strides = array<i32>} : memref<8x16x16xf32, #tpu.memory_space<vmem>>, vector<1x8x16xf32>,
    %269 = vector.extract_strided_slice %212 {offsets = [0, 64], sizes = [8, 16], strides = [1, 1]} : vector<8x128xf32> to vector<8x16xf32>
    %c4_186 = arith.constant 4 : index
    %c0_187 = arith.constant 0 : index
    %c0_188 = arith.constant 0 : index
    %270 = vector.load %arg34[%c4_186, %c0_187, %c0_188] : memref<8x16x16xf32, #tpu.memory_space<vmem>>, vector<1x8x16xf32>
    %271 = vector.shape_cast %270 : vector<1x8x16xf32> to vector<8x16xf32>
    %272 = vector.shape_cast %269 : vector<8x16xf32> to vector<1x8x16xf32>
    tpu.vector_store %arg34[%c4_186, %c0_187, %c0_188], %272 {strides = array<i32>} : memref<8x16x16xf32, #tpu.memory_space<vmem>>, vector<1x8x16xf32>,
    %273 = vector.extract_strided_slice %202 {offsets = [0, 80], sizes = [16, 16], strides = [1, 1]} : vector<16x128xf32> to vector<16x16xf32>
    %c5_189 = arith.constant 5 : index
    %c0_190 = arith.constant 0 : index
    %c0_191 = arith.constant 0 : index
    %274 = vector.load %arg32[%c5_189, %c0_190, %c0_191] : memref<8x16x16xf32, #tpu.memory_space<vmem>>, vector<1x16x16xf32>
    %275 = vector.shape_cast %274 : vector<1x16x16xf32> to vector<16x16xf32>
    %276 = vector.shape_cast %273 : vector<16x16xf32> to vector<1x16x16xf32>
    tpu.vector_store %arg32[%c5_189, %c0_190, %c0_191], %276 {strides = array<i32>} : memref<8x16x16xf32, #tpu.memory_space<vmem>>, vector<1x16x16xf32>,
    %277 = vector.extract_strided_slice %207 {offsets = [0, 80], sizes = [8, 16], strides = [1, 1]} : vector<8x128xf32> to vector<8x16xf32>
    %c5_192 = arith.constant 5 : index
    %c0_193 = arith.constant 0 : index
    %c0_194 = arith.constant 0 : index
    %278 = vector.load %arg33[%c5_192, %c0_193, %c0_194] : memref<8x16x16xf32, #tpu.memory_space<vmem>>, vector<1x8x16xf32>
    %279 = vector.shape_cast %278 : vector<1x8x16xf32> to vector<8x16xf32>
    %280 = vector.shape_cast %277 : vector<8x16xf32> to vector<1x8x16xf32>
    tpu.vector_store %arg33[%c5_192, %c0_193, %c0_194], %280 {strides = array<i32>} : memref<8x16x16xf32, #tpu.memory_space<vmem>>, vector<1x8x16xf32>,
    %281 = vector.extract_strided_slice %212 {offsets = [0, 80], sizes = [8, 16], strides = [1, 1]} : vector<8x128xf32> to vector<8x16xf32>
    %c5_195 = arith.constant 5 : index
    %c0_196 = arith.constant 0 : index
    %c0_197 = arith.constant 0 : index
    %282 = vector.load %arg34[%c5_195, %c0_196, %c0_197] : memref<8x16x16xf32, #tpu.memory_space<vmem>>, vector<1x8x16xf32>
    %283 = vector.shape_cast %282 : vector<1x8x16xf32> to vector<8x16xf32>
    %284 = vector.shape_cast %281 : vector<8x16xf32> to vector<1x8x16xf32>
    tpu.vector_store %arg34[%c5_195, %c0_196, %c0_197], %284 {strides = array<i32>} : memref<8x16x16xf32, #tpu.memory_space<vmem>>, vector<1x8x16xf32>,
    %285 = vector.extract_strided_slice %202 {offsets = [0, 96], sizes = [16, 16], strides = [1, 1]} : vector<16x128xf32> to vector<16x16xf32>
    %c6_198 = arith.constant 6 : index
    %c0_199 = arith.constant 0 : index
    %c0_200 = arith.constant 0 : index
    %286 = vector.load %arg32[%c6_198, %c0_199, %c0_200] : memref<8x16x16xf32, #tpu.memory_space<vmem>>, vector<1x16x16xf32>
    %287 = vector.shape_cast %286 : vector<1x16x16xf32> to vector<16x16xf32>
    %288 = vector.shape_cast %285 : vector<16x16xf32> to vector<1x16x16xf32>
    tpu.vector_store %arg32[%c6_198, %c0_199, %c0_200], %288 {strides = array<i32>} : memref<8x16x16xf32, #tpu.memory_space<vmem>>, vector<1x16x16xf32>,
    %289 = vector.extract_strided_slice %207 {offsets = [0, 96], sizes = [8, 16], strides = [1, 1]} : vector<8x128xf32> to vector<8x16xf32>
    %c6_201 = arith.constant 6 : index
    %c0_202 = arith.constant 0 : index
    %c0_203 = arith.constant 0 : index
    %290 = vector.load %arg33[%c6_201, %c0_202, %c0_203] : memref<8x16x16xf32, #tpu.memory_space<vmem>>, vector<1x8x16xf32>
    %291 = vector.shape_cast %290 : vector<1x8x16xf32> to vector<8x16xf32>
    %292 = vector.shape_cast %289 : vector<8x16xf32> to vector<1x8x16xf32>
    tpu.vector_store %arg33[%c6_201, %c0_202, %c0_203], %292 {strides = array<i32>} : memref<8x16x16xf32, #tpu.memory_space<vmem>>, vector<1x8x16xf32>,
    %293 = vector.extract_strided_slice %212 {offsets = [0, 96], sizes = [8, 16], strides = [1, 1]} : vector<8x128xf32> to vector<8x16xf32>
    %c6_204 = arith.constant 6 : index
    %c0_205 = arith.constant 0 : index
    %c0_206 = arith.constant 0 : index
    %294 = vector.load %arg34[%c6_204, %c0_205, %c0_206] : memref<8x16x16xf32, #tpu.memory_space<vmem>>, vector<1x8x16xf32>
    %295 = vector.shape_cast %294 : vector<1x8x16xf32> to vector<8x16xf32>
    %296 = vector.shape_cast %293 : vector<8x16xf32> to vector<1x8x16xf32>
    tpu.vector_store %arg34[%c6_204, %c0_205, %c0_206], %296 {strides = array<i32>} : memref<8x16x16xf32, #tpu.memory_space<vmem>>, vector<1x8x16xf32>,
    %297 = vector.extract_strided_slice %202 {offsets = [0, 112], sizes = [16, 16], strides = [1, 1]} : vector<16x128xf32> to vector<16x16xf32>
    %c7_207 = arith.constant 7 : index
    %c0_208 = arith.constant 0 : index
    %c0_209 = arith.constant 0 : index
    %298 = vector.load %arg32[%c7_207, %c0_208, %c0_209] : memref<8x16x16xf32, #tpu.memory_space<vmem>>, vector<1x16x16xf32>
    %299 = vector.shape_cast %298 : vector<1x16x16xf32> to vector<16x16xf32>
    %300 = vector.shape_cast %297 : vector<16x16xf32> to vector<1x16x16xf32>
    tpu.vector_store %arg32[%c7_207, %c0_208, %c0_209], %300 {strides = array<i32>} : memref<8x16x16xf32, #tpu.memory_space<vmem>>, vector<1x16x16xf32>,
    %301 = vector.extract_strided_slice %207 {offsets = [0, 112], sizes = [8, 16], strides = [1, 1]} : vector<8x128xf32> to vector<8x16xf32>
    %c7_210 = arith.constant 7 : index
    %c0_211 = arith.constant 0 : index
    %c0_212 = arith.constant 0 : index
    %302 = vector.load %arg33[%c7_210, %c0_211, %c0_212] : memref<8x16x16xf32, #tpu.memory_space<vmem>>, vector<1x8x16xf32>
    %303 = vector.shape_cast %302 : vector<1x8x16xf32> to vector<8x16xf32>
    %304 = vector.shape_cast %301 : vector<8x16xf32> to vector<1x8x16xf32>
    tpu.vector_store %arg33[%c7_210, %c0_211, %c0_212], %304 {strides = array<i32>} : memref<8x16x16xf32, #tpu.memory_space<vmem>>, vector<1x8x16xf32>,
    %305 = vector.extract_strided_slice %212 {offsets = [0, 112], sizes = [8, 16], strides = [1, 1]} : vector<8x128xf32> to vector<8x16xf32>
    %c7_213 = arith.constant 7 : index
    %c0_214 = arith.constant 0 : index
    %c0_215 = arith.constant 0 : index
    %306 = vector.load %arg34[%c7_213, %c0_214, %c0_215] : memref<8x16x16xf32, #tpu.memory_space<vmem>>, vector<1x8x16xf32>
    %307 = vector.shape_cast %306 : vector<1x8x16xf32> to vector<8x16xf32>
    %308 = vector.shape_cast %305 : vector<8x16xf32> to vector<1x8x16xf32>
    tpu.vector_store %arg34[%c7_213, %c0_214, %c0_215], %308 {strides = array<i32>} : memref<8x16x16xf32, #tpu.memory_space<vmem>>, vector<1x8x16xf32>,
    %c0_216 = arith.constant 0 : index
    %c0_217 = arith.constant 0 : index
    %c0_218 = arith.constant 0 : index
    %309 = vector.load %arg32[%c0_216, %c0_217, %c0_218] : memref<8x16x16xf32, #tpu.memory_space<vmem>>, vector<8x16x16xf32>
    %c0_219 = arith.constant 0 : index
    %c0_220 = arith.constant 0 : index
    %c0_221 = arith.constant 0 : index
    %310 = vector.load %arg33[%c0_219, %c0_220, %c0_221] : memref<8x16x16xf32, #tpu.memory_space<vmem>>, vector<8x8x16xf32>
    %c0_222 = arith.constant 0 : index
    %c0_223 = arith.constant 0 : index
    %c0_224 = arith.constant 0 : index
    %311 = vector.load %arg34[%c0_222, %c0_223, %c0_224] : memref<8x16x16xf32, #tpu.memory_space<vmem>>, vector<8x8x16xf32>
    "tpu.trace_start"() <{level = 10 : i32, message = "hqd,hkd->hqk"}> : () -> ()
    %cst_225 = arith.constant dense<0.000000e+00> : vector<8x16x8xf32>
    %312 = tpu.matmul %309, %310, %cst_225 {dimension_numbers = #tpu.dot_dimension_numbers<[2], [2], [1], [1], [0, 0, 0, 1, 1, 1], [0], [0]>} : vector<8x16x16xf32>, vector<8x8x16xf32>, vector<8x16x8xf32> -> vector<8x16x8xf32>
    "tpu.trace_stop"() : () -> ()
    %cst_226 = arith.constant 2.500000e-01 : f32
    %313 = vector.broadcast %cst_226 : f32 to vector<8x16x8xf32>
    %314 = arith.mulf %312, %313 : vector<8x16x8xf32>
    %315 = vector.shape_cast %7 : vector<1x8xf32> to vector<1x1x8xf32>
    %316 = vector.broadcast %315 : vector<1x1x8xf32> to vector<8x16x8xf32>
    %317 = arith.addf %314, %316 : vector<8x16x8xf32>
    %cst_227 = arith.constant dense<0xFF800000> : vector<8x16xf32>
    %318 = vector.multi_reduction <maximumf>, %317, %cst_227 [2] : vector<8x16x8xf32> to vector<8x16xf32>
    %319 = vector.shape_cast %318 : vector<8x16xf32> to vector<8x16x1xf32>
    %320 = vector.broadcast %319 : vector<8x16x1xf32> to vector<8x16x8xf32>
    %321 = arith.subf %317, %320 : vector<8x16x8xf32>
    %322 = math.exp %321 : vector<8x16x8xf32>
    %cst_228 = arith.constant dense<0.000000e+00> : vector<8x16xf32>
    %323 = vector.multi_reduction <add>, %322, %cst_228 [2] : vector<8x16x8xf32> to vector<8x16xf32>
    %324 = vector.shape_cast %323 : vector<8x16xf32> to vector<8x16x1xf32>
    %325 = tpu.reciprocal %324 {approx = true} : vector<8x16x1xf32> -> vector<8x16x1xf32>
    %326 = vector.broadcast %325 : vector<8x16x1xf32> to vector<8x16x8xf32>
    %327 = arith.mulf %322, %326 : vector<8x16x8xf32>
    "tpu.trace_start"() <{level = 10 : i32, message = "hqk,hkd->hqd"}> : () -> ()
    %cst_229 = arith.constant dense<0.000000e+00> : vector<8x16x16xf32>
    %328 = tpu.matmul %327, %311, %cst_229 {dimension_numbers = #tpu.dot_dimension_numbers<[2], [1], [1], [2], [0, 0, 0, 1, 1, 2], [0], [0]>} : vector<8x16x8xf32>, vector<8x8x16xf32>, vector<8x16x16xf32> -> vector<8x16x16xf32>
    "tpu.trace_stop"() : () -> ()
    %329 = vector.extract_strided_slice %328 {offsets = [0, 0, 0], sizes = [1, 16, 16], strides = [1, 1, 1]} : vector<8x16x16xf32> to vector<1x16x16xf32>
    %330 = vector.shape_cast %329 : vector<1x16x16xf32> to vector<16x16xf32>
    %c0_230 = arith.constant 0 : index
    %c0_231 = arith.constant 0 : index
    %331 = vector.load %arg35[%c0_230, %c0_231] : memref<16x128xf32, #tpu.memory_space<vmem>>, vector<16x16xf32>
    tpu.vector_store %arg35[%c0_230, %c0_231], %330 {strides = array<i32>} : memref<16x128xf32, #tpu.memory_space<vmem>>, vector<16x16xf32>,
    %332 = vector.extract_strided_slice %328 {offsets = [1, 0, 0], sizes = [1, 16, 16], strides = [1, 1, 1]} : vector<8x16x16xf32> to vector<1x16x16xf32>
    %333 = vector.shape_cast %332 : vector<1x16x16xf32> to vector<16x16xf32>
    %c0_232 = arith.constant 0 : index
    %c16_233 = arith.constant 16 : index
    %334 = vector.load %arg35[%c0_232, %c16_233] : memref<16x128xf32, #tpu.memory_space<vmem>>, vector<16x16xf32>
    tpu.vector_store %arg35[%c0_232, %c16_233], %333 {strides = array<i32>} : memref<16x128xf32, #tpu.memory_space<vmem>>, vector<16x16xf32>,
    %335 = vector.extract_strided_slice %328 {offsets = [2, 0, 0], sizes = [1, 16, 16], strides = [1, 1, 1]} : vector<8x16x16xf32> to vector<1x16x16xf32>
    %336 = vector.shape_cast %335 : vector<1x16x16xf32> to vector<16x16xf32>
    %c0_234 = arith.constant 0 : index
    %c32_235 = arith.constant 32 : index
    %337 = vector.load %arg35[%c0_234, %c32_235] : memref<16x128xf32, #tpu.memory_space<vmem>>, vector<16x16xf32>
    tpu.vector_store %arg35[%c0_234, %c32_235], %336 {strides = array<i32>} : memref<16x128xf32, #tpu.memory_space<vmem>>, vector<16x16xf32>,
    %338 = vector.extract_strided_slice %328 {offsets = [3, 0, 0], sizes = [1, 16, 16], strides = [1, 1, 1]} : vector<8x16x16xf32> to vector<1x16x16xf32>
    %339 = vector.shape_cast %338 : vector<1x16x16xf32> to vector<16x16xf32>
    %c0_236 = arith.constant 0 : index
    %c48_237 = arith.constant 48 : index
    %340 = vector.load %arg35[%c0_236, %c48_237] : memref<16x128xf32, #tpu.memory_space<vmem>>, vector<16x16xf32>
    tpu.vector_store %arg35[%c0_236, %c48_237], %339 {strides = array<i32>} : memref<16x128xf32, #tpu.memory_space<vmem>>, vector<16x16xf32>,
    %341 = vector.extract_strided_slice %328 {offsets = [4, 0, 0], sizes = [1, 16, 16], strides = [1, 1, 1]} : vector<8x16x16xf32> to vector<1x16x16xf32>
    %342 = vector.shape_cast %341 : vector<1x16x16xf32> to vector<16x16xf32>
    %c0_238 = arith.constant 0 : index
    %c64_239 = arith.constant 64 : index
    %343 = vector.load %arg35[%c0_238, %c64_239] : memref<16x128xf32, #tpu.memory_space<vmem>>, vector<16x16xf32>
    tpu.vector_store %arg35[%c0_238, %c64_239], %342 {strides = array<i32>} : memref<16x128xf32, #tpu.memory_space<vmem>>, vector<16x16xf32>,
    %344 = vector.extract_strided_slice %328 {offsets = [5, 0, 0], sizes = [1, 16, 16], strides = [1, 1, 1]} : vector<8x16x16xf32> to vector<1x16x16xf32>
    %345 = vector.shape_cast %344 : vector<1x16x16xf32> to vector<16x16xf32>
    %c0_240 = arith.constant 0 : index
    %c80_241 = arith.constant 80 : index
    %346 = vector.load %arg35[%c0_240, %c80_241] : memref<16x128xf32, #tpu.memory_space<vmem>>, vector<16x16xf32>
    tpu.vector_store %arg35[%c0_240, %c80_241], %345 {strides = array<i32>} : memref<16x128xf32, #tpu.memory_space<vmem>>, vector<16x16xf32>,
    %347 = vector.extract_strided_slice %328 {offsets = [6, 0, 0], sizes = [1, 16, 16], strides = [1, 1, 1]} : vector<8x16x16xf32> to vector<1x16x16xf32>
    %348 = vector.shape_cast %347 : vector<1x16x16xf32> to vector<16x16xf32>
    %c0_242 = arith.constant 0 : index
    %c96_243 = arith.constant 96 : index
    %349 = vector.load %arg35[%c0_242, %c96_243] : memref<16x128xf32, #tpu.memory_space<vmem>>, vector<16x16xf32>
    tpu.vector_store %arg35[%c0_242, %c96_243], %348 {strides = array<i32>} : memref<16x128xf32, #tpu.memory_space<vmem>>, vector<16x16xf32>,
    %350 = vector.extract_strided_slice %328 {offsets = [7, 0, 0], sizes = [1, 16, 16], strides = [1, 1, 1]} : vector<8x16x16xf32> to vector<1x16x16xf32>
    %351 = vector.shape_cast %350 : vector<1x16x16xf32> to vector<16x16xf32>
    %c0_244 = arith.constant 0 : index
    %c112_245 = arith.constant 112 : index
    %352 = vector.load %arg35[%c0_244, %c112_245] : memref<16x128xf32, #tpu.memory_space<vmem>>, vector<16x16xf32>
    tpu.vector_store %arg35[%c0_244, %c112_245], %351 {strides = array<i32>} : memref<16x128xf32, #tpu.memory_space<vmem>>, vector<16x16xf32>,
    %c0_246 = arith.constant 0 : index
    %c0_247 = arith.constant 0 : index
    %353 = vector.load %arg35[%c0_246, %c0_247] : memref<16x128xf32, #tpu.memory_space<vmem>>, vector<16x128xf32>
    %354 = arith.truncf %353 : vector<16x128xf32> to vector<16x128xbf16>
    %c0_248 = arith.constant 0 : index
    %c0_249 = arith.constant 0 : index
    %355 = vector.load %arg21[%c0_248, %c0_249] : memref<128x128xbf16, #tpu.memory_space<vmem>>, vector<128x128xbf16>
    %cst_250 = arith.constant dense<0.000000e+00> : vector<16x128xf32>
    %356 = tpu.matmul %354, %355, %cst_250 {dimension_numbers = #tpu.dot_dimension_numbers<[1], [0], [0], [1], [0, 0, 1, 1], [], []>} : vector<16x128xbf16>, vector<128x128xbf16>, vector<16x128xf32> -> vector<16x128xf32>
    %c0_251 = arith.constant 0 : index
    %c0_252 = arith.constant 0 : index
    %357 = vector.load %arg22[%c0_251, %c0_252] : memref<1x128xf32, #tpu.memory_space<vmem>>, vector<1x128xf32>
    %358 = vector.broadcast %357 : vector<1x128xf32> to vector<16x128xf32>
    %359 = arith.addf %356, %358 : vector<16x128xf32>
    %360 = arith.addf %195, %359 : vector<16x128xf32>
    %c0_253 = arith.constant 0 : index
    %c0_254 = arith.constant 0 : index
    %361 = vector.load %arg23[%c0_253, %c0_254] : memref<1x128xf32, #tpu.memory_space<vmem>>, vector<1x128xf32>
    %c0_255 = arith.constant 0 : index
    %c0_256 = arith.constant 0 : index
    %362 = vector.load %arg24[%c0_255, %c0_256] : memref<1x128xf32, #tpu.memory_space<vmem>>, vector<1x128xf32>
    %cst_257 = arith.constant dense<0.000000e+00> : vector<16xf32>
    %363 = vector.multi_reduction <add>, %360, %cst_257 [1] : vector<16x128xf32> to vector<16xf32>
    %364 = vector.shape_cast %363 : vector<16xf32> to vector<16x1xf32>
    %cst_258 = arith.constant 1.280000e+02 : f32
    %365 = vector.broadcast %cst_258 : f32 to vector<16x1xf32>
    %366 = arith.divf %364, %365 : vector<16x1xf32>
    %367 = vector.broadcast %366 : vector<16x1xf32> to vector<16x128xf32>
    %368 = arith.subf %360, %367 : vector<16x128xf32>
    %369 = arith.mulf %368, %368 : vector<16x128xf32>
    %cst_259 = arith.constant dense<0.000000e+00> : vector<16xf32>
    %370 = vector.multi_reduction <add>, %369, %cst_259 [1] : vector<16x128xf32> to vector<16xf32>
    %371 = vector.shape_cast %370 : vector<16xf32> to vector<16x1xf32>
    %cst_260 = arith.constant 1.270000e+02 : f32
    %372 = vector.broadcast %cst_260 : f32 to vector<16x1xf32>
    %373 = arith.divf %371, %372 : vector<16x1xf32>
    %374 = math.sqrt %373 : vector<16x1xf32>
    %cst_261 = arith.constant 9.99999997E-7 : f32
    %375 = vector.broadcast %cst_261 : f32 to vector<16x1xf32>
    %376 = arith.addf %374, %375 : vector<16x1xf32>
    %377 = tpu.reciprocal %376 {approx = true} : vector<16x1xf32> -> vector<16x1xf32>
    %378 = vector.broadcast %361 : vector<1x128xf32> to vector<16x128xf32>
    %379 = arith.mulf %378, %368 : vector<16x128xf32>
    %380 = vector.broadcast %377 : vector<16x1xf32> to vector<16x128xf32>
    %381 = arith.mulf %379, %380 : vector<16x128xf32>
    %382 = vector.broadcast %362 : vector<1x128xf32> to vector<16x128xf32>
    %383 = arith.addf %381, %382 : vector<16x128xf32>
    %384 = arith.truncf %383 : vector<16x128xf32> to vector<16x128xbf16>
    %c0_262 = arith.constant 0 : index
    %c0_263 = arith.constant 0 : index
    %385 = vector.load %arg25[%c0_262, %c0_263] : memref<128x256xbf16, #tpu.memory_space<vmem>>, vector<128x256xbf16>
    %cst_264 = arith.constant dense<0.000000e+00> : vector<16x256xf32>
    %386 = tpu.matmul %384, %385, %cst_264 {dimension_numbers = #tpu.dot_dimension_numbers<[1], [0], [0], [1], [0, 0, 1, 1], [], []>} : vector<16x128xbf16>, vector<128x256xbf16>, vector<16x256xf32> -> vector<16x256xf32>
    %c0_265 = arith.constant 0 : index
    %c0_266 = arith.constant 0 : index
    %387 = vector.load %arg26[%c0_265, %c0_266] : memref<1x256xf32, #tpu.memory_space<vmem>>, vector<1x256xf32>
    %388 = vector.broadcast %387 : vector<1x256xf32> to vector<16x256xf32>
    %389 = arith.addf %386, %388 : vector<16x256xf32>
    %cst_267 = arith.constant 0.000000e+00 : f32
    %390 = vector.broadcast %cst_267 : f32 to vector<16x256xf32>
    %391 = arith.maximumf %389, %390 : vector<16x256xf32>
    %392 = arith.truncf %391 : vector<16x256xf32> to vector<16x256xbf16>
    %c0_268 = arith.constant 0 : index
    %c0_269 = arith.constant 0 : index
    %393 = vector.load %arg27[%c0_268, %c0_269] : memref<256x128xbf16, #tpu.memory_space<vmem>>, vector<256x128xbf16>
    %cst_270 = arith.constant dense<0.000000e+00> : vector<16x128xf32>
    %394 = tpu.matmul %392, %393, %cst_270 {dimension_numbers = #tpu.dot_dimension_numbers<[1], [0], [0], [1], [0, 0, 1, 1], [], []>} : vector<16x256xbf16>, vector<256x128xbf16>, vector<16x128xf32> -> vector<16x128xf32>
    %c0_271 = arith.constant 0 : index
    %c0_272 = arith.constant 0 : index
    %395 = vector.load %arg28[%c0_271, %c0_272] : memref<1x128xf32, #tpu.memory_space<vmem>>, vector<1x128xf32>
    %396 = vector.broadcast %395 : vector<1x128xf32> to vector<16x128xf32>
    %397 = arith.addf %394, %396 : vector<16x128xf32>
    %398 = arith.addf %383, %397 : vector<16x128xf32>
    %c0_273 = arith.constant 0 : index
    %c0_274 = arith.constant 0 : index
    %399 = vector.load %arg29[%c0_273, %c0_274] : memref<1x128xf32, #tpu.memory_space<vmem>>, vector<1x128xf32>
    %c0_275 = arith.constant 0 : index
    %c0_276 = arith.constant 0 : index
    %400 = vector.load %arg30[%c0_275, %c0_276] : memref<1x128xf32, #tpu.memory_space<vmem>>, vector<1x128xf32>
    %cst_277 = arith.constant dense<0.000000e+00> : vector<16xf32>
    %401 = vector.multi_reduction <add>, %398, %cst_277 [1] : vector<16x128xf32> to vector<16xf32>
    %402 = vector.shape_cast %401 : vector<16xf32> to vector<16x1xf32>
    %cst_278 = arith.constant 1.280000e+02 : f32
    %403 = vector.broadcast %cst_278 : f32 to vector<16x1xf32>
    %404 = arith.divf %402, %403 : vector<16x1xf32>
    %405 = vector.broadcast %404 : vector<16x1xf32> to vector<16x128xf32>
    %406 = arith.subf %398, %405 : vector<16x128xf32>
    %407 = arith.mulf %406, %406 : vector<16x128xf32>
    %cst_279 = arith.constant dense<0.000000e+00> : vector<16xf32>
    %408 = vector.multi_reduction <add>, %407, %cst_279 [1] : vector<16x128xf32> to vector<16xf32>
    %409 = vector.shape_cast %408 : vector<16xf32> to vector<16x1xf32>
    %cst_280 = arith.constant 1.270000e+02 : f32
    %410 = vector.broadcast %cst_280 : f32 to vector<16x1xf32>
    %411 = arith.divf %409, %410 : vector<16x1xf32>
    %412 = math.sqrt %411 : vector<16x1xf32>
    %cst_281 = arith.constant 9.99999997E-7 : f32
    %413 = vector.broadcast %cst_281 : f32 to vector<16x1xf32>
    %414 = arith.addf %412, %413 : vector<16x1xf32>
    %415 = tpu.reciprocal %414 {approx = true} : vector<16x1xf32> -> vector<16x1xf32>
    %416 = vector.broadcast %399 : vector<1x128xf32> to vector<16x128xf32>
    %417 = arith.mulf %416, %406 : vector<16x128xf32>
    %418 = vector.broadcast %415 : vector<16x1xf32> to vector<16x128xf32>
    %419 = arith.mulf %417, %418 : vector<16x128xf32>
    %420 = vector.broadcast %400 : vector<1x128xf32> to vector<16x128xf32>
    %421 = arith.addf %419, %420 : vector<16x128xf32>
    %c0_282 = arith.constant 0 : index
    %c0_283 = arith.constant 0 : index
    %c0_284 = arith.constant 0 : index
    %422 = vector.load %arg31[%c0_282, %c0_283, %c0_284] : memref<1x16x128xf32, #tpu.memory_space<vmem>>, vector<1x16x128xf32>
    %423 = vector.shape_cast %422 : vector<1x16x128xf32> to vector<16x128xf32>
    %424 = vector.shape_cast %421 : vector<16x128xf32> to vector<1x16x128xf32>
    tpu.vector_store %arg31[%c0_282, %c0_283, %c0_284], %424 {strides = array<i32>} : memref<1x16x128xf32, #tpu.memory_space<vmem>>, vector<1x16x128xf32>,
    return
  }
  func.func @transform_0(%arg0: i32) -> (i32, i32, i32) {
    %c0_i32 = arith.constant 0 : i32
    %c0_i32_0 = arith.constant 0 : i32
    %c0_i32_1 = arith.constant 0 : i32
    return %arg0, %c0_i32, %c0_i32_0 : i32, i32, i32
  }
  func.func @transform_1(%arg0: i32) -> (i32, i32, i32) {
    %c0_i32 = arith.constant 0 : i32
    %c0_i32_0 = arith.constant 0 : i32
    %c0_i32_1 = arith.constant 0 : i32
    return %arg0, %c0_i32, %c0_i32_0 : i32, i32, i32
  }
  func.func @transform_2(%arg0: i32) -> (i32, i32, i32) {
    %c0_i32 = arith.constant 0 : i32
    %c0_i32_0 = arith.constant 0 : i32
    %c0_i32_1 = arith.constant 0 : i32
    return %arg0, %c0_i32, %c0_i32_0 : i32, i32, i32
  }
  func.func @transform_3(%arg0: i32) -> (i32, i32, i32) {
    %c0_i32 = arith.constant 0 : i32
    %c0_i32_0 = arith.constant 0 : i32
    %c0_i32_1 = arith.constant 0 : i32
    return %arg0, %c0_i32, %c0_i32_0 : i32, i32, i32
  }
  func.func @transform_4(%arg0: i32) -> (i32, i32) {
    %c0_i32 = arith.constant 0 : i32
    %c0_i32_0 = arith.constant 0 : i32
    %c0_i32_1 = arith.constant 0 : i32
    return %c0_i32, %c0_i32_0 : i32, i32
  }
  func.func @transform_5(%arg0: i32) -> (i32, i32) {
    %c0_i32 = arith.constant 0 : i32
    %c0_i32_0 = arith.constant 0 : i32
    %c0_i32_1 = arith.constant 0 : i32
    return %c0_i32, %c0_i32_0 : i32, i32
  }
  func.func @transform_6(%arg0: i32) -> (i32, i32) {
    %c0_i32 = arith.constant 0 : i32
    %c0_i32_0 = arith.constant 0 : i32
    %c0_i32_1 = arith.constant 0 : i32
    return %c0_i32, %c0_i32_0 : i32, i32
  }
  func.func @transform_7(%arg0: i32) -> (i32, i32) {
    %c0_i32 = arith.constant 0 : i32
    %c0_i32_0 = arith.constant 0 : i32
    %c0_i32_1 = arith.constant 0 : i32
    return %c0_i32, %c0_i32_0 : i32, i32
  }
  func.func @transform_8(%arg0: i32) -> (i32, i32) {
    %c0_i32 = arith.constant 0 : i32
    %c0_i32_0 = arith.constant 0 : i32
    %c0_i32_1 = arith.constant 0 : i32
    return %c0_i32, %c0_i32_0 : i32, i32
  }
  func.func @transform_9(%arg0: i32) -> (i32, i32) {
    %c0_i32 = arith.constant 0 : i32
    %c0_i32_0 = arith.constant 0 : i32
    %c0_i32_1 = arith.constant 0 : i32
    return %c0_i32, %c0_i32_0 : i32, i32
  }
  func.func @transform_10(%arg0: i32) -> (i32, i32) {
    %c0_i32 = arith.constant 0 : i32
    %c0_i32_0 = arith.constant 0 : i32
    %c0_i32_1 = arith.constant 0 : i32
    return %c0_i32, %c0_i32_0 : i32, i32
  }
  func.func @transform_11(%arg0: i32) -> (i32, i32) {
    %c0_i32 = arith.constant 0 : i32
    %c0_i32_0 = arith.constant 0 : i32
    %c0_i32_1 = arith.constant 0 : i32
    return %c0_i32, %c0_i32_0 : i32, i32
  }
  func.func @transform_12(%arg0: i32) -> (i32, i32) {
    %c0_i32 = arith.constant 0 : i32
    %c0_i32_0 = arith.constant 0 : i32
    %c0_i32_1 = arith.constant 0 : i32
    return %c0_i32, %c0_i32_0 : i32, i32
  }
  func.func @transform_13(%arg0: i32) -> (i32, i32) {
    %c0_i32 = arith.constant 0 : i32
    %c0_i32_0 = arith.constant 0 : i32
    %c0_i32_1 = arith.constant 0 : i32
    return %c0_i32, %c0_i32_0 : i32, i32
  }
  func.func @transform_14(%arg0: i32) -> (i32, i32) {
    %c0_i32 = arith.constant 0 : i32
    %c0_i32_0 = arith.constant 0 : i32
    %c0_i32_1 = arith.constant 0 : i32
    return %c0_i32, %c0_i32_0 : i32, i32
  }
  func.func @transform_15(%arg0: i32) -> (i32, i32) {
    %c0_i32 = arith.constant 0 : i32
    %c0_i32_0 = arith.constant 0 : i32
    %c0_i32_1 = arith.constant 0 : i32
    return %c0_i32, %c0_i32_0 : i32, i32
  }
  func.func @transform_16(%arg0: i32) -> (i32, i32) {
    %c0_i32 = arith.constant 0 : i32
    %c0_i32_0 = arith.constant 0 : i32
    %c0_i32_1 = arith.constant 0 : i32
    return %c0_i32, %c0_i32_0 : i32, i32
  }
  func.func @transform_17(%arg0: i32) -> (i32, i32) {
    %c0_i32 = arith.constant 0 : i32
    %c0_i32_0 = arith.constant 0 : i32
    %c0_i32_1 = arith.constant 0 : i32
    return %c0_i32, %c0_i32_0 : i32, i32
  }
  func.func @transform_18(%arg0: i32) -> (i32, i32) {
    %c0_i32 = arith.constant 0 : i32
    %c0_i32_0 = arith.constant 0 : i32
    %c0_i32_1 = arith.constant 0 : i32
    return %c0_i32, %c0_i32_0 : i32, i32
  }
  func.func @transform_19(%arg0: i32) -> (i32, i32) {
    %c0_i32 = arith.constant 0 : i32
    %c0_i32_0 = arith.constant 0 : i32
    %c0_i32_1 = arith.constant 0 : i32
    return %c0_i32, %c0_i32_0 : i32, i32
  }
  func.func @transform_20(%arg0: i32) -> (i32, i32) {
    %c0_i32 = arith.constant 0 : i32
    %c0_i32_0 = arith.constant 0 : i32
    %c0_i32_1 = arith.constant 0 : i32
    return %c0_i32, %c0_i32_0 : i32, i32
  }
  func.func @transform_21(%arg0: i32) -> (i32, i32) {
    %c0_i32 = arith.constant 0 : i32
    %c0_i32_0 = arith.constant 0 : i32
    %c0_i32_1 = arith.constant 0 : i32
    return %c0_i32, %c0_i32_0 : i32, i32
  }
  func.func @transform_22(%arg0: i32) -> (i32, i32) {
    %c0_i32 = arith.constant 0 : i32
    %c0_i32_0 = arith.constant 0 : i32
    %c0_i32_1 = arith.constant 0 : i32
    return %c0_i32, %c0_i32_0 : i32, i32
  }
  func.func @transform_23(%arg0: i32) -> (i32, i32) {
    %c0_i32 = arith.constant 0 : i32
    %c0_i32_0 = arith.constant 0 : i32
    %c0_i32_1 = arith.constant 0 : i32
    return %c0_i32, %c0_i32_0 : i32, i32
  }
  func.func @transform_24(%arg0: i32) -> (i32, i32) {
    %c0_i32 = arith.constant 0 : i32
    %c0_i32_0 = arith.constant 0 : i32
    %c0_i32_1 = arith.constant 0 : i32
    return %c0_i32, %c0_i32_0 : i32, i32
  }
  func.func @transform_25(%arg0: i32) -> (i32, i32) {
    %c0_i32 = arith.constant 0 : i32
    %c0_i32_0 = arith.constant 0 : i32
    %c0_i32_1 = arith.constant 0 : i32
    return %c0_i32, %c0_i32_0 : i32, i32
  }
  func.func @transform_26(%arg0: i32) -> (i32, i32) {
    %c0_i32 = arith.constant 0 : i32
    %c0_i32_0 = arith.constant 0 : i32
    %c0_i32_1 = arith.constant 0 : i32
    return %c0_i32, %c0_i32_0 : i32, i32
  }
  func.func @transform_27(%arg0: i32) -> (i32, i32) {
    %c0_i32 = arith.constant 0 : i32
    %c0_i32_0 = arith.constant 0 : i32
    %c0_i32_1 = arith.constant 0 : i32
    return %c0_i32, %c0_i32_0 : i32, i32
  }
  func.func @transform_28(%arg0: i32) -> (i32, i32) {
    %c0_i32 = arith.constant 0 : i32
    %c0_i32_0 = arith.constant 0 : i32
    %c0_i32_1 = arith.constant 0 : i32
    return %c0_i32, %c0_i32_0 : i32, i32
  }
  func.func @transform_29(%arg0: i32) -> (i32, i32) {
    %c0_i32 = arith.constant 0 : i32
    %c0_i32_0 = arith.constant 0 : i32
    %c0_i32_1 = arith.constant 0 : i32
    return %c0_i32, %c0_i32_0 : i32, i32
  }
  func.func @transform_30(%arg0: i32) -> (i32, i32, i32) {
    %c0_i32 = arith.constant 0 : i32
    %c0_i32_0 = arith.constant 0 : i32
    %c0_i32_1 = arith.constant 0 : i32
    return %arg0, %c0_i32, %c0_i32_0 : i32, i32, i32
  }
}

</mosaic_0001>

<bundles_post_ra>
// kernel: tpu_custom_call.1
= control target key start
LH: loop header
LB: loop body
LE: loop exit
PB: predicated region body
PF: predicated region fallthrough
CT: control target
= control target key end

     0   :  { %s8686_s6 = smov 1   ;;  %s8687_s10 = smov 2   ;;  %s10244_s0 = inlined_call_operand.smem [shape: u32[31], index: -1, kind: input, shape index: {}] }
   0x1   :  { %s8760_s5 = sld [smem:[%s10244_s0]]   ;;  %s8688_s14 = smov 3  }
   0x2   :  { %s8765_s9 = sld [smem:[%s10244_s0 + %s8686_s6]]   ;;  %s8689_s18 = smov 4  }
   0x3   :  { %s8770_s13 = sld [smem:[%s10244_s0 + %s8687_s10]]   ;;  %s8690_s22 = smov 5  }
   0x4   :  { %s8775_s17 = sld [smem:[%s10244_s0 + %s8688_s14]]   ;;  %s8691_s26 = smov 6  }
   0x5   :  { %s8780_s21 = sld [smem:[%s10244_s0 + %s8689_s18]]   ;;  %s8692_s30 = smov 7  }
   0x6   :  { %s8785_s25 = sld [smem:[%s10244_s0 + %s8690_s22]]   ;;  %s8693_s4 = smov 8  }
   0x7   :  { %10277 = sst [smem:[#allocation49_spill]] %s8760_s5  ;;  %s8694_s10 = smov 9  }
   0x8   :  { %10278 = sst [smem:[#allocation50_spill]] %s8765_s9  ;;  %s8695_s15 = smov 10  }
   0x9   :  { %10279 = sst [smem:[#allocation51_spill]] %s8770_s13  ;;  %s8696_s20 = smov 11  }
   0xa   :  { %10280 = sst [smem:[#allocation52_spill]] %s8775_s17  ;;  %s8698_s1 = smov 13  }
   0xb   :  { %10281 = sst [smem:[#allocation53_spill]] %s8780_s21  ;;  %s8699_s7 = smov 14  }
   0xc   :  { %10282 = sst [smem:[#allocation54_spill]] %s8785_s25  ;;  %s8701_s22 = smov 16  }
   0xd   :  { %s8790_s29 = sld [smem:[%s10244_s0 + %s8691_s26]]   ;;  %s8697_s26 = smov 12  }
   0xe   :  { %s8795_s3 = sld [smem:[%s10244_s0 + %s8692_s30]]   ;;  %s8702_s28 = smov 17  }
   0xf   :  { %s8800_s8 = sld [smem:[%s10244_s0 + %s8693_s4]]  }
  0x10   :  { %s8805_s14 = sld [smem:[%s10244_s0 + %s8694_s10]]  }
  0x11   :  { %s8810_s19 = sld [smem:[%s10244_s0 + %s8695_s15]]   ;;  %s8700_s15 = smov 15  }
  0x12   :  { %s8815_s24 = sld [smem:[%s10244_s0 + %s8696_s20]]  }
  0x13   :  { %s8820_s30 = sld [smem:[%s10244_s0 + %s8697_s26]]  }
  0x14   :  { %10283 = sst [smem:[#allocation55_spill]] %s8795_s3 }
  0x15   :  { %10284 = sst [smem:[#allocation56_spill]] %s8800_s8 }
  0x16   :  { %10285 = sst [smem:[#allocation57_spill]] %s8805_s14 }
  0x17   :  { %10286 = sst [smem:[#allocation58_spill]] %s8810_s19 }
  0x18   :  { %10287 = sst [smem:[#allocation59_spill]] %s8815_s24 }
  0x19   :  { %s8825_s6 = sld [smem:[%s10244_s0 + %s8698_s1]]  }
  0x1a   :  { %s8830_s12 = sld [smem:[%s10244_s0 + %s8699_s7]]   ;;  %s8703_s7 = smov 18  }
  0x1b   :  { %s8835_s20 = sld [smem:[%s10244_s0 + %s8700_s15]]   ;;  %s8704_s15 = smov 19  }
  0x1c   :  { %s8840_s27 = sld [smem:[%s10244_s0 + %s8701_s22]]   ;;  %s8705_s22 = smov 20  }
  0x1d   :  { %s8845_s4 = sld [smem:[%s10244_s0 + %s8702_s28]]   ;;  %s8706_s28 = smov 21  }
  0x1e   :  { %s8850_s17 = sld [smem:[%s10244_s0 + %s8703_s7]]   ;;  %s8707_s7 = smov 22  }
  0x1f   :  { %10288 = sst [smem:[#allocation60_spill]] %s8825_s6 }
  0x20   :  { %10289 = sst [smem:[#allocation61_spill]] %s8830_s12 }
  0x21   :  { %10290 = sst [smem:[#allocation62_spill]] %s8835_s20 }
  0x22   :  { %10291 = sst [smem:[#allocation63_spill]] %s8840_s27 }
  0x23   :  { %10292 = sst [smem:[#allocation64_spill]] %s8845_s4 }
  0x24   :  { %10293 = sst [smem:[#allocation65_spill]] %s8850_s17 }
  0x25   :  { %s8855_s13 = sld [smem:[%s10244_s0 + %s8704_s15]]   ;;  %s8708_s15 = smov 23  }
  0x26   :  { %s8860_s9 = sld [smem:[%s10244_s0 + %s8705_s22]]   ;;  %s8709_s22 = smov 24  }
  0x27   :  { %s8865_s5 = sld [smem:[%s10244_s0 + %s8706_s28]]   ;;  %s8710_s28 = smov 25  }
  0x28   :  { %s8870_s17 = sld [smem:[%s10244_s0 + %s8707_s7]]   ;;  %s8711_s7 = smov 26  }
  0x2b   :  { %10294 = sst [smem:[#allocation66_spill]] %s8855_s13 }
  0x2c   :  { %10295 = sst [smem:[#allocation67_spill]] %s8860_s9 }
  0x2d   :  { %10296 = sst [smem:[#allocation68_spill]] %s8865_s5 }
  0x2e   :  { %10297 = sst [smem:[#allocation69_spill]] %s8870_s17 }
  0x2f   :  { %s8875_s13 = sld [smem:[%s10244_s0 + %s8708_s15]]   ;;  %s8712_s15 = smov 27  }
  0x30   :  { %s8880_s9 = sld [smem:[%s10244_s0 + %s8709_s22]]   ;;  %s8713_s22 = smov 28  }
  0x31   :  { %s8885_s5 = sld [smem:[%s10244_s0 + %s8710_s28]]   ;;  %s8714_s28 = smov 29  }
  0x32   :  { %s8890_s17 = sld [smem:[%s10244_s0 + %s8711_s7]]   ;;  %s8715_s7 = smov 30  }
  0x33   :  { %s8900_s27 = sld [smem:[%s10244_s0 + %s8713_s22]]  }
  0x35   :  { %10298 = sst [smem:[#allocation70_spill]] %s8875_s13 }
  0x36   :  { %10299 = sst [smem:[#allocation71_spill]] %s8880_s9 }
  0x37   :  { %10300 = sst [smem:[#allocation72_spill]] %s8885_s5 }
  0x38   :  { %10301 = sst [smem:[#allocation73_spill]] %s8890_s17 }
  0x39   :  { %s8895_s13 = sld [smem:[%s10244_s0 + %s8712_s15]]  }
  0x3a   :  { %10302 = sst [smem:[#allocation74_spill]] %s8900_s27 }
  0x3b   :  { %s8905_s5 = sld [smem:[%s10244_s0 + %s8714_s28]]  }
  0x3c   :  { %s8910_s17 = sld [smem:[%s10244_s0 + %s8715_s7]]  }
  0x41   :  { %10303 = sst [smem:[#allocation75_spill]] %s8905_s5 }
  0x42   :  { %10304 = sst [smem:[#allocation76_spill]] %s8910_s17 }
  0x43   :  { %66 = vsyncpa [#allocation7], 0 }
  0x44   :  { %68 = vsyncpa [#allocation7 + $0x1], 0 }
  0x45   :  { %69 = vsyncpa [#allocation10], 0 }
  0x46   :  { %71 = vsyncpa [#allocation10 + $0x1], 0 }
  0x47   :  { %72 = vsyncpa [#allocation13], 0 }
  0x48   :  { %73 = vsyncpa [#allocation16], 0 }
  0x49   :  { %74 = vsyncpa [#allocation19], 0 }
  0x4a   :  { %75 = vsyncpa [#allocation22], 0 }
  0x4b   :  { %76 = vsyncpa [#allocation25], 0 }
  0x4c   :  { %77 = vsyncpa [#allocation28], 0 }
  0x4d   :  { %78 = vsyncpa [#allocation31], 0 }
  0x4e   :  { %79 = vsyncpa [#allocation34], 0 }
  0x4f   :  { %80 = vsyncpa [#allocation8], 0 }
  0x50   :  { %82 = vsyncpa [#allocation8 + $0x1], 0  ;;  %s8912_s15 = smov 0   ;;  %s8914_s16 = smov 0  }
  0x51   :  { %s8916_s0 = smov 0   ;;  %s8918_s18 = smov 0  }
  0x52 LB: > { %s10305_s25 = sld [smem:[#allocation54_spill]]  ;;  %s10306_s24 = sld [smem:[#allocation59_spill]]  ;;  %s8684_s18 = sphi %s8918_s18, %s10375_s18   ;;  %s8680_s0 = sphi %s8916_s0, %s10374_s0   ;;  %s8676_s16 = sphi %s8914_s16, %s10373_s16   ;;  %s8672_s15 = sphi %s8912_s15, %s10372_s15  }
  0x53   : > { %s10307_s21 = sld [smem:[#allocation53_spill]]  ;;  %s10308_s20 = sld [smem:[#allocation62_spill]] }
  0x54   : > { %s10309_s19 = sld [smem:[#allocation58_spill]]  ;;  %s10310_s14 = sld [smem:[#allocation57_spill]] }
  0x55   : > { %s10311_s12 = sld [smem:[#allocation61_spill]]  ;;  %s10312_s9 = sld [smem:[#allocation71_spill]] }
  0x56   : > { %s10313_s8 = sld [smem:[#allocation56_spill]]  ;;  %s10314_s6 = sld [smem:[#allocation60_spill]] }
  0x57   : > { %s10315_s4 = sld [smem:[#allocation64_spill]]  ;;  %s10316_s3 = sld [smem:[#allocation55_spill]] }
  0x58   : > { %s8716_s22 = smov [#allocation11]   ;;  %s8933_s26 = sadd.s32 4294967295, %s8684_s18  }
  0x59   : > { %s781_s23 = sshll.u32 %s8716_s22, 4  ;;  %p6625_p0 = scmp.ge.s32.totalorder %s8684_s18, 1  ;;  %s8938_s23 = int_to_ptr.vmem [resolvable:$true] %s781_s23 }
  0x5a   : > { %p10252_p1 = scmp.eq.s32.totalorder %s8933_s26, 0  ;;  %p769_p2 = scmp.lt.s32.totalorder %s8684_s18, 3 }
  0x5b   : > { %s8717_s1 = smov [#allocation12]   ;;  %s8718_s10 = smov [#allocation15]  }
  0x5c   : > { %p8940_p3 = pnand %p6625_p0, %p769_p2  ;;  %s795_s2 = sshll.u32 %s8717_s1, 4  ;;  %s8953_s2 = int_to_ptr.vmem [resolvable:$true] %s795_s2 }
  0x5d   : > { %s819_s11 = sshll.u32 %s8718_s10, 4  ;;  %s8042_s22 = scalar_lea.hbm %s10307_s21, 1024  ;;  %s8955_s11 = int_to_ptr.vmem [resolvable:$true] %s819_s11 }
  0x5e   : > { %s10317_s28 = scalar_select %p8940_p3, 1, 0 }
  0x5f   : > { %p7590_p5 = pneg %p8940_p3  ;;  %p8043_p7 = scmp.ne.s32.totalorder %s10307_s21, %s8042_s22 }
  0x60   : > { %p8049_p11 = scmp.lt.u32.totalorder %s8042_s22, %s10307_s21 }
  0x61   : > { %p8949_p6 = pnand %p7590_p5, %p10252_p1 }
  0x63   : > { %p8961_p8 = pneg %p8949_p6 }
  0x65   : > { %p8045_p9 = pnand %p8961_p8, %p8043_p7 }
  0x67   : > { %p8046_p10 = pneg %p8045_p9 }
  0x69   : > { %p8051_p12 = pnand %p8049_p11, %p8046_p10 }
  0x6b   : > { %8054 = shalt.err (!%p8051_p12)
}
  0x6c   : > { %s8055_s1 = scalar_lea.vmem %s8938_s23, 1024  ;;  %p8063_p5 = scmp.lt.s32.totalorder %s8938_s23, %s8938_s23 }
  0x6d   : > { %p8056_p13 = scmp.ne.s32.totalorder %s8938_s23, %s8055_s1  ;;  %p8064_p4 = scmp.lt.s32.totalorder %s8055_s1, %s8055_s1 }
  0x6f   : > { %p8058_p0 = pnand %p8056_p13, %p8961_p8  ;;  %p8065_p1 = por %p8064_p4, %p8063_p5 }
  0x71   : > { %p8059_p2 = pneg %p8058_p0 }
  0x73   : > { %p8066_p3 = pnand %p8065_p1, %p8059_p2 }
  0x75   : > { %8069 = shalt.err (!%p8066_p3)
}
  0x76   : > { %s10254_s10 = smov 64   ;;  %s10256_s22 = smov 4  }
  0x77   : > { %7593 = dma.hbm_to_vmem [thread:$0]  (!%p8949_p6), %s10307_s21, 1024, %s8938_s23, [#allocation10], %s10254_s10, %s10254_s10, %s10256_s22  }
  0x78   : > { %s8070_s5 = scalar_lea.hbm %s10305_s25, 16 }
  0x79   : > { %p8071_p7 = scmp.ne.s32.totalorder %s10305_s25, %s8070_s5  ;;  %p8077_p3 = scmp.lt.u32.totalorder %s8070_s5, %s10305_s25 }
  0x7b   : > { %p8073_p4 = pnand %p8071_p7, %p8961_p8 }
  0x7d   : > { %p8074_p1 = pneg %p8073_p4 }
  0x7f   : > { %p8079_p9 = pnand %p8077_p3, %p8074_p1 }
  0x81   : > { %8082 = shalt.err (!%p8079_p9)
}
  0x82   : > { %s8083_s1 = scalar_lea.vmem %s8953_s2, 16  ;;  %s8090_s27 = scalar_lea.vmem %s8953_s2, 32 }
  0x83   : > { %p8084_p10 = scmp.ne.s32.totalorder %s8953_s2, %s8083_s1  ;;  %p8091_p13 = scmp.lt.s32.totalorder %s8953_s2, %s8953_s2 }
  0x84   : > { %p8092_p0 = scmp.lt.s32.totalorder %s8090_s27, %s8083_s1 }
  0x85   : > { %p8086_p11 = pnand %p8084_p10, %p8961_p8 }
  0x86   : > { %p8093_p2 = por %p8092_p0, %p8091_p13 }
  0x87   : > { %p8087_p12 = pneg %p8086_p11 }
  0x89   : > { %p8094_p5 = pnand %p8093_p2, %p8087_p12 }
  0x8b   : > { %8097 = shalt.err (!%p8094_p5)
}
  0x8c   : > { %7596 = dma.hbm_to_vmem [thread:$0]  (!%p8949_p6), %s10305_s25, 16, %s8953_s2, [#allocation13]  }
  0x8d   : > { %s8098_s5 = scalar_lea.hbm %s10316_s3, 16 }
  0x8e   : > { %p8099_p7 = scmp.ne.s32.totalorder %s10316_s3, %s8098_s5  ;;  %p8105_p3 = scmp.lt.u32.totalorder %s8098_s5, %s10316_s3 }
  0x90   : > { %p8101_p4 = pnand %p8099_p7, %p8961_p8 }
  0x92   : > { %p8102_p1 = pneg %p8101_p4 }
  0x94   : > { %p8107_p9 = pnand %p8105_p3, %p8102_p1 }
  0x96   : > { %8110 = shalt.err (!%p8107_p9)
}
  0x97   : > { %s8111_s27 = scalar_lea.vmem %s8955_s11, 16  ;;  %s8118_s23 = scalar_lea.vmem %s8955_s11, 32 }
  0x98   : > { %p8112_p10 = scmp.ne.s32.totalorder %s8955_s11, %s8111_s27  ;;  %p8119_p13 = scmp.lt.s32.totalorder %s8955_s11, %s8955_s11 }
  0x99   : > { %p8120_p0 = scmp.lt.s32.totalorder %s8118_s23, %s8111_s27 }
  0x9a   : > { %p8114_p11 = pnand %p8112_p10, %p8961_p8 }
  0x9b   : > { %p8121_p2 = por %p8120_p0, %p8119_p13 }
  0x9c   : > { %p8115_p12 = pneg %p8114_p11 }
  0x9e   : > { %p8122_p5 = pnand %p8121_p2, %p8115_p12 }
  0xa0   : > { %8125 = shalt.err (!%p8122_p5)
}
  0xa1   : > { %7602 = dma.hbm_to_vmem [thread:$0]  (!%p8949_p6), %s10316_s3, 16, %s8955_s11, [#allocation16]  }
  0xa2   : > { %s8721_s2 = smov [#allocation18]   ;;  %s8722_s5 = smov [#allocation21]  }
  0xa3   : > { %s843_s1 = sshll.u32 %s8721_s2, 4  ;;  %s867_s10 = sshll.u32 %s8722_s5, 4  ;;  %s844_s1 = int_to_ptr.vmem [resolvable:$true] %s843_s1  ;;  %s868_s10 = int_to_ptr.vmem [resolvable:$true] %s867_s10 }
  0xa4   : > { %s8126_s22 = scalar_lea.hbm %s10310_s14, 16 }
  0xa5   : > { %p8127_p7 = scmp.ne.s32.totalorder %s10310_s14, %s8126_s22  ;;  %p8133_p3 = scmp.lt.u32.totalorder %s8126_s22, %s10310_s14 }
  0xa7   : > { %p8129_p4 = pnand %p8127_p7, %p8961_p8 }
  0xa9   : > { %p8130_p1 = pneg %p8129_p4 }
  0xab   : > { %p8135_p9 = pnand %p8133_p3, %p8130_p1 }
  0xad   : > { %8138 = shalt.err (!%p8135_p9)
}
  0xae   : > { %s8139_s27 = scalar_lea.vmem %s844_s1, 16  ;;  %s8146_s11 = scalar_lea.vmem %s844_s1, 32 }
  0xaf   : > { %p8140_p10 = scmp.ne.s32.totalorder %s844_s1, %s8139_s27  ;;  %p8147_p13 = scmp.lt.s32.totalorder %s844_s1, %s844_s1 }
  0xb0   : > { %p8148_p0 = scmp.lt.s32.totalorder %s8146_s11, %s8139_s27 }
  0xb1   : > { %p8142_p11 = pnand %p8140_p10, %p8961_p8 }
  0xb2   : > { %p8149_p2 = por %p8148_p0, %p8147_p13 }
  0xb3   : > { %p8143_p12 = pneg %p8142_p11 }
  0xb5   : > { %p8150_p5 = pnand %p8149_p2, %p8143_p12 }
  0xb7   : > { %8153 = shalt.err (!%p8150_p5)
}
  0xb8   : > { %7608 = dma.hbm_to_vmem [thread:$0]  (!%p8949_p6), %s10310_s14, 16, %s844_s1, [#allocation19]  }
  0xb9   : > { %s8154_s22 = scalar_lea.hbm %s10306_s24, 16 }
  0xba   : > { %p8155_p7 = scmp.ne.s32.totalorder %s10306_s24, %s8154_s22  ;;  %p8161_p3 = scmp.lt.u32.totalorder %s8154_s22, %s10306_s24 }
  0xbc   : > { %p8157_p4 = pnand %p8155_p7, %p8961_p8 }
  0xbe   : > { %p8158_p1 = pneg %p8157_p4 }
  0xc0   : > { %p8163_p9 = pnand %p8161_p3, %p8158_p1 }
  0xc2   : > { %8166 = shalt.err (!%p8163_p9)
}
  0xc3   : > { %s8167_s23 = scalar_lea.vmem %s868_s10, 16  ;;  %s8174_s2 = scalar_lea.vmem %s868_s10, 32 }
  0xc4   : > { %p8168_p10 = scmp.ne.s32.totalorder %s868_s10, %s8167_s23  ;;  %p8175_p13 = scmp.lt.s32.totalorder %s868_s10, %s868_s10 }
  0xc5   : > { %p8176_p0 = scmp.lt.s32.totalorder %s8174_s2, %s8167_s23 }
  0xc6   : > { %p8170_p11 = pnand %p8168_p10, %p8961_p8 }
  0xc7   : > { %p8177_p2 = por %p8176_p0, %p8175_p13 }
  0xc8   : > { %p8171_p12 = pneg %p8170_p11 }
  0xca   : > { %p8178_p5 = pnand %p8177_p2, %p8171_p12 }
  0xcc   : > { %8181 = shalt.err (!%p8178_p5)
}
  0xcd   : > { %7614 = dma.hbm_to_vmem [thread:$0]  (!%p8949_p6), %s10306_s24, 16, %s868_s10, [#allocation22]  }
  0xce   : > { %s8723_s1 = smov [#allocation24]   ;;  %s8724_s27 = smov [#allocation27]  }
  0xcf   : > { %s889_s5 = sshll.u32 %s8723_s1, 4  ;;  %s913_s11 = sshll.u32 %s8724_s27, 4  ;;  %s890_s5 = int_to_ptr.vmem [resolvable:$true] %s889_s5  ;;  %s914_s11 = int_to_ptr.vmem [resolvable:$true] %s913_s11 }
  0xd0   : > { %s8182_s22 = scalar_lea.hbm %s10314_s6, 16 }
  0xd1   : > { %p8183_p7 = scmp.ne.s32.totalorder %s10314_s6, %s8182_s22  ;;  %p8189_p3 = scmp.lt.u32.totalorder %s8182_s22, %s10314_s6 }
  0xd3   : > { %p8185_p4 = pnand %p8183_p7, %p8961_p8 }
  0xd5   : > { %p8186_p1 = pneg %p8185_p4 }
  0xd7   : > { %p8191_p9 = pnand %p8189_p3, %p8186_p1 }
  0xd9   : > { %8194 = shalt.err (!%p8191_p9)
}
  0xda   : > { %s8195_s23 = scalar_lea.vmem %s890_s5, 16  ;;  %s8202_s10 = scalar_lea.vmem %s890_s5, 32 }
  0xdb   : > { %p8196_p10 = scmp.ne.s32.totalorder %s890_s5, %s8195_s23  ;;  %p8203_p13 = scmp.lt.s32.totalorder %s890_s5, %s890_s5 }
  0xdc   : > { %p8204_p0 = scmp.lt.s32.totalorder %s8202_s10, %s8195_s23 }
  0xdd   : > { %p8198_p11 = pnand %p8196_p10, %p8961_p8 }
  0xde   : > { %p8205_p2 = por %p8204_p0, %p8203_p13 }
  0xdf   : > { %p8199_p12 = pneg %p8198_p11 }
  0xe1   : > { %p8206_p5 = pnand %p8205_p2, %p8199_p12 }
  0xe3   : > { %8209 = shalt.err (!%p8206_p5)
}
  0xe4   : > { %7620 = dma.hbm_to_vmem [thread:$0]  (!%p8949_p6), %s10314_s6, 16, %s890_s5, [#allocation25]  }
  0xe5   : > { %s8210_s2 = scalar_lea.hbm %s10308_s20, 16 }
  0xe6   : > { %p8211_p7 = scmp.ne.s32.totalorder %s10308_s20, %s8210_s2  ;;  %p8217_p3 = scmp.lt.u32.totalorder %s8210_s2, %s10308_s20 }
  0xe8   : > { %p8213_p4 = pnand %p8211_p7, %p8961_p8 }
  0xea   : > { %p8214_p1 = pneg %p8213_p4 }
  0xec   : > { %p8219_p9 = pnand %p8217_p3, %p8214_p1 }
  0xee   : > { %8222 = shalt.err (!%p8219_p9)
}
  0xef   : > { %s8223_s1 = scalar_lea.vmem %s914_s11, 16  ;;  %s8230_s27 = scalar_lea.vmem %s914_s11, 32 }
  0xf0   : > { %p8224_p10 = scmp.ne.s32.totalorder %s914_s11, %s8223_s1  ;;  %p8231_p13 = scmp.lt.s32.totalorder %s914_s11, %s914_s11 }
  0xf1   : > { %p8232_p0 = scmp.lt.s32.totalorder %s8230_s27, %s8223_s1 }
  0xf2   : > { %p8226_p11 = pnand %p8224_p10, %p8961_p8 }
  0xf3   : > { %p8233_p2 = por %p8232_p0, %p8231_p13 }
  0xf4   : > { %p8227_p12 = pneg %p8226_p11 }
  0xf6   : > { %p8234_p5 = pnand %p8233_p2, %p8227_p12 }
  0xf8   : > { %8237 = shalt.err (!%p8234_p5)
}
  0xf9   : > { %7626 = dma.hbm_to_vmem [thread:$0]  (!%p8949_p6), %s10308_s20, 16, %s914_s11, [#allocation28]  }
  0xfa   : > { %s8725_s5 = smov [#allocation30]   ;;  %s8726_s23 = smov [#allocation33]  }
  0xfb   : > { %s937_s22 = sshll.u32 %s8725_s5, 4  ;;  %s975_s10 = sshll.u32 %s8726_s23, 4  ;;  %s938_s22 = int_to_ptr.vmem [resolvable:$true] %s937_s22  ;;  %s976_s10 = int_to_ptr.vmem [resolvable:$true] %s975_s10 }
  0xfc   : > { %s8238_s2 = scalar_lea.hbm %s10315_s4, 16 }
  0xfd   : > { %p8239_p7 = scmp.ne.s32.totalorder %s10315_s4, %s8238_s2  ;;  %p8245_p3 = scmp.lt.u32.totalorder %s8238_s2, %s10315_s4 }
  0xff   : > { %p8241_p4 = pnand %p8239_p7, %p8961_p8 }
 0x101   : > { %p8242_p1 = pneg %p8241_p4 }
 0x103   : > { %p8247_p9 = pnand %p8245_p3, %p8242_p1 }
 0x105   : > { %8250 = shalt.err (!%p8247_p9)
}
 0x106   : > { %s8251_s1 = scalar_lea.vmem %s938_s22, 16  ;;  %s8258_s11 = scalar_lea.vmem %s938_s22, 32 }
 0x107   : > { %p8252_p10 = scmp.ne.s32.totalorder %s938_s22, %s8251_s1  ;;  %p8259_p13 = scmp.lt.s32.totalorder %s938_s22, %s938_s22 }
 0x108   : > { %p8260_p0 = scmp.lt.s32.totalorder %s8258_s11, %s8251_s1 }
 0x109   : > { %p8254_p11 = pnand %p8252_p10, %p8961_p8 }
 0x10a   : > { %p8261_p2 = por %p8260_p0, %p8259_p13 }
 0x10b   : > { %p8255_p12 = pneg %p8254_p11 }
 0x10d   : > { %p8262_p5 = pnand %p8261_p2, %p8255_p12 }
 0x10f   : > { %8265 = shalt.err (!%p8262_p5)
}
 0x110   : > { %7632 = dma.hbm_to_vmem [thread:$0]  (!%p8949_p6), %s10315_s4, 16, %s938_s22, [#allocation31]  }
 0x111   : > { %s8266_s27 = scalar_lea.hbm %s10312_s9, 2048 }
 0x112   : > { %p8267_p7 = scmp.ne.s32.totalorder %s10312_s9, %s8266_s27  ;;  %p8273_p3 = scmp.lt.u32.totalorder %s8266_s27, %s10312_s9 }
 0x114   : > { %p8269_p4 = pnand %p8267_p7, %p8961_p8 }
 0x116   : > { %p8270_p1 = pneg %p8269_p4 }
 0x118   : > { %p8275_p9 = pnand %p8273_p3, %p8270_p1 }
 0x11a   : > { %8278 = shalt.err (!%p8275_p9)
}
 0x11b   : > { %s8279_s5 = scalar_lea.vmem %s976_s10, 2048  ;;  %p8287_p13 = scmp.lt.s32.totalorder %s976_s10, %s976_s10 }
 0x11c   : > { %p8280_p10 = scmp.ne.s32.totalorder %s976_s10, %s8279_s5  ;;  %p8288_p0 = scmp.lt.s32.totalorder %s8279_s5, %s8279_s5 }
 0x11e   : > { %p8282_p11 = pnand %p8280_p10, %p8961_p8  ;;  %p8289_p2 = por %p8288_p0, %p8287_p13 }
 0x120   : > { %p8283_p12 = pneg %p8282_p11 }
 0x122   : > { %p8290_p5 = pnand %p8289_p2, %p8283_p12 }
 0x124   : > { %8293 = shalt.err (!%p8290_p5)
}
 0x125   : > { %s10259_s22 = smov 128   ;;  %s10260_s23 = smov 8  }
 0x126   : > { %7638 = dma.hbm_to_vmem [thread:$0]  (!%p8949_p6), %s10312_s9, 2048, %s976_s10, [#allocation34], %s10259_s22, %s10259_s22, %s10260_s23  }
 0x127   : > { %s8729_s2 = smov [#allocation14]   ;;  %s8730_s11 = smov [#allocation17]  }
 0x128   : > { %s805_s1 = sshll.u32 %s8729_s2, 4  ;;  %s829_s27 = sshll.u32 %s8730_s11, 4  ;;  %s806_s1 = int_to_ptr.vmem [resolvable:$true] %s805_s1  ;;  %s830_s27 = int_to_ptr.vmem [resolvable:$true] %s829_s27 }
 0x129   : > { %s8294_s5 = scalar_lea.hbm %s8790_s29, 1024 }
 0x12a   : > { %p8295_p7 = scmp.ne.s32.totalorder %s8790_s29, %s8294_s5  ;;  %p8301_p3 = scmp.lt.u32.totalorder %s8294_s5, %s8790_s29 }
 0x12c   : > { %p8297_p4 = pnand %p8295_p7, %p8961_p8 }
 0x12e   : > { %p8298_p1 = pneg %p8297_p4 }
 0x130   : > { %p8303_p9 = pnand %p8301_p3, %p8298_p1 }
 0x132   : > { %8306 = shalt.err (!%p8303_p9)
}
 0x133   : > { %s8307_s3 = scalar_lea.vmem %s806_s1, 1024  ;;  %p8315_p13 = scmp.lt.s32.totalorder %s806_s1, %s806_s1 }
 0x134   : > { %p8308_p10 = scmp.ne.s32.totalorder %s806_s1, %s8307_s3  ;;  %p8316_p0 = scmp.lt.s32.totalorder %s8307_s3, %s8307_s3 }
 0x136   : > { %p8310_p11 = pnand %p8308_p10, %p8961_p8  ;;  %p8317_p2 = por %p8316_p0, %p8315_p13 }
 0x138   : > { %p8311_p12 = pneg %p8310_p11 }
 0x13a   : > { %p8318_p5 = pnand %p8317_p2, %p8311_p12 }
 0x13c   : > { %8321 = shalt.err (!%p8318_p5)
}
 0x13d   : > { %s10320_s10 = smov 4   ;;  %s10321_s2 = smov 64  }
 0x13e   : > { %7599 = dma.hbm_to_vmem [thread:$0]  (!%p8949_p6), %s8790_s29, 1024, %s806_s1, [#allocation13], %s10321_s2, %s10321_s2, %s10320_s10  }
 0x13f   : > { %s8322_s11 = scalar_lea.hbm %s10313_s8, 1024 }
 0x140   : > { %p8323_p7 = scmp.ne.s32.totalorder %s10313_s8, %s8322_s11  ;;  %p8329_p3 = scmp.lt.u32.totalorder %s8322_s11, %s10313_s8 }
 0x142   : > { %p8325_p4 = pnand %p8323_p7, %p8961_p8 }
 0x144   : > { %p8326_p1 = pneg %p8325_p4 }
 0x146   : > { %p8331_p9 = pnand %p8329_p3, %p8326_p1 }
 0x148   : > { %8334 = shalt.err (!%p8331_p9)
}
 0x149   : > { %s8335_s3 = scalar_lea.vmem %s830_s27, 1024  ;;  %p8343_p13 = scmp.lt.s32.totalorder %s830_s27, %s830_s27 }
 0x14a   : > { %p8336_p10 = scmp.ne.s32.totalorder %s830_s27, %s8335_s3  ;;  %p8344_p0 = scmp.lt.s32.totalorder %s8335_s3, %s8335_s3 }
 0x14c   : > { %p8338_p11 = pnand %p8336_p10, %p8961_p8  ;;  %p8345_p2 = por %p8344_p0, %p8343_p13 }
 0x14e   : > { %p8339_p12 = pneg %p8338_p11 }
 0x150   : > { %p8346_p5 = pnand %p8345_p2, %p8339_p12 }
 0x152   : > { %8349 = shalt.err (!%p8346_p5)
}
 0x153   : > { %7605 = dma.hbm_to_vmem [thread:$0]  (!%p8949_p6), %s10313_s8, 1024, %s830_s27, [#allocation16], %s10321_s2, %s10321_s2, %s10320_s10  }
 0x154   : > { %s8731_s1 = smov [#allocation20]   ;;  %s8732_s11 = smov [#allocation23]  }
 0x155   : > { %s853_s5 = sshll.u32 %s8731_s1, 4  ;;  %s878_s22 = sshll.u32 %s8732_s11, 4  ;;  %s854_s5 = int_to_ptr.vmem [resolvable:$true] %s853_s5  ;;  %s879_s22 = int_to_ptr.vmem [resolvable:$true] %s878_s22 }
 0x156   : > { %s8350_s3 = scalar_lea.hbm %s10309_s19, 1024 }
 0x157   : > { %p8351_p7 = scmp.ne.s32.totalorder %s10309_s19, %s8350_s3  ;;  %p8357_p3 = scmp.lt.u32.totalorder %s8350_s3, %s10309_s19 }
 0x159   : > { %p8353_p4 = pnand %p8351_p7, %p8961_p8 }
 0x15b   : > { %p8354_p1 = pneg %p8353_p4 }
 0x15d   : > { %p8359_p9 = pnand %p8357_p3, %p8354_p1 }
 0x15f   : > { %8362 = shalt.err (!%p8359_p9)
}
 0x160   : > { %s8363_s23 = scalar_lea.vmem %s854_s5, 1024  ;;  %p8371_p13 = scmp.lt.s32.totalorder %s854_s5, %s854_s5 }
 0x161   : > { %p8364_p10 = scmp.ne.s32.totalorder %s854_s5, %s8363_s23  ;;  %p8372_p0 = scmp.lt.s32.totalorder %s8363_s23, %s8363_s23 }
 0x163   : > { %p8366_p11 = pnand %p8364_p10, %p8961_p8  ;;  %p8373_p2 = por %p8372_p0, %p8371_p13 }
 0x165   : > { %p8367_p12 = pneg %p8366_p11 }
 0x167   : > { %p8374_p5 = pnand %p8373_p2, %p8367_p12 }
 0x169   : > { %8377 = shalt.err (!%p8374_p5)
}
 0x16a   : > { %7611 = dma.hbm_to_vmem [thread:$0]  (!%p8949_p6), %s10309_s19, 1024, %s854_s5, [#allocation19], %s10321_s2, %s10321_s2, %s10320_s10  }
 0x16b   : > { %s8378_s27 = scalar_lea.hbm %s8820_s30, 16 }
 0x16c   : > { %p8379_p7 = scmp.ne.s32.totalorder %s8820_s30, %s8378_s27  ;;  %p8385_p3 = scmp.lt.u32.totalorder %s8378_s27, %s8820_s30 }
 0x16e   : > { %p8381_p4 = pnand %p8379_p7, %p8961_p8 }
 0x170   : > { %p8382_p1 = pneg %p8381_p4 }
 0x172   : > { %p8387_p9 = pnand %p8385_p3, %p8382_p1 }
 0x174   : > { %8390 = shalt.err (!%p8387_p9)
}
 0x175   : > { %s8391_s23 = scalar_lea.vmem %s879_s22, 16  ;;  %s8398_s1 = scalar_lea.vmem %s879_s22, 32 }
 0x176   : > { %p8392_p10 = scmp.ne.s32.totalorder %s879_s22, %s8391_s23  ;;  %p8399_p13 = scmp.lt.s32.totalorder %s879_s22, %s879_s22 }
 0x177   : > { %p8400_p0 = scmp.lt.s32.totalorder %s8398_s1, %s8391_s23 }
 0x178   : > { %p8394_p11 = pnand %p8392_p10, %p8961_p8 }
 0x179   : > { %p8401_p2 = por %p8400_p0, %p8399_p13 }
 0x17a   : > { %p8395_p12 = pneg %p8394_p11 }
 0x17c   : > { %p8402_p5 = pnand %p8401_p2, %p8395_p12 }
 0x17e   : > { %8405 = shalt.err (!%p8402_p5)
}
 0x17f   : > { %7617 = dma.hbm_to_vmem [thread:$0]  (!%p8949_p6), %s8820_s30, 16, %s879_s22, [#allocation22]  }
 0x180   : > { %s8733_s5 = smov [#allocation26]   ;;  %s8734_s3 = smov [#allocation29]  }
 0x181   : > { %s899_s11 = sshll.u32 %s8733_s5, 4  ;;  %s923_s27 = sshll.u32 %s8734_s3, 4  ;;  %s900_s11 = int_to_ptr.vmem [resolvable:$true] %s899_s11  ;;  %s924_s27 = int_to_ptr.vmem [resolvable:$true] %s923_s27 }
 0x182   : > { %s8406_s4 = scalar_lea.hbm %s10311_s12, 1024 }
 0x183   : > { %p8407_p7 = scmp.ne.s32.totalorder %s10311_s12, %s8406_s4  ;;  %p8413_p3 = scmp.lt.u32.totalorder %s8406_s4, %s10311_s12 }
 0x185   : > { %p8409_p4 = pnand %p8407_p7, %p8961_p8 }
 0x187   : > { %p8410_p1 = pneg %p8409_p4 }
 0x189   : > { %p8415_p9 = pnand %p8413_p3, %p8410_p1 }
 0x18b   : > { %8418 = shalt.err (!%p8415_p9)
}
 0x18c   : > { %s8419_s23 = scalar_lea.vmem %s900_s11, 1024  ;;  %p8427_p13 = scmp.lt.s32.totalorder %s900_s11, %s900_s11 }
 0x18d   : > { %p8420_p10 = scmp.ne.s32.totalorder %s900_s11, %s8419_s23  ;;  %p8428_p0 = scmp.lt.s32.totalorder %s8419_s23, %s8419_s23 }
 0x18f   : > { %p8422_p11 = pnand %p8420_p10, %p8961_p8  ;;  %p8429_p2 = por %p8428_p0, %p8427_p13 }
 0x191   : > { %p8423_p12 = pneg %p8422_p11 }
 0x193   : > { %p8430_p5 = pnand %p8429_p2, %p8423_p12 }
 0x195   : > { %8433 = shalt.err (!%p8430_p5)
}
 0x196   : > { %s10322_s4 = sld [smem:[#allocation63_spill]] }
 0x197   : > { %7623 = dma.hbm_to_vmem [thread:$0]  (!%p8949_p6), %s10311_s12, 1024, %s900_s11, [#allocation25], %s10321_s2, %s10321_s2, %s10320_s10  }
 0x19c   : > { %s8434_s22 = scalar_lea.hbm %s10322_s4, 1024 }
 0x19d   : > { %p8435_p7 = scmp.ne.s32.totalorder %s10322_s4, %s8434_s22  ;;  %p8441_p3 = scmp.lt.u32.totalorder %s8434_s22, %s10322_s4 }
 0x19f   : > { %p8437_p4 = pnand %p8435_p7, %p8961_p8 }
 0x1a1   : > { %p8438_p1 = pneg %p8437_p4 }
 0x1a3   : > { %p8443_p9 = pnand %p8441_p3, %p8438_p1 }
 0x1a5   : > { %8446 = shalt.err (!%p8443_p9)
}
 0x1a6   : > { %s8447_s1 = scalar_lea.vmem %s924_s27, 1024  ;;  %p8455_p13 = scmp.lt.s32.totalorder %s924_s27, %s924_s27 }
 0x1a7   : > { %p8448_p10 = scmp.ne.s32.totalorder %s924_s27, %s8447_s1  ;;  %p8456_p0 = scmp.lt.s32.totalorder %s8447_s1, %s8447_s1 }
 0x1a9   : > { %p8450_p11 = pnand %p8448_p10, %p8961_p8  ;;  %p8457_p2 = por %p8456_p0, %p8455_p13 }
 0x1ab   : > { %p8451_p12 = pneg %p8450_p11 }
 0x1ad   : > { %p8458_p5 = pnand %p8457_p2, %p8451_p12 }
 0x1af   : > { %8461 = shalt.err (!%p8458_p5)
}
 0x1b0   : > { %s10323_s5 = sld [smem:[#allocation67_spill]]  ;;  %s8735_s11 = smov [#allocation32]  }
 0x1b1   : > { %7629 = dma.hbm_to_vmem [thread:$0]  (!%p8949_p6), %s10322_s4, 1024, %s924_s27, [#allocation28], %s10321_s2, %s10321_s2, %s10320_s10  }
 0x1b2   : > { %s953_s3 = sshll.u32 %s8735_s11, 4  ;;  %s8736_s23 = smov [#allocation35]   ;;  %s954_s3 = int_to_ptr.vmem [resolvable:$true] %s953_s3 }
 0x1b3   : > { %s991_s22 = sshll.u32 %s8736_s23, 4  ;;  %s992_s22 = int_to_ptr.vmem [resolvable:$true] %s991_s22 }
 0x1b6   : > { %s8462_s1 = scalar_lea.hbm %s10323_s5, 1024 }
 0x1b7   : > { %p8463_p7 = scmp.ne.s32.totalorder %s10323_s5, %s8462_s1  ;;  %p8469_p3 = scmp.lt.u32.totalorder %s8462_s1, %s10323_s5 }
 0x1b9   : > { %p8465_p4 = pnand %p8463_p7, %p8961_p8 }
 0x1bb   : > { %p8466_p1 = pneg %p8465_p4 }
 0x1bd   : > { %p8471_p9 = pnand %p8469_p3, %p8466_p1 }
 0x1bf   : > { %8474 = shalt.err (!%p8471_p9)
}
 0x1c0   : > { %s8475_s6 = scalar_lea.vmem %s954_s3, 1024  ;;  %p8483_p13 = scmp.lt.s32.totalorder %s954_s3, %s954_s3 }
 0x1c1   : > { %p8476_p10 = scmp.ne.s32.totalorder %s954_s3, %s8475_s6  ;;  %p8484_p0 = scmp.lt.s32.totalorder %s8475_s6, %s8475_s6 }
 0x1c3   : > { %p8478_p11 = pnand %p8476_p10, %p8961_p8  ;;  %p8485_p2 = por %p8484_p0, %p8483_p13 }
 0x1c5   : > { %p8479_p12 = pneg %p8478_p11 }
 0x1c7   : > { %p8486_p5 = pnand %p8485_p2, %p8479_p12 }
 0x1c9   : > { %8489 = shalt.err (!%p8486_p5)
}
 0x1ca   : > { %s10324_s27 = sld [smem:[#allocation73_spill]] }
 0x1cb   : > { %7635 = dma.hbm_to_vmem [thread:$0]  (!%p8949_p6), %s10323_s5, 1024, %s954_s3, [#allocation31], %s10321_s2, %s10321_s2, %s10320_s10  }
 0x1d0   : > { %s8490_s11 = scalar_lea.hbm %s10324_s27, 2048 }
 0x1d1   : > { %p8491_p7 = scmp.ne.s32.totalorder %s10324_s27, %s8490_s11  ;;  %p8497_p3 = scmp.lt.u32.totalorder %s8490_s11, %s10324_s27 }
 0x1d3   : > { %p8493_p4 = pnand %p8491_p7, %p8961_p8 }
 0x1d5   : > { %p8494_p1 = pneg %p8493_p4 }
 0x1d7   : > { %p8499_p9 = pnand %p8497_p3, %p8494_p1 }
 0x1d9   : > { %8502 = shalt.err (!%p8499_p9)
}
 0x1da   : > { %s8503_s6 = scalar_lea.vmem %s992_s22, 2048  ;;  %p8511_p13 = scmp.lt.s32.totalorder %s992_s22, %s992_s22 }
 0x1db   : > { %p8504_p10 = scmp.ne.s32.totalorder %s992_s22, %s8503_s6  ;;  %p8512_p0 = scmp.lt.s32.totalorder %s8503_s6, %s8503_s6 }
 0x1dd   : > { %p8506_p11 = pnand %p8504_p10, %p8961_p8  ;;  %p8513_p2 = por %p8512_p0, %p8511_p13 }
 0x1df   : > { %p8507_p12 = pneg %p8506_p11 }
 0x1e1   : > { %p8514_p5 = pnand %p8513_p2, %p8507_p12 }
 0x1e3   : > { %8517 = shalt.err (!%p8514_p5)
}
 0x1e4   : > { %7641 = dma.hbm_to_vmem [thread:$0]  (!%p8949_p6), %s10324_s27, 2048, %s992_s22, [#allocation34], %s10321_s2, %s10321_s2, %s10320_s10  }
 0x1e5   : > { %s6624_s17 = sadd.s32 4294967294, %s8684_s18   ;;  %s9179_s7 = sadd.s32 1, %s8684_s18  }
 0x1e6   : > { %s95_s3 = sadd.s32 1, %s8680_s0  ;;  %s92_s23 = ssub.s32 %s8684_s18, %s9179_s7 }
 0x1e7   : > { %s10325_s1 = sld [smem:[#allocation49_spill]]  ;;  %p102_p8 = scmp.ne.s32.totalorder %s8680_s0, %s8676_s16 }
 0x1e8   : > { %p93_p7 = scmp.eq.s32.totalorder %s92_s23, 0  ;;  %p103_p4 = scmp.eq.s32.totalorder %s8684_s18, 0 }
 0x1e9   : > { %p108_p1 = scmp.ne.s32.totalorder %s8676_s16, %s8672_s15  ;;  %p756_p3 = scmp.eq.s32.totalorder %s8933_s26, 1 }
 0x1ea   : > { %s9191_s11 = scalar_select %p93_p7, %s8680_s0, %s95_s3  }
 0x1eb   : > { %p104_p9 = por %p103_p4, %p102_p8  ;;  %p10326_p10 = scmp.eq.s32.totalorder %s8933_s26, 0 }
 0x1ec   : > { %p9199_p11 = por %p756_p3, %p102_p8  ;;  %p762_p12 = scmp.eq.s32.totalorder %s6624_s17, 1 }
 0x1ed   : > { %p9195_p6 = por %p10326_p10, %p108_p1  ;;  %p7670_p13 = scmp.lt.s32.totalorder %s8684_s18, 2 }
 0x1ee   : > { %s10328_s2 = scalar_select %p9199_p11, 1, 0 }
 0x1ef   : > { %s10327_s10 = scalar_select %p9195_p6, 1, 0 }
 0x1f0   : > { %s9205_s22 = sand.u32 1, %s8680_s0   ;;  %p9207_p0 = por %p762_p12, %p108_p1 }
 0x1f1   : > { %s6644_s3 = sshll.u32 %s9205_s22, 4  ;;  %s6876_s23 = sshll.u32 %s8684_s18, 8 }
 0x1f2   : > { %s10329_s6 = scalar_select %p9207_p0, 1, 0 }
 0x1f3   : > { %s9214_s4 = scalar_lea.hbm %s10325_s1, %s6876_s23  ;;  %s1018_s17 = scalar_lea.vmem [#allocation6], %s6644_s3 }
 0x1f4   : > { %s1025_s5 = sshll.u32 %s1018_s17, 4  ;;  %p9216_p2 = pnand %p7670_p13, %p104_p9  ;;  %s9220_s5 = int_to_ptr.vmem [resolvable:$true] %s1025_s5 }
 0x1f5   : > { %s8518_s14 = scalar_lea.hbm %s9214_s4, 256  ;;  %s8523_s3 = scalar_lea.hbm %s10325_s1, 512 }
 0x1f6   : > { %p8519_p5 = scmp.ne.s32.totalorder %s9214_s4, %s8518_s14  ;;  %p8520_p8 = pneg %p9216_p2 }
 0x1f7   : > { %p8524_p1 = scmp.lt.u32.totalorder %s9214_s4, %s10325_s1  ;;  %p8525_p3 = scmp.lt.u32.totalorder %s8523_s3, %s8518_s14 }
 0x1f8   : > { %p8521_p7 = pnand %p8520_p8, %p8519_p5  ;;  %p8527_p10 = scmp.lt.u32.totalorder %s8518_s14, %s9214_s4 }
 0x1f9   : > { %p8526_p9 = por %p8525_p3, %p8524_p1 }
 0x1fa   : > { %p8522_p4 = pneg %p8521_p7 }
 0x1fb   : > { %p8528_p12 = por %p8527_p10, %p8526_p9 }
 0x1fd   : > { %p8529_p13 = pnand %p8528_p12, %p8522_p4 }
 0x1ff   : > { %8532 = shalt.err (!%p8529_p13)
}
 0x200   : > { %s8533_s23 = scalar_lea.vmem %s9220_s5, 256  ;;  %s8737_s17 = smov [#allocation6]  }
 0x201   : > { %p8534_p0 = scmp.ne.s32.totalorder %s9220_s5, %s8533_s23  ;;  %s8538_s9 = sshll.u32 %s8737_s17, 4  ;;  %s8539_s9 = int_to_ptr.vmem [resolvable:$false] %s8538_s9 }
 0x202   : > { %s8540_s12 = scalar_lea.vmem %s8539_s9, 512  ;;  %p8541_p5 = scmp.lt.s32.totalorder %s9220_s5, %s8539_s9 }
 0x203   : > { %p8536_p11 = pnand %p8534_p0, %p8520_p8  ;;  %p8542_p7 = scmp.lt.s32.totalorder %s8540_s12, %s8533_s23 }
 0x205   : > { %p8537_p6 = pneg %p8536_p11  ;;  %p8543_p1 = por %p8542_p7, %p8541_p5 }
 0x207   : > { %p8544_p3 = pnand %p8543_p1, %p8537_p6 }
 0x209   : > { %8547 = shalt.err (!%p8544_p3)
}
 0x20a   : > { %s10331_s14 = smov 8   ;;  %s10332_s3 = smov 128  }
 0x20b   : > { %s10333_s1 = scalar_lea.sflag [#allocation7], %s9205_s22  ;;  %s10334_s19 = sld [smem:[#allocation50_spill]] }
 0x20c   : > { %7645 = dma.hbm_to_vmem [thread:$0]  (!%p9216_p2), %s9214_s4, 256, %s9220_s5, %s10333_s1, %s10332_s3, %s10332_s3, %s10331_s14  }
 0x20d   : > { %s6647_s9 = sshll.u32 %s9205_s22, 3  ;;  %s6648_s12 = sshll.u32 %s8684_s18, 7 }
 0x20e   : > { %s1039_s17 = scalar_lea.vmem [#allocation9], %s6647_s9  ;;  %s10335_s21 = sand.u32 1, %s8684_s18  }
 0x20f   : > { %s1046_s20 = sshll.u32 %s1039_s17, 4  ;;  %s1036_s24 = scalar_lea.sflag [#allocation10], %s10335_s21  ;;  %s1047_s20 = int_to_ptr.vmem [resolvable:$true] %s1046_s20 }
 0x211   : > { %s9253_s23 = scalar_lea.hbm %s10334_s19, %s6648_s12  ;;  %s8553_s4 = scalar_lea.hbm %s10334_s19, 256 }
 0x212   : > { %s8548_s25 = scalar_lea.hbm %s9253_s23, 128  ;;  %p8554_p4 = scmp.lt.u32.totalorder %s9253_s23, %s10334_s19 }
 0x213   : > { %p8549_p6 = scmp.ne.s32.totalorder %s9253_s23, %s8548_s25  ;;  %p8555_p9 = scmp.lt.u32.totalorder %s8553_s4, %s8548_s25 }
 0x214   : > { %p8557_p12 = scmp.lt.u32.totalorder %s8548_s25, %s9253_s23 }
 0x215   : > { %p8551_p11 = pnand %p8549_p6, %p8520_p8  ;;  %p8556_p10 = por %p8555_p9, %p8554_p4 }
 0x217   : > { %p8552_p0 = pneg %p8551_p11  ;;  %p8558_p13 = por %p8557_p12, %p8556_p10 }
 0x219   : > { %p8559_p5 = pnand %p8558_p13, %p8552_p0 }
 0x21b   : > { %8562 = shalt.err (!%p8559_p5)
}
 0x21c   : > { %s8563_s5 = scalar_lea.vmem %s1047_s20, 128  ;;  %s8738_s21 = smov [#allocation9]  }
 0x21d   : > { %p8564_p7 = scmp.ne.s32.totalorder %s1047_s20, %s8563_s5  ;;  %s8568_s1 = sshll.u32 %s8738_s21, 4  ;;  %s8569_s1 = int_to_ptr.vmem [resolvable:$false] %s8568_s1 }
 0x21e   : > { %s8570_s22 = scalar_lea.vmem %s8569_s1, 256  ;;  %p8571_p6 = scmp.lt.s32.totalorder %s1047_s20, %s8569_s1 }
 0x21f   : > { %p8566_p1 = pnand %p8564_p7, %p8520_p8  ;;  %p8572_p11 = scmp.lt.s32.totalorder %s8570_s22, %s8563_s5 }
 0x221   : > { %p8567_p3 = pneg %p8566_p1  ;;  %p8573_p4 = por %p8572_p11, %p8571_p6 }
 0x223   : > { %p8574_p9 = pnand %p8573_p4, %p8567_p3 }
 0x225   : > { %8577 = shalt.err (!%p8574_p9)
}
 0x226   : > { %7648 = dma.hbm_to_vmem [thread:$0]  (!%p9216_p2), %s9253_s23, 128, %s1047_s20, %s1036_s24  }
 0x227   : > { %p10336_p0 = scmp.ne.s32.totalorder %s10317_s28, 0 }
 0x228   : > { %s9275_s25 = sand.u32 (!%p10336_p0), 1, %s8676_s16   ;;  %p10337_p8 = scmp.ne.s32.totalorder (!%p10336_p0), %s10327_s10, 0 }
 0x229   : > { %1067 = sbr.rel (%p10336_p0) target bundleno = 5028 (0x13a4), region = 140  ;;  %s6650_s14 = sshll.u32 (!%p10336_p0), %s9275_s25, 4 }
 0x22a   : > { %s1070_s3 = scalar_lea.sflag (!%p10336_p0), [#allocation7], %s9275_s25  ;;  %s9281_s9 = scalar_lea.vmem (!%p10336_p0), [#allocation6], %s6650_s14 }
 0x230   : > { %8623 = dma.done.wait (%p10337_p8), %s1070_s3, 256  }
 0x231   : > { %8625 = vsyncadd (%p10337_p8), %s1070_s3, 4294967040  ;;  %s1078_s8 = sand.u32 1, %s8933_s26   ;;  %s6651_s24 = sshll.u32 %s9275_s25, 3 }
 0x232   : > { %s1079_s20 = scalar_lea.sflag [#allocation10], %s1078_s8  ;;  %s9289_s28 = scalar_lea.vmem [#allocation9], %s6651_s24 }
 0x233   : > { %8627 = dma.done.wait (%p10337_p8), %s1079_s20, 128  }
 0x234   : > { %8629 = vsyncadd (%p10337_p8), %s1079_s20, 4294967168  ;;  %p10338_p2 = scmp.eq.s32.totalorder %s8933_s26, 0 }
 0x236   : > { %8631 = dma.done.wait (%p10338_p2), [#allocation10], 1024   ;;  %p10339_p10 = pmov %p10338_p2 }
 0x237   : > { %p10340_p12 = pmov %p10338_p2 }
 0x238   : > { %8633 = vsyncadd (%p10339_p10), [#allocation10], 4294966272 }
 0x239   : > { %8635 = dma.done.wait (%p10340_p12), [#allocation13], 1040   ;;  %p10341_p13 = pmov %p10338_p2 }
 0x23a   : > { %p10342_p5 = pmov %p10338_p2 }
 0x23b   : > { %8637 = vsyncadd (%p10341_p13), [#allocation13], 4294966256 }
 0x23c   : > { %8639 = dma.done.wait (%p10342_p5), [#allocation16], 1040   ;;  %p10343_p7 = pmov %p10338_p2 }
 0x23d   : > { %p10344_p1 = pmov %p10338_p2 }
 0x23e   : > { %8641 = vsyncadd (%p10343_p7), [#allocation16], 4294966256 }
 0x23f   : > { %8643 = dma.done.wait (%p10344_p1), [#allocation19], 1040   ;;  %p10345_p3 = pmov %p10344_p1 }
 0x240   : > { %p10346_p6 = pmov %p10344_p1 }
 0x241   : > { %8645 = vsyncadd (%p10345_p3), [#allocation19], 4294966256 }
 0x242   : > { %8647 = dma.done.wait (%p10346_p6), [#allocation22], 32   ;;  %p10347_p11 = pmov %p10344_p1 }
 0x243   : > { %p10348_p4 = pmov %p10344_p1 }
 0x244   : > { %8649 = vsyncadd (%p10347_p11), [#allocation22], 4294967264 }
 0x245   : > { %8651 = dma.done.wait (%p10348_p4), [#allocation25], 1040   ;;  %p10349_p9 = pmov %p10344_p1 }
 0x246   : > { %p10350_p0 = pmov %p10344_p1 }
 0x247   : > { %8653 = vsyncadd (%p10349_p9), [#allocation25], 4294966256 }
 0x248   : > { %8655 = dma.done.wait (%p10350_p0), [#allocation28], 1040   ;;  %p10351_p8 = pmov %p10350_p0 }
 0x249   : > { %p10352_p2 = pmov %p10350_p0 }
 0x24a   : > { %8657 = vsyncadd (%p10351_p8), [#allocation28], 4294966256 }
 0x24b   : > { %8659 = dma.done.wait (%p10352_p2), [#allocation31], 1040   ;;  %p10353_p10 = pmov %p10350_p0 }
 0x24c   : > { %p10354_p12 = pmov %p10350_p0 }
 0x24d   : > { %8661 = vsyncadd (%p10353_p10), [#allocation31], 4294966256 }
 0x24e   : > { %8663 = dma.done.wait (%p10354_p12), [#allocation34], 4096   ;;  %p10355_p13 = pmov %p10350_p0 }
 0x24f   : > { %v8739_v0 = vmov 0.0   ;;  %vm8740_vm0 = vmmov 0   ;;  %v7784_v1 = vld [vmem:[#allocation14] sm:$0xff]   ;;  %v7785_v2 = vld [vmem:[#allocation14 + $0x8] sm:$0xff]   ;;  %v7787_v5 = vld [vmem:[#allocation14 + $0x10] sm:$0xff]   ;;  %vm1587_vm1 = vcmask 130048  }
 0x250   : > { %8665 = vsyncadd (%p10355_p13), [#allocation34], 4294963200  ;;  %7104 = vmatprep.subr.bf16.mxu1 %v8739_v0  ;;  %7084 = vmatprep.subr.bf16.mxu0 %v8739_v0  ;;  %v7786_v3 = vld [vmem:[#allocation11] sm:$0xff]   ;;  %v7788_v4 = vld [vmem:[#allocation11 + $0x8] sm:$0xff]   ;;  %s8741_s10 = smov 96   ;;  %s8742_s12 = smov 112  }
 0x251   : > { %7120 = vmatprep.mubr.msk.bf16.mxu1 %vm8740_vm0, %v8739_v0  ;;  %7100 = vmatprep.mubr.msk.bf16.mxu0 %vm8740_vm0, %v8739_v0  ;;  %v7790_v6 = vld [vmem:[#allocation11 + $0x10] sm:$0xff]   ;;  %v7789_v7 = vld [vmem:[#allocation14 + $0x18] sm:$0xff]   ;;  %v7791_v9 = vld [vmem:[#allocation14 + $0x20] sm:$0xff]   ;;  %s8743_s23 = smov 80   ;;  %s8744_s17 = smov 64   ;;  %vm3405_vm3 = vcmask 261248  }
 0x252   : > { %7105 = vmatpush3.bf16.msra.mxu1 %v7784_v1  ;;  %7085 = vmatpush3.bf16.msra.mxu0 %v7786_v3  ;;  %v7792_v8 = vld [vmem:[#allocation11 + $0x18] sm:$0xff]   ;;  %v7794_v10 = vld [vmem:[#allocation11 + $0x20] sm:$0xff]   ;;  %v7793_v11 = vld [vmem:[#allocation14 + $0x28] sm:$0xff]   ;;  %s8745_s4 = smov 48   ;;  %s8746_s5 = smov 32   ;;  %vm3416_vm4 = vcmask 392448  }
 0x253   : > { %7106 = vmatprep.subr.bf16.mxu1 %v8739_v0  ;;  %7086 = vmatprep.subr.bf16.mxu0 %v8739_v0  ;;  %v7796_v12 = vld [vmem:[#allocation11 + $0x28] sm:$0xff]   ;;  %v7795_v13 = vld [vmem:[#allocation14 + $0x30] sm:$0xff]   ;;  %v7797_v15 = vld [vmem:[#allocation14 + $0x38] sm:$0xff]   ;;  %s8747_s21 = smov 16   ;;  %s10358_s1 = sld [smem:[#allocation51_spill]]  ;;  %vm3427_vm5 = vcmask 523648  }
 0x254   : > { %v7798_v14 = vld [vmem:[#allocation11 + $0x30] sm:$0xff]   ;;  %v1246_v17 = vld [vmem:[%s9281_s9 + $0x8] sm:$0xff]  ;;  %v6679_v28 = vld [vmem:[#allocation15] ss:$0 sm:$0xff]  ;;  %p1238_p5 = scmp.lt.s32.totalorder %s8933_s26, 1  ;;  %vm3438_vm6 = vcmask 654848  }
 0x255   : > { %v1245_v16 = vld [vmem:[%s9281_s9] sm:$0xff]  ;;  %v7799_v18 = vld [vmem:[#allocation11 + $0x38] sm:$0xff]   ;;  %vm9375_vm2 = vmpackc.low %vm1587_vm1, %vm1587_vm1  ;;  %vm3449_vm7 = vcmask 786048   ;;  %vm3460_vm8 = vcmask 917248   ;;  %vm3471_vm9 = vcmask 1048448   ;;  %s10360_s8 = sld [smem:[#allocation66_spill]] }
 0x256   : > { %7107 = vmatpush3.bf16.msra.mxu1 %v7785_v2  ;;  %7087 = vmatpush3.bf16.msra.mxu0 %v7788_v4  ;;  %v1250_v19 = vpack.c.bf16 %v1246_v17, %v1245_v16  ;;  %v7800_v20 = vld [vmem:[#allocation17] sm:$0xff]   ;;  %v7801_v21 = vld [vmem:[#allocation17 + $0x8] sm:$0xff]   ;;  %v7802_v22 = vld [vmem:[#allocation17 + $0x10] sm:$0xff]   ;;  %s9523_s22 = scalar_select %p1238_p5, %s8933_s26, 1  ;;  %vm4845_vm14 = vcmask 64512  }
 0x257   : > { %7108 = vmatprep.subr.bf16.mxu1 %v8739_v0  ;;  %7088 = vmatprep.subr.bf16.mxu0 %v8739_v0  ;;  %v7803_v23 = vld [vmem:[#allocation17 + $0x18] sm:$0xff]   ;;  %v7804_v24 = vld [vmem:[#allocation17 + $0x20] sm:$0xff]   ;;  %v7805_v25 = vld [vmem:[#allocation17 + $0x28] sm:$0xff]   ;;  %s10361_s24 = sld [smem:[#allocation52_spill]]  ;;  %p10369_p1 = scmp.ne.s32.totalorder %s10328_s2, 0 }
 0x258   : > { %v7806_v26 = vld [vmem:[#allocation17 + $0x30] sm:$0xff]   ;;  %v7807_v27 = vld [vmem:[#allocation17 + $0x38] sm:$0xff]   ;;  %v6688_v48 = vld [vmem:[#allocation18] ss:$0 sm:$0xff] }
 0x259   : > { %v6670_v30 = vld [vmem:[#allocation12] ss:$0 sm:$0xff]  ;;  %s1240_s3 = scalar_lea.vmem %s10358_s1, %s9523_s22  ;;  %s1237_s1 = scalar_lea.vmem [#allocation36], %s6650_s14 }
 0x25a   : > { %7109 = vmatpush3.bf16.msra.mxu1 %v7787_v5  ;;  %7089 = vmatpush3.bf16.msra.mxu0 %v7790_v6 }
 0x25b   : > { %7110 = vmatprep.subr.bf16.mxu1 %v8739_v0  ;;  %7090 = vmatprep.subr.bf16.mxu0 %v8739_v0 }
 0x25d   : > { %s1243_s20 = scalar_lea.vmem %s10361_s24, %s9523_s22  ;;  %s6319_s22 = sshll.u32 %s1237_s1, 4  ;;  %s10204_s22 = int_to_ptr.vmem [resolvable:$true] %s6319_s22 }
 0x25e   : > { %7111 = vmatpush3.bf16.msra.mxu1 %v7789_v7  ;;  %7091 = vmatpush3.bf16.msra.mxu0 %v7792_v8  ;;  %s8578_s24 = scalar_lea.vmem %s10204_s22, 256 }
 0x25f   : > { %7112 = vmatprep.subr.bf16.mxu1 %v8739_v0  ;;  %7092 = vmatprep.subr.bf16.mxu0 %v8739_v0  ;;  %p8579_p7 = scmp.ne.s32.totalorder %s10204_s22, %s8578_s24 }
 0x261   : > { %p8580_p3 = pnand %p8579_p7, %p10369_p1 }
 0x262   : > { %7113 = vmatpush3.bf16.msra.mxu1 %v7791_v9  ;;  %7093 = vmatpush3.bf16.msra.mxu0 %v7794_v10 }
 0x263   : > { %7114 = vmatprep.subr.bf16.mxu1 %v8739_v0  ;;  %7094 = vmatprep.subr.bf16.mxu0 %v8739_v0  ;;  %p8581_p6 = pneg %p8580_p3 }
 0x266   : > { %7115 = vmatpush3.bf16.msra.mxu1 %v7793_v11  ;;  %7095 = vmatpush3.bf16.msra.mxu0 %v7796_v12 }
 0x267   : > { %7116 = vmatprep.subr.bf16.mxu1 %v8739_v0  ;;  %7096 = vmatprep.subr.bf16.mxu0 %v8739_v0 }
 0x26a   : > { %7117 = vmatpush3.bf16.msra.mxu1 %v7795_v13  ;;  %7097 = vmatpush3.bf16.msra.mxu0 %v7798_v14 }
 0x26b   : > { %7118 = vmatprep.subr.bf16.mxu1 %v8739_v0  ;;  %7098 = vmatprep.subr.bf16.mxu0 %v8739_v0 }
 0x26e   : > { %7119 = vmatpush3.bf16.msra.mxu1 %v7797_v15  ;;  %7099 = vmatpush3.bf16.msra.mxu0 %v7799_v18 }
 0x26f   : > { %7124 = vmatprep.subr.bf16.mxu0 %v8739_v0 }
 0x271   : > { %7121 = vmatmul.mubr.bf16.vlgmr.msra.gmra.mrb[0].mxu1 %v1250_v19  ;;  %7101 = vmatmul.mubr.bf16.vlgmr.msra.gmra.mrb[0].mxu0 %v1250_v19 }
 0x272   : > { %7125 = vmatpush3.bf16.msra.mxu0 %v7800_v20  ;;  %7140 = vmatprep.mubr.msk.bf16.mxu0 %vm8740_vm0, %v8739_v0 }
 0x273   : > { %7126 = vmatprep.subr.bf16.mxu0 %v8739_v0 }
 0x276   : > { %7127 = vmatpush3.bf16.msra.mxu0 %v7801_v21 }
 0x277   : > { %7128 = vmatprep.subr.bf16.mxu0 %v8739_v0 }
 0x27a   : > { %7129 = vmatpush3.bf16.msra.mxu0 %v7802_v22 }
 0x27b   : > { %7130 = vmatprep.subr.bf16.mxu0 %v8739_v0 }
 0x27e   : > { %7131 = vmatpush3.bf16.msra.mxu0 %v7803_v23 }
 0x27f   : > { %7132 = vmatprep.subr.bf16.mxu0 %v8739_v0 }
 0x282   : > { %7133 = vmatpush3.bf16.msra.mxu0 %v7804_v24 }
 0x283   : > { %7134 = vmatprep.subr.bf16.mxu0 %v8739_v0 }
 0x286   : > { %7135 = vmatpush3.bf16.msra.mxu0 %v7805_v25 }
 0x287   : > { %7136 = vmatprep.subr.bf16.mxu0 %v8739_v0 }
 0x28a   : > { %7137 = vmatpush3.bf16.msra.mxu0 %v7806_v26 }
 0x28b   : > { %7138 = vmatprep.subr.bf16.mxu0 %v8739_v0 }
 0x28e   : > { %7139 = vmatpush3.bf16.msra.mxu0 %v7807_v27 }
 0x291   : > { %7141 = vmatmul.mubr.bf16.vlgmr.msra.gmra.mrb[4].mxu0 %v1250_v19 }
 0x344   : > { %v1468_v29 = vpop.f32.mrb[0].mxu1  ;;  %v1356_v34 = vpop.f32.mrb[0].mxu0 }
 0x345   : > { %v1469_v31 = vadd.f32 %v6679_v28, %v1468_v29  ;;  %v7122_v32 = vpop.f32.mrb[1].mxu1  ;;  %v1357_v37 = vadd.f32 %v6670_v30, %v1356_v34  ;;  %v7102_v38 = vpop.f32.mrb[1].mxu0 }
 0x346   : > { %v1471_v33 = vpop.f32.mrb[2].mxu1  ;;  %v1359_v39 = vpop.f32.mrb[2].mxu0 }
 0x347   : > { %1590 = vst.msk [vmem:[#allocation3] sm:$0xff] %vm1587_vm1, %v1469_v31  ;;  %v1472_v35 = vadd.f32 %v6679_v28, %v1471_v33  ;;  %1636 = vrot.lane.b32.xlu1 %v1469_v31, %s8741_s10  ;;  %1607 = vrot.lane.b32.xlu0 %v1469_v31, %s8742_s12  ;;  %v7123_v36 = vpop.f32.mrb[3].mxu1  ;;  %1588 = vst.msk [vmem:[#allocation2] sm:$0xff] %vm1587_vm1, %v1357_v37  ;;  %v1360_v40 = vadd.f32 %v6670_v30, %v1359_v39  ;;  %v7103_v41 = vpop.f32.mrb[3].mxu0 }
 0x349   : > { %1591 = vst.msk [vmem:[#allocation3 + $0x8] sm:$0xff] %vm1587_vm1, %v1472_v35  ;;  %1589 = vst.msk [vmem:[#allocation2 + $0x8] sm:$0xff] %vm1587_vm1, %v1360_v40 }
 0x34b   : > { %1638 = vrot.lane.b32.xlu1 %v1472_v35, %s8741_s10  ;;  %1609 = vrot.lane.b32.xlu0 %v1472_v35, %s8742_s12 }
 0x34e   : > { %v1805_v43 = vld [vmem:[#allocation3] sm:$0xff] }
 0x34f   : > { %1596 = vrot.lane.b32.xlu0 %v1357_v37, %s8742_s12  ;;  %1598 = vrot.lane.b32.xlu1 %v1360_v40, %s8742_s12  ;;  %v1789_v45 = vld [vmem:[#allocation2] sm:$0xff] }
 0x350   : > { %v1806_v44 = vld [vmem:[#allocation3 + $0x8] sm:$0xff]  ;;  %7148 = vmatprep.mubr.msk.f32.mxu1 %vm1587_vm1, %v1789_v45 }
 0x351   : > { %v7436_v46 = vpack.c.bf16 %v1806_v44, %v1805_v43  ;;  %v1790_v47 = vld [vmem:[#allocation2 + $0x8] sm:$0xff] }
 0x353   : > { %7438 = vmatprep.subr.msk.bf16.mxu1 %vm9375_vm2, %v7436_v46  ;;  %1663 = vrot.lane.b32.xlu0 %v1469_v31, %s8743_s23 }
 0x354   : > { %1665 = vrot.lane.b32.xlu1 %v1472_v35, %s8743_s23  ;;  %7441 = vmatpush3.bf16.xpose.msk.msra.mxu1 %vm9375_vm2, %v7436_v46 }
 0x357   : > { %1627 = vrot.lane.b32.xlu0 %v1357_v37, %s8741_s10 }
 0x358   : > { %1629 = vrot.lane.b32.xlu1 %v1360_v40, %s8741_s10 }
 0x35b   : > { %1690 = vrot.lane.b32.xlu0 %v1469_v31, %s8744_s17  ;;  %7149 = vmatmul.mubr.msk.f32.vlgmr.msra.gmra.mrb[4].mxu1 %vm1587_vm1, %v1790_v47 }
 0x35c   : > { %1692 = vrot.lane.b32.xlu1 %v1472_v35, %s8744_s17 }
 0x35f   : > { %1654 = vrot.lane.b32.xlu0 %v1357_v37, %s8743_s23 }
 0x360   : > { %1656 = vrot.lane.b32.xlu1 %v1360_v40, %s8743_s23 }
 0x363   : > { %1717 = vrot.lane.b32.xlu0 %v1469_v31, %s8745_s4 }
 0x364   : > { %1719 = vrot.lane.b32.xlu1 %v1472_v35, %s8745_s4  ;;  %v1580_v49 = vpop.f32.mrb[4].mxu0 }
 0x365   : > { %v9398_v50 = vadd.f32 %v6688_v48, %v1580_v49  ;;  %v7142_v51 = vpop.f32.mrb[5].mxu0 }
 0x366   : > { %v1583_v52 = vpop.f32.mrb[6].mxu0 }
 0x367   : > { %1681 = vrot.lane.b32.xlu0 %v1357_v37, %s8744_s17  ;;  %1592 = vst.msk [vmem:[#allocation4] sm:$0xff] %vm1587_vm1, %v9398_v50  ;;  %v9405_v53 = vadd.f32 %v6688_v48, %v1583_v52  ;;  %v7143_v54 = vpop.f32.mrb[7].mxu0 }
 0x368   : > { %1683 = vrot.lane.b32.xlu1 %v1360_v40, %s8744_s17 }
 0x369   : > { %1593 = vst.msk [vmem:[#allocation4 + $0x8] sm:$0xff] %vm1587_vm1, %v9405_v53 }
 0x36b   : > { %1744 = vrot.lane.b32.xlu0 %v1469_v31, %s8746_s5 }
 0x36c   : > { %1746 = vrot.lane.b32.xlu1 %v1472_v35, %s8746_s5 }
 0x36e   : > { %v1821_v55 = vld [vmem:[#allocation4] sm:$0xff] }
 0x36f   : > { %1708 = vrot.lane.b32.xlu0 %v1357_v37, %s8745_s4 }
 0x370   : > { %1710 = vrot.lane.b32.xlu1 %v1360_v40, %s8745_s4  ;;  %v1822_v56 = vld [vmem:[#allocation4 + $0x8] sm:$0xff] }
 0x371   : > { %v7484_v57 = vpack.c.bf16 %v1822_v56, %v1821_v55 }
 0x373   : > { %1771 = vrot.lane.b32.xlu0 %v1469_v31, %s8747_s21  ;;  %7485 = vmatprep.subr.bf16.mxu0 %v7484_v57 }
 0x374   : > { %1773 = vrot.lane.b32.xlu1 %v1472_v35, %s8747_s21  ;;  %7487 = vmatpush3.bf16.msra.mxu0 %v7484_v57 }
 0x377   : > { %1735 = vrot.lane.b32.xlu0 %v1357_v37, %s8746_s5 }
 0x378   : > { %1737 = vrot.lane.b32.xlu1 %v1360_v40, %s8746_s5 }
 0x37b   : > { %1762 = vrot.lane.b32.xlu0 %v1357_v37, %s8747_s21 }
 0x37c   : > { %1764 = vrot.lane.b32.xlu1 %v1360_v40, %s8747_s21 }
 0x37f   : > { %1672 = vrot.lane.b32.xlu0 %v9398_v50, %s8743_s23 }
 0x380   : > { %1618 = vrot.lane.b32.xlu1 %v9398_v50, %s8742_s12 }
 0x383   : > { %1699 = vrot.lane.b32.xlu0 %v9398_v50, %s8744_s17 }
 0x384   : > { %1645 = vrot.lane.b32.xlu1 %v9398_v50, %s8741_s10 }
 0x387   : > { %1726 = vrot.lane.b32.xlu0 %v9398_v50, %s8745_s4 }
 0x388   : > { %1647 = vrot.lane.b32.xlu1 %v9405_v53, %s8741_s10 }
 0x38b   : > { %1620 = vrot.lane.b32.xlu0 %v9405_v53, %s8742_s12 }
 0x38c   : > { %1674 = vrot.lane.b32.xlu1 %v9405_v53, %s8743_s23 }
 0x390   : > { %1701 = vrot.lane.b32.xlu1 %v9405_v53, %s8744_s17 }
 0x394   : > { %1728 = vrot.lane.b32.xlu1 %v9405_v53, %s8745_s4 }
 0x3b9   : > { %v1637_v58 = vpop.permute.xlu1 %1636  ;;  %v1608_v59 = vpop.permute.xlu0 %1607 }
 0x3ba   : > { %1643 = vst.msk [vmem:[#allocation3 + $0x20] sm:$0xff] %vm1587_vm1, %v1637_v58  ;;  %1614 = vst.msk [vmem:[#allocation3 + $0x10] sm:$0xff] %vm1587_vm1, %v1608_v59 }
 0x3bd   : > { %v1639_v60 = vpop.permute.xlu1 %1638  ;;  %v1610_v61 = vpop.permute.xlu0 %1609 }
 0x3be   : > { %1644 = vst.msk [vmem:[#allocation3 + $0x28] sm:$0xff] %vm1587_vm1, %v1639_v60  ;;  %1615 = vst.msk [vmem:[#allocation3 + $0x18] sm:$0xff] %vm1587_vm1, %v1610_v61 }
 0x3c1   : > { %v1597_v62 = vpop.permute.xlu0 %1596  ;;  %v1599_v63 = vpop.permute.xlu1 %1598  ;;  %v1807_v2 = vld [vmem:[#allocation3 + $0x10] sm:$0xff]  ;;  %v1809_v7 = vld [vmem:[#allocation3 + $0x20] sm:$0xff] }
 0x3c2   : > { %1603 = vst.msk [vmem:[#allocation2 + $0x10] sm:$0xff] %vm1587_vm1, %v1597_v62  ;;  %1604 = vst.msk [vmem:[#allocation2 + $0x18] sm:$0xff] %vm1587_vm1, %v1599_v63 }
 0x3c5   : > { %v1664_v1 = vpop.permute.xlu0 %1663  ;;  %v1808_v3 = vld [vmem:[#allocation3 + $0x18] sm:$0xff]  ;;  %v1810_v4 = vld [vmem:[#allocation3 + $0x28] sm:$0xff] }
 0x3c6   : > { %1670 = vst.msk [vmem:[#allocation3 + $0x30] sm:$0xff] %vm1587_vm1, %v1664_v1  ;;  %v1666_v5 = vpop.permute.xlu1 %1665  ;;  %v7442_v6 = vpack.c.bf16 %v1808_v3, %v1807_v2  ;;  %v7448_v8 = vpack.c.bf16 %v1810_v4, %v1809_v7 }
 0x3c7   : > { %1671 = vst.msk [vmem:[#allocation3 + $0x38] sm:$0xff] %vm1587_vm1, %v1666_v5 }
 0x3c8   : > { %7444 = vmatprep.subr.msk.bf16.mxu1 %vm9375_vm2, %v7442_v6 }
 0x3c9   : > { %v1628_v9 = vpop.permute.xlu0 %1627  ;;  %7447 = vmatpush3.bf16.xpose.msk.msra.mxu1 %vm9375_vm2, %v7442_v6  ;;  %v1791_v10 = vld [vmem:[#allocation2 + $0x10] sm:$0xff]  ;;  %v1792_v16 = vld [vmem:[#allocation2 + $0x18] sm:$0xff] }
 0x3ca   : > { %1634 = vst.msk [vmem:[#allocation2 + $0x20] sm:$0xff] %vm1587_vm1, %v1628_v9  ;;  %v1630_v11 = vpop.permute.xlu1 %1629  ;;  %7450 = vmatprep.subr.msk.bf16.mxu1 %vm9375_vm2, %v7448_v8  ;;  %7155 = vmatprep.mubr.msk.f32.mxu1 %vm1587_vm1, %v1791_v10 }
 0x3cb   : > { %1635 = vst.msk [vmem:[#allocation2 + $0x28] sm:$0xff] %vm1587_vm1, %v1630_v11 }
 0x3cd   : > { %v1691_v12 = vpop.permute.xlu0 %1690  ;;  %v1811_v13 = vld [vmem:[#allocation3 + $0x30] sm:$0xff] }
 0x3ce   : > { %1697 = vst.msk [vmem:[#allocation3 + $0x40] sm:$0xff] %vm1587_vm1, %v1691_v12  ;;  %v1693_v14 = vpop.permute.xlu1 %1692  ;;  %v1812_v15 = vld [vmem:[#allocation3 + $0x38] sm:$0xff] }
 0x3cf   : > { %1698 = vst.msk [vmem:[#allocation3 + $0x48] sm:$0xff] %vm1587_vm1, %v1693_v14  ;;  %v7454_v17 = vpack.c.bf16 %v1812_v15, %v1811_v13 }
 0x3d0   : > { %7156 = vmatmul.mubr.msk.f32.vlgmr.msra.gmra.mrb[6].mxu1 %vm1587_vm1, %v1792_v16 }
 0x3d1   : > { %v1655_v18 = vpop.permute.xlu0 %1654  ;;  %7453 = vmatpush3.bf16.xpose.msk.msra.mxu1 %vm9375_vm2, %v7448_v8  ;;  %v1793_v19 = vld [vmem:[#allocation2 + $0x20] sm:$0xff] }
 0x3d2   : > { %1661 = vst.msk [vmem:[#allocation2 + $0x30] sm:$0xff] %vm1587_vm1, %v1655_v18  ;;  %v1657_v20 = vpop.permute.xlu1 %1656  ;;  %7162 = vmatprep.mubr.msk.f32.mxu1 %vm1587_vm1, %v1793_v19  ;;  %7456 = vmatprep.subr.msk.bf16.mxu1 %vm9375_vm2, %v7454_v17  ;;  %v1794_v25 = vld [vmem:[#allocation2 + $0x28] sm:$0xff] }
 0x3d3   : > { %1662 = vst.msk [vmem:[#allocation2 + $0x38] sm:$0xff] %vm1587_vm1, %v1657_v20 }
 0x3d5   : > { %v1718_v21 = vpop.permute.xlu0 %1717  ;;  %v1813_v22 = vld [vmem:[#allocation3 + $0x40] sm:$0xff] }
 0x3d6   : > { %1724 = vst.msk [vmem:[#allocation3 + $0x50] sm:$0xff] %vm1587_vm1, %v1718_v21  ;;  %v1720_v23 = vpop.permute.xlu1 %1719  ;;  %v1814_v24 = vld [vmem:[#allocation3 + $0x48] sm:$0xff] }
 0x3d7   : > { %1725 = vst.msk [vmem:[#allocation3 + $0x58] sm:$0xff] %vm1587_vm1, %v1720_v23  ;;  %v7460_v26 = vpack.c.bf16 %v1814_v24, %v1813_v22 }
 0x3d8   : > { %7163 = vmatmul.mubr.msk.f32.vlgmr.msra.gmra.mrb[8].mxu1 %vm1587_vm1, %v1794_v25 }
 0x3d9   : > { %v1682_v27 = vpop.permute.xlu0 %1681  ;;  %7459 = vmatpush3.bf16.xpose.msk.msra.mxu1 %vm9375_vm2, %v7454_v17  ;;  %v1795_v28 = vld [vmem:[#allocation2 + $0x30] sm:$0xff]  ;;  %v9527_v17 = vld [vmem:[%s1240_s3] ss:$0 sm:$0xff] }
 0x3da   : > { %1688 = vst.msk [vmem:[#allocation2 + $0x40] sm:$0xff] %vm1587_vm1, %v1682_v27  ;;  %v1684_v29 = vpop.permute.xlu1 %1683  ;;  %7169 = vmatprep.mubr.msk.f32.mxu1 %vm1587_vm1, %v1795_v28  ;;  %7462 = vmatprep.subr.msk.bf16.mxu1 %vm9375_vm2, %v7460_v26  ;;  %v1796_v34 = vld [vmem:[#allocation2 + $0x38] sm:$0xff] }
 0x3db   : > { %1689 = vst.msk [vmem:[#allocation2 + $0x48] sm:$0xff] %vm1587_vm1, %v1684_v29 }
 0x3dd   : > { %v1745_v30 = vpop.permute.xlu0 %1744  ;;  %v1815_v31 = vld [vmem:[#allocation3 + $0x50] sm:$0xff] }
 0x3de   : > { %1751 = vst.msk [vmem:[#allocation3 + $0x60] sm:$0xff] %vm1587_vm1, %v1745_v30  ;;  %v1747_v32 = vpop.permute.xlu1 %1746  ;;  %v1816_v33 = vld [vmem:[#allocation3 + $0x58] sm:$0xff] }
 0x3df   : > { %1752 = vst.msk [vmem:[#allocation3 + $0x68] sm:$0xff] %vm1587_vm1, %v1747_v32  ;;  %v7466_v35 = vpack.c.bf16 %v1816_v33, %v1815_v31 }
 0x3e0   : > { %7170 = vmatmul.mubr.msk.f32.vlgmr.msra.gmra.mrb[10].mxu1 %vm1587_vm1, %v1796_v34 }
 0x3e1   : > { %v1709_v36 = vpop.permute.xlu0 %1708  ;;  %7465 = vmatpush3.bf16.xpose.msk.msra.mxu1 %vm9375_vm2, %v7460_v26  ;;  %v1797_v37 = vld [vmem:[#allocation2 + $0x40] sm:$0xff] }
 0x3e2   : > { %1715 = vst.msk [vmem:[#allocation2 + $0x50] sm:$0xff] %vm1587_vm1, %v1709_v36  ;;  %v1711_v38 = vpop.permute.xlu1 %1710  ;;  %7176 = vmatprep.mubr.msk.f32.mxu1 %vm1587_vm1, %v1797_v37  ;;  %7468 = vmatprep.subr.msk.bf16.mxu1 %vm9375_vm2, %v7466_v35  ;;  %v1798_v44 = vld [vmem:[#allocation2 + $0x48] sm:$0xff] }
 0x3e3   : > { %1716 = vst.msk [vmem:[#allocation2 + $0x58] sm:$0xff] %vm1587_vm1, %v1711_v38 }
 0x3e5   : > { %v1772_v39 = vpop.permute.xlu0 %1771  ;;  %v1817_v40 = vld [vmem:[#allocation3 + $0x60] sm:$0xff] }
 0x3e6   : > { %1778 = vst.msk [vmem:[#allocation3 + $0x70] sm:$0xff] %vm1587_vm1, %v1772_v39  ;;  %v1774_v41 = vpop.permute.xlu1 %1773  ;;  %v1818_v43 = vld [vmem:[#allocation3 + $0x68] sm:$0xff] }
 0x3e7   : > { %1779 = vst.msk [vmem:[#allocation3 + $0x78] sm:$0xff] %vm1587_vm1, %v1774_v41  ;;  %v7472_v45 = vpack.c.bf16 %v1818_v43, %v1817_v40 }
 0x3e8   : > { %7177 = vmatmul.mubr.msk.f32.vlgmr.msra.gmra.mrb[12].mxu1 %vm1587_vm1, %v1798_v44 }
 0x3e9   : > { %v1736_v46 = vpop.permute.xlu0 %1735  ;;  %7471 = vmatpush3.bf16.xpose.msk.msra.mxu1 %vm9375_vm2, %v7466_v35  ;;  %v1799_v47 = vld [vmem:[#allocation2 + $0x50] sm:$0xff] }
 0x3ea   : > { %1742 = vst.msk [vmem:[#allocation2 + $0x60] sm:$0xff] %vm1587_vm1, %v1736_v46  ;;  %v1738_v48 = vpop.permute.xlu1 %1737  ;;  %7183 = vmatprep.mubr.msk.f32.mxu1 %vm1587_vm1, %v1799_v47  ;;  %7474 = vmatprep.subr.msk.bf16.mxu1 %vm9375_vm2, %v7472_v45  ;;  %v1800_v55 = vld [vmem:[#allocation2 + $0x58] sm:$0xff] }
 0x3eb   : > { %1743 = vst.msk [vmem:[#allocation2 + $0x68] sm:$0xff] %vm1587_vm1, %v1738_v48 }
 0x3ed   : > { %v1763_v49 = vpop.permute.xlu0 %1762  ;;  %v1819_v51 = vld [vmem:[#allocation3 + $0x70] sm:$0xff] }
 0x3ee   : > { %1769 = vst.msk [vmem:[#allocation2 + $0x70] sm:$0xff] %vm1587_vm1, %v1763_v49  ;;  %v1765_v52 = vpop.permute.xlu1 %1764  ;;  %v1820_v54 = vld [vmem:[#allocation3 + $0x78] sm:$0xff] }
 0x3ef   : > { %1770 = vst.msk [vmem:[#allocation2 + $0x78] sm:$0xff] %vm1587_vm1, %v1765_v52  ;;  %v7478_v56 = vpack.c.bf16 %v1820_v54, %v1819_v51 }
 0x3f0   : > { %7184 = vmatmul.mubr.msk.f32.vlgmr.msra.gmra.mrb[14].mxu1 %vm1587_vm1, %v1800_v55 }
 0x3f1   : > { %7477 = vmatpush3.bf16.xpose.msk.msra.mxu1 %vm9375_vm2, %v7472_v45  ;;  %v1801_v57 = vld [vmem:[#allocation2 + $0x60] sm:$0xff]  ;;  %v1673_v58 = vpop.permute.xlu0 %1672 }
 0x3f2   : > { %7190 = vmatprep.mubr.msk.f32.mxu1 %vm1587_vm1, %v1801_v57  ;;  %7480 = vmatprep.subr.msk.bf16.mxu1 %vm9375_vm2, %v7478_v56  ;;  %v1619_v59 = vpop.permute.xlu1 %1618  ;;  %1679 = vst.msk [vmem:[#allocation4 + $0x30] sm:$0xff] %vm1587_vm1, %v1673_v58  ;;  %v1802_v62 = vld [vmem:[#allocation2 + $0x68] sm:$0xff] }
 0x3f3   : > { %1625 = vst.msk [vmem:[#allocation4 + $0x10] sm:$0xff] %vm1587_vm1, %v1619_v59 }
 0x3f5   : > { %v1700_v60 = vpop.permute.xlu0 %1699  ;;  %v1803_v63 = vld [vmem:[#allocation2 + $0x70] sm:$0xff] }
 0x3f6   : > { %v1646_v61 = vpop.permute.xlu1 %1645  ;;  %1706 = vst.msk [vmem:[#allocation4 + $0x40] sm:$0xff] %vm1587_vm1, %v1700_v60  ;;  %v1804_v5 = vld [vmem:[#allocation2 + $0x78] sm:$0xff] }
 0x3f7   : > { %1652 = vst.msk [vmem:[#allocation4 + $0x20] sm:$0xff] %vm1587_vm1, %v1646_v61 }
 0x3f8   : > { %7191 = vmatmul.mubr.msk.f32.vlgmr.msra.gmra.mrb[16].mxu1 %vm1587_vm1, %v1802_v62 }
 0x3f9   : > { %7483 = vmatpush3.bf16.xpose.msk.msra.mxu1 %vm9375_vm2, %v7478_v56  ;;  %7197 = vmatprep.mubr.msk.f32.mxu1 %vm1587_vm1, %v1803_v63  ;;  %v1727_v1 = vpop.permute.xlu0 %1726  ;;  %v1827_v10 = vld [vmem:[#allocation4 + $0x30] sm:$0xff] }
 0x3fa   : > { %v1648_v2 = vpop.permute.xlu1 %1647  ;;  %1733 = vst.msk [vmem:[#allocation4 + $0x50] sm:$0xff] %vm1587_vm1, %v1727_v1  ;;  %v1823_v8 = vld [vmem:[#allocation4 + $0x10] sm:$0xff] }
 0x3fb   : > { %1653 = vst.msk [vmem:[#allocation4 + $0x28] sm:$0xff] %vm1587_vm1, %v1648_v2 }
 0x3fd   : > { %v1621_v3 = vpop.permute.xlu0 %1620 }
 0x3fe   : > { %v1675_v4 = vpop.permute.xlu1 %1674  ;;  %1626 = vst.msk [vmem:[#allocation4 + $0x18] sm:$0xff] %vm1587_vm1, %v1621_v3  ;;  %v1825_v6 = vld [vmem:[#allocation4 + $0x20] sm:$0xff] }
 0x3ff   : > { %1680 = vst.msk [vmem:[#allocation4 + $0x38] sm:$0xff] %vm1587_vm1, %v1675_v4 }
 0x400   : > { %7198 = vmatmul.mubr.msk.f32.vlgmr.msra.gmra.mrb[18].mxu1 %vm1587_vm1, %v1804_v5 }
 0x402   : > { %v1702_v42 = vpop.permute.xlu1 %1701  ;;  %v1826_v7 = vld [vmem:[#allocation4 + $0x28] sm:$0xff] }
 0x403   : > { %1707 = vst.msk [vmem:[#allocation4 + $0x48] sm:$0xff] %vm1587_vm1, %v1702_v42  ;;  %v9514_v9 = vpack.c.bf16 %v1826_v7, %v1825_v6 }
 0x405   : > { %v1824_v11 = vld [vmem:[#allocation4 + $0x18] sm:$0xff]  ;;  %7493 = vmatprep.subr.bf16.mxu0 %v9514_v9 }
 0x406   : > { %v1729_v12 = vpop.permute.xlu1 %1728  ;;  %v7488_v13 = vpack.c.bf16 %v1824_v11, %v1823_v8  ;;  %v1828_v14 = vld [vmem:[#allocation4 + $0x38] sm:$0xff] }
 0x407   : > { %1734 = vst.msk [vmem:[#allocation4 + $0x58] sm:$0xff] %vm1587_vm1, %v1729_v12  ;;  %v9518_v15 = vpack.c.bf16 %v1828_v14, %v1827_v10 }
 0x408   : > { %7489 = vmatprep.subr.bf16.mxu1 %v7488_v13 }
 0x409   : > { %7491 = vmatpush3.bf16.msra.mxu1 %v7488_v13 }
 0x40a   : > { %7497 = vmatprep.subr.bf16.mxu1 %v9518_v15 }
 0x42e   : > { %v7150_v16 = vpop.f32.mrb[4].mxu1 }
 0x42f   : > { %v2534_v18 = vmul.f32 0.25, %v7150_v16  ;;  %v1915_v19 = vpop.f32.mrb[5].mxu1 }
 0x430   : > { %v2533_v20 = vmul.f32 0.25, %v1915_v19 }
 0x431   : > { %v2556_v21 = vadd.f32 %v9527_v17, %v2534_v18 }
 0x432   : > { %v2555_v22 = vadd.f32 %v9527_v17, %v2533_v20 }
 0x433   : > { %v2574_v23 = vsel %vm1587_vm1, %v2556_v21, -inf }
 0x434   : > { %2575 = vmax.xlane.f32.xlu1 %v2574_v23  ;;  %v2571_v24 = vsel %vm1587_vm1, %v2555_v22, -inf }
 0x435   : > { %2572 = vmax.xlane.f32.xlu0 %v2571_v24 }
 0x4a3   : > { %v7157_v25 = vpop.f32.mrb[6].mxu1 }
 0x4a4   : > { %v2536_v26 = vmul.f32 0.25, %v7157_v25  ;;  %v2002_v27 = vpop.f32.mrb[7].mxu1 }
 0x4a5   : > { %v2535_v28 = vmul.f32 0.25, %v2002_v27 }
 0x4a6   : > { %v9534_v29 = vadd.f32 %v9527_v17, %v2536_v26 }
 0x4a7   : > { %v9539_v31 = vadd.f32 %v9527_v17, %v2535_v28 }
 0x4a8   : > { %v2580_v30 = vsel %vm1587_vm1, %v9534_v29, -inf }
 0x4a9   : > { %2581 = vmax.xlane.f32.xlu0 %v2580_v30  ;;  %v2577_v35 = vsel %vm1587_vm1, %v9539_v31, -inf }
 0x4ab   : > { %v7164_v32 = vpop.f32.mrb[8].mxu1 }
 0x4ac   : > { %v2538_v33 = vmul.f32 0.25, %v7164_v32  ;;  %v2089_v34 = vpop.f32.mrb[9].mxu1 }
 0x4ad   : > { %v2537_v36 = vmul.f32 0.25, %v2089_v34  ;;  %2578 = vmax.xlane.f32.xlu0 %v2577_v35 }
 0x4ae   : > { %v9544_v37 = vadd.f32 %v9527_v17, %v2538_v33 }
 0x4af   : > { %v9547_v38 = vadd.f32 %v9527_v17, %v2537_v36 }
 0x4b0   : > { %v2586_v39 = vsel %vm1587_vm1, %v9544_v37, -inf }
 0x4b1   : > { %2587 = vmax.xlane.f32.xlu0 %v2586_v39  ;;  %v2583_v40 = vsel %vm1587_vm1, %v9547_v38, -inf }
 0x4b2   : > { %2584 = vmax.xlane.f32.xlu1 %v2583_v40 }
 0x4b3   : > { %v7171_v41 = vpop.f32.mrb[10].mxu1 }
 0x4b4   : > { %v2540_v43 = vmul.f32 0.25, %v7171_v41  ;;  %v2176_v44 = vpop.f32.mrb[11].mxu1 }
 0x4b5   : > { %v2539_v45 = vmul.f32 0.25, %v2176_v44 }
 0x4b6   : > { %v9554_v46 = vadd.f32 %v9527_v17, %v2540_v43 }
 0x4b7   : > { %v9557_v47 = vadd.f32 %v9527_v17, %v2539_v45 }
 0x4b8   : > { %v2592_v48 = vsel %vm1587_vm1, %v9554_v46, -inf }
 0x4b9   : > { %2593 = vmax.xlane.f32.xlu0 %v2592_v48  ;;  %v2589_v49 = vsel %vm1587_vm1, %v9557_v47, -inf }
 0x4ba   : > { %2590 = vmax.xlane.f32.xlu1 %v2589_v49 }
 0x4bb   : > { %v7178_v51 = vpop.f32.mrb[12].mxu1 }
 0x4bc   : > { %v2542_v52 = vmul.f32 0.25, %v7178_v51  ;;  %v2263_v54 = vpop.f32.mrb[13].mxu1 }
 0x4bd   : > { %v2541_v55 = vmul.f32 0.25, %v2263_v54 }
 0x4be   : > { %v9564_v56 = vadd.f32 %v9527_v17, %v2542_v52 }
 0x4bf   : > { %v9567_v57 = vadd.f32 %v9527_v17, %v2541_v55 }
 0x4c0   : > { %v2598_v58 = vsel %vm1587_vm1, %v9564_v56, -inf }
 0x4c1   : > { %v2576_v59 = vpop.xlane.xlu1 %2575  ;;  %2599 = vmax.xlane.f32.xlu0 %v2598_v58  ;;  %v2595_v60 = vsel %vm1587_vm1, %v9567_v57, -inf }
 0x4c2   : > { %v2620_v61 = vsub.f32 %v2556_v21, %v2576_v59  ;;  %2596 = vmax.xlane.f32.xlu1 %v2595_v60  ;;  %v2573_v62 = vpop.xlane.xlu0 %2572 }
 0x4c3   : > { %v2619_v63 = vsub.f32 %v2555_v22, %v2573_v62  ;;  %v7185_v1 = vpop.f32.mrb[14].mxu1 }
 0x4c4   : > { %v2637_v2 = vmul.f32 1.442695, %v2620_v61  ;;  %v2544_v3 = vmul.f32 0.25, %v7185_v1  ;;  %v2350_v4 = vpop.f32.mrb[15].mxu1 }
 0x4c5   : > { %v2635_v5 = vmul.f32 1.442695, %v2619_v63  ;;  %v2543_v6 = vmul.f32 0.25, %v2350_v4 }
 0x4c6   : > { %v9574_v42 = vadd.f32 %v9527_v17, %v2544_v3  ;;  %7888 = vpow2.f32 %v2637_v2 }
 0x4c7   : > { %v9577_v7 = vadd.f32 %v9527_v17, %v2543_v6  ;;  %7890 = vpow2.f32 %v2635_v5 }
 0x4c8   : > { %v2604_v8 = vsel %vm1587_vm1, %v9574_v42, -inf }
 0x4c9   : > { %2605 = vmax.xlane.f32.xlu0 %v2604_v8  ;;  %v2601_v10 = vsel %vm1587_vm1, %v9577_v7, -inf }
 0x4ca   : > { %2602 = vmax.xlane.f32.xlu1 %v2601_v10 }
 0x4cb   : > { %v7192_v11 = vpop.f32.mrb[16].mxu1 }
 0x4cc   : > { %v2546_v12 = vmul.f32 0.25, %v7192_v11  ;;  %v2437_v13 = vpop.f32.mrb[17].mxu1 }
 0x4cd   : > { %v2545_v14 = vmul.f32 0.25, %v2437_v13 }
 0x4ce   : > { %v9584_v16 = vadd.f32 %v9527_v17, %v2546_v12 }
 0x4cf   : > { %v9587_v18 = vadd.f32 %v9527_v17, %v2545_v14 }
 0x4d0   : > { %v2610_v19 = vsel %vm1587_vm1, %v9584_v16, -inf  ;;  %v9591_v20 = vpop.eup %7888 }
 0x4d1   : > { %2611 = vmax.xlane.f32.xlu0 %v2610_v19  ;;  %v2607_v21 = vsel %vm1587_vm1, %v9587_v18, -inf  ;;  %v9595_v22 = vpop.eup %7890  ;;  %v2670_v26 = vsel %vm1587_vm1, %v9591_v20, 0.0 }
 0x4d2   : > { %2608 = vmax.xlane.f32.xlu1 %v2607_v21  ;;  %v2667_v28 = vsel %vm1587_vm1, %v9595_v22, 0.0 }
 0x4d3   : > { %v7199_v23 = vpop.f32.mrb[18].mxu1 }
 0x4d4   : > { %v2548_v24 = vmul.f32 0.25, %v7199_v23  ;;  %v2524_v25 = vpop.f32.mrb[19].mxu1 }
 0x4d5   : > { %v2547_v27 = vmul.f32 0.25, %v2524_v25  ;;  %2671 = vadd.xlane.f32.xlu0 %v2670_v26 }
 0x4d6   : > { %2668 = vadd.xlane.f32.xlu1 %v2667_v28  ;;  %v9602_v30 = vadd.f32 %v9527_v17, %v2548_v24 }
 0x4d7   : > { %v9605_v32 = vadd.f32 %v9527_v17, %v2547_v27 }
 0x4d8   : > { %v2616_v33 = vsel %vm1587_vm1, %v9602_v30, -inf }
 0x4d9   : > { %2617 = vmax.xlane.f32.xlu0 %v2616_v33  ;;  %v2613_v34 = vsel %vm1587_vm1, %v9605_v32, -inf }
 0x4da   : > { %2614 = vmax.xlane.f32.xlu1 %v2613_v34 }
 0x4eb   : > { %1755 = vrot.lane.b32.xlu1 %v9405_v53, %s8746_s5 }
 0x4ef   : > { %1753 = vrot.lane.b32.xlu0 %v9398_v50, %s8746_s5 }
 0x536   : > { %v2582_v35 = vpop.xlane.xlu0 %2581 }
 0x537   : > { %v2622_v36 = vsub.f32 %v9534_v29, %v2582_v35 }
 0x539   : > { %v2641_v39 = vmul.f32 1.442695, %v2622_v36 }
 0x53a   : > { %v2579_v17 = vpop.xlane.xlu0 %2578 }
 0x53b   : > { %7892 = vpow2.f32 %v2641_v39  ;;  %v2621_v40 = vsub.f32 %v9539_v31, %v2579_v17 }
 0x53d   : > { %v2639_v41 = vmul.f32 1.442695, %v2621_v40 }
 0x53e   : > { %v2588_v43 = vpop.xlane.xlu0 %2587 }
 0x53f   : > { %7894 = vpow2.f32 %v2639_v41  ;;  %v2624_v44 = vsub.f32 %v9544_v37, %v2588_v43  ;;  %v2585_v45 = vpop.xlane.xlu1 %2584 }
 0x540   : > { %v2623_v48 = vsub.f32 %v9547_v38, %v2585_v45 }
 0x541   : > { %v2645_v49 = vmul.f32 1.442695, %v2624_v44 }
 0x542   : > { %v2643_v51 = vmul.f32 1.442695, %v2623_v48 }
 0x543   : > { %7896 = vpow2.f32 %v2645_v49 }
 0x544   : > { %7898 = vpow2.f32 %v2643_v51 }
 0x545   : > { %v9619_v52 = vpop.eup %7892 }
 0x546   : > { %v2594_v29 = vpop.xlane.xlu0 %2593  ;;  %v2676_v54 = vsel %vm1587_vm1, %v9619_v52, 0.0 }
 0x547   : > { %v2626_v31 = vsub.f32 %v9554_v46, %v2594_v29  ;;  %v2591_v55 = vpop.xlane.xlu1 %2590  ;;  %2677 = vadd.xlane.f32.xlu0 %v2676_v54 }
 0x548   : > { %v2625_v58 = vsub.f32 %v9557_v47, %v2591_v55 }
 0x549   : > { %v9625_v37 = vpop.eup %7894  ;;  %v2649_v59 = vmul.f32 1.442695, %v2626_v31 }
 0x54a   : > { %v2647_v38 = vmul.f32 1.442695, %v2625_v58  ;;  %v2673_v60 = vsel %vm1587_vm1, %v9625_v37, 0.0  ;;  %v1829_v58 = vld [vmem:[#allocation4 + $0x40] sm:$0xff] }
 0x54b   : > { %7900 = vpow2.f32 %v2649_v59  ;;  %2674 = vadd.xlane.f32.xlu1 %v2673_v60  ;;  %v1830_v59 = vld [vmem:[#allocation4 + $0x48] sm:$0xff] }
 0x54c   : > { %7902 = vpow2.f32 %v2647_v38  ;;  %v7500_v60 = vpack.c.bf16 %v1830_v59, %v1829_v58 }
 0x54d   : > { %v9629_v61 = vpop.eup %7896 }
 0x54e   : > { %v9631_v62 = vpop.eup %7898  ;;  %v2600_v63 = vpop.xlane.xlu0 %2599  ;;  %v2682_v46 = vsel %vm1587_vm1, %v9629_v61, 0.0 }
 0x54f   : > { %v2628_v47 = vsub.f32 %v9564_v56, %v2600_v63  ;;  %v2597_v1 = vpop.xlane.xlu1 %2596  ;;  %2683 = vadd.xlane.f32.xlu0 %v2682_v46  ;;  %v2679_v2 = vsel %vm1587_vm1, %v9631_v62, 0.0 }
 0x550   : > { %v2627_v3 = vsub.f32 %v9567_v57, %v2597_v1  ;;  %2680 = vadd.xlane.f32.xlu1 %v2679_v2 }
 0x551   : > { %v2653_v4 = vmul.f32 1.442695, %v2628_v47 }
 0x552   : > { %v2651_v5 = vmul.f32 1.442695, %v2627_v3 }
 0x553   : > { %7904 = vpow2.f32 %v2653_v4 }
 0x554   : > { %7906 = vpow2.f32 %v2651_v5 }
 0x555   : > { %v9639_v6 = vpop.eup %7900 }
 0x556   : > { %v9641_v8 = vpop.eup %7902  ;;  %v2606_v10 = vpop.xlane.xlu0 %2605  ;;  %v2688_v56 = vsel %vm1587_vm1, %v9639_v6, 0.0 }
 0x557   : > { %v2630_v11 = vsub.f32 %v9574_v42, %v2606_v10  ;;  %v2603_v12 = vpop.xlane.xlu1 %2602  ;;  %2689 = vadd.xlane.f32.xlu0 %v2688_v56  ;;  %v2685_v57 = vsel %vm1587_vm1, %v9641_v8, 0.0  ;;  %v1831_v56 = vld [vmem:[#allocation4 + $0x50] sm:$0xff] }
 0x558   : > { %v2629_v13 = vsub.f32 %v9577_v7, %v2603_v12  ;;  %2686 = vadd.xlane.f32.xlu1 %v2685_v57 }
 0x559   : > { %v2657_v14 = vmul.f32 1.442695, %v2630_v11  ;;  %v1832_v11 = vld [vmem:[#allocation4 + $0x58] sm:$0xff] }
 0x55a   : > { %v2655_v19 = vmul.f32 1.442695, %v2629_v13  ;;  %v7504_v57 = vpack.c.bf16 %v1832_v11, %v1831_v56  ;;  %v7813_v56 = vld [vmem:[#allocation20 + $0x28] sm:$0xff]  }
 0x55b   : > { %7908 = vpow2.f32 %v2657_v14 }
 0x55c   : > { %7910 = vpow2.f32 %v2655_v19 }
 0x55d   : > { %v9649_v21 = vpop.eup %7904 }
 0x55e   : > { %v9651_v23 = vpop.eup %7906  ;;  %v2612_v24 = vpop.xlane.xlu0 %2611  ;;  %v2694_v42 = vsel %vm1587_vm1, %v9649_v21, 0.0 }
 0x55f   : > { %v2632_v25 = vsub.f32 %v9584_v16, %v2612_v24  ;;  %v2609_v26 = vpop.xlane.xlu1 %2608  ;;  %2695 = vadd.xlane.f32.xlu0 %v2694_v42  ;;  %v2691_v7 = vsel %vm1587_vm1, %v9651_v23, 0.0 }
 0x560   : > { %v2631_v27 = vsub.f32 %v9587_v18, %v2609_v26  ;;  %2692 = vadd.xlane.f32.xlu1 %v2691_v7 }
 0x561   : > { %v2661_v28 = vmul.f32 1.442695, %v2632_v25 }
 0x562   : > { %v2659_v33 = vmul.f32 1.442695, %v2631_v27  ;;  %v2672_v34 = vpop.xlane.xlu0 %2671 }
 0x563   : > { %7912 = vpow2.f32 %v2661_v28  ;;  %v2669_v35 = vpop.xlane.xlu1 %2668 }
 0x564   : > { %7914 = vpow2.f32 %v2659_v33 }
 0x565   : > { %v9659_v36 = vpop.eup %7908  ;;  %7916 = vrcp.f32 %v2672_v34 }
 0x566   : > { %v9661_v39 = vpop.eup %7910  ;;  %7918 = vrcp.f32 %v2669_v35  ;;  %v2618_v16 = vpop.xlane.xlu0 %2617  ;;  %v2700_v17 = vsel %vm1587_vm1, %v9659_v36, 0.0 }
 0x567   : > { %v2634_v40 = vsub.f32 %v9602_v30, %v2618_v16  ;;  %v2615_v18 = vpop.xlane.xlu1 %2614  ;;  %2701 = vadd.xlane.f32.xlu0 %v2700_v17  ;;  %v2697_v41 = vsel %vm1587_vm1, %v9661_v39, 0.0 }
 0x568   : > { %v2633_v43 = vsub.f32 %v9605_v32, %v2615_v18  ;;  %2698 = vadd.xlane.f32.xlu1 %v2697_v41 }
 0x569   : > { %v2665_v44 = vmul.f32 1.442695, %v2634_v40 }
 0x56a   : > { %v2663_v45 = vmul.f32 1.442695, %v2633_v43  ;;  %v1754_v48 = vpop.permute.xlu0 %1753 }
 0x56b   : > { %7920 = vpow2.f32 %v2665_v44  ;;  %1760 = vst.msk [vmem:[#allocation4 + $0x60] sm:$0xff] %vm1587_vm1, %v1754_v48  ;;  %v1756_v49 = vpop.permute.xlu1 %1755 }
 0x56c   : > { %7922 = vpow2.f32 %v2663_v45  ;;  %1761 = vst.msk [vmem:[#allocation4 + $0x68] sm:$0xff] %vm1587_vm1, %v1756_v49 }
 0x56d   : > { %v9671_v51 = vpop.eup %7912 }
 0x56e   : > { %v9673_v30 = vpop.eup %7914  ;;  %v2706_v29 = vsel %vm1587_vm1, %v9671_v51, 0.0 }
 0x56f   : > { %v7917_v54 = vpop.eup %7916  ;;  %2707 = vadd.xlane.f32.xlu0 %v2706_v29  ;;  %v2703_v32 = vsel %vm1587_vm1, %v9673_v30, 0.0 }
 0x570   : > { %v7919_v31 = vpop.eup %7918  ;;  %2704 = vadd.xlane.f32.xlu1 %v2703_v32  ;;  %v2732_v38 = vmul.f32 %v7917_v54, %v9591_v20 }
 0x571   : > { %v2731_v55 = vmul.f32 %v7919_v31, %v9595_v22 }
 0x573   : > { %7204 = vmatprep.mubr.msk.f32.mxu0 %vm1587_vm1, %v2731_v55  ;;  %v1834_v19 = vld [vmem:[#allocation4 + $0x68] sm:$0xff] }
 0x574   : > { %7205 = vmatmul.mubr.msk.f32.vlgmr.msra.gmra.mrb[8].mxu0 %vm1587_vm1, %v2732_v38 }
 0x575   : > { %v9683_v63 = vpop.eup %7920  ;;  %7495 = vmatpush3.bf16.msra.mxu0 %v9514_v9 }
 0x576   : > { %v9686_v46 = vpop.eup %7922  ;;  %7501 = vmatprep.subr.bf16.mxu0 %v7500_v60  ;;  %v2712_v47 = vsel %vm1587_vm1, %v9683_v63, 0.0 }
 0x577   : > { %2713 = vadd.xlane.f32.xlu0 %v2712_v47  ;;  %v2709_v22 = vsel %vm1587_vm1, %v9686_v46, 0.0  ;;  %v7808_v47 = vld [vmem:[#allocation20] sm:$0xff]  }
 0x578   : > { %2710 = vadd.xlane.f32.xlu1 %v2709_v22  ;;  %v7809_v22 = vld [vmem:[#allocation20 + $0x8] sm:$0xff]  }
 0x589   : > { %1782 = vrot.lane.b32.xlu1 %v9405_v53, %s8747_s21 }
 0x58d   : > { %1780 = vrot.lane.b32.xlu0 %v9398_v50, %s8747_s21 }
 0x5d4   : > { %v2678_v20 = vpop.xlane.xlu0 %2677 }
 0x5d5   : > { %7924 = vrcp.f32 %v2678_v20 }
 0x5d8   : > { %v2675_v9 = vpop.xlane.xlu1 %2674 }
 0x5d9   : > { %7926 = vrcp.f32 %v2675_v9 }
 0x5dc   : > { %v2684_v1 = vpop.xlane.xlu0 %2683 }
 0x5dd   : > { %7928 = vrcp.f32 %v2684_v1  ;;  %v2681_v2 = vpop.xlane.xlu1 %2680  ;;  %v7810_v1 = vld [vmem:[#allocation20 + $0x10] sm:$0xff]  }
 0x5de   : > { %7930 = vrcp.f32 %v2681_v2  ;;  %v7811_v2 = vld [vmem:[#allocation20 + $0x18] sm:$0xff]  }
 0x5df   : > { %v7925_v3 = vpop.eup %7924 }
 0x5e0   : > { %v2734_v12 = vmul.f32 %v7925_v3, %v9619_v52 }
 0x5e3   : > { %v7927_v4 = vpop.eup %7926 }
 0x5e4   : > { %v2690_v5 = vpop.xlane.xlu0 %2689  ;;  %v2733_v10 = vmul.f32 %v7927_v4, %v9625_v37  ;;  %v1833_v37 = vld [vmem:[#allocation4 + $0x60] sm:$0xff] }
 0x5e5   : > { %7932 = vrcp.f32 %v2690_v5  ;;  %v2687_v53 = vpop.xlane.xlu1 %2686  ;;  %v7508_v42 = vpack.c.bf16 %v1834_v19, %v1833_v37  ;;  %v7812_v5 = vld [vmem:[#allocation20 + $0x20] sm:$0xff]  }
 0x5e6   : > { %7934 = vrcp.f32 %v2687_v53  ;;  %7211 = vmatprep.mubr.msk.f32.mxu1 %vm1587_vm1, %v2733_v10  ;;  %v7814_v53 = vld [vmem:[#allocation20 + $0x30] sm:$0xff]  }
 0x5e7   : > { %v7929_v50 = vpop.eup %7928  ;;  %7212 = vmatmul.mubr.msk.f32.vlgmr.msra.gmra.mrb[20].mxu1 %vm1587_vm1, %v2734_v12  ;;  %v7815_v12 = vld [vmem:[#allocation20 + $0x38] sm:$0xff]  }
 0x5e8   : > { %v7931_v13 = vpop.eup %7930  ;;  %7499 = vmatpush3.bf16.msra.mxu1 %v9518_v15  ;;  %v2736_v24 = vmul.f32 %v7929_v50, %v9629_v61 }
 0x5e9   : > { %7505 = vmatprep.subr.bf16.mxu1 %v7504_v57  ;;  %v2735_v14 = vmul.f32 %v7931_v13, %v9631_v62 }
 0x5eb   : > { %7218 = vmatprep.mubr.msk.f32.mxu0 %vm1587_vm1, %v2735_v14 }
 0x5ec   : > { %v2696_v52 = vpop.xlane.xlu0 %2695  ;;  %7219 = vmatmul.mubr.msk.f32.vlgmr.msra.gmra.mrb[10].mxu0 %vm1587_vm1, %v2736_v24 }
 0x5ed   : > { %7936 = vrcp.f32 %v2696_v52  ;;  %7503 = vmatpush3.bf16.msra.mxu0 %v7500_v60  ;;  %v2693_v25 = vpop.xlane.xlu1 %2692 }
 0x5ee   : > { %7938 = vrcp.f32 %v2693_v25  ;;  %7509 = vmatprep.subr.bf16.mxu0 %v7508_v42 }
 0x5ef   : > { %v7933_v26 = vpop.eup %7932 }
 0x5f0   : > { %v7935_v15 = vpop.eup %7934  ;;  %v2738_v62 = vmul.f32 %v7933_v26, %v9639_v6 }
 0x5f1   : > { %v2737_v7 = vmul.f32 %v7935_v15, %v9641_v8 }
 0x5f3   : > { %7225 = vmatprep.mubr.msk.f32.mxu1 %vm1587_vm1, %v2737_v7 }
 0x5f4   : > { %7226 = vmatmul.mubr.msk.f32.vlgmr.msra.gmra.mrb[22].mxu1 %vm1587_vm1, %v2738_v62  ;;  %v2702_v61 = vpop.xlane.xlu0 %2701 }
 0x5f5   : > { %7507 = vmatpush3.bf16.msra.mxu1 %v7504_v57  ;;  %7940 = vrcp.f32 %v2702_v61  ;;  %v2699_v27 = vpop.xlane.xlu1 %2698 }
 0x5f6   : > { %7942 = vrcp.f32 %v2699_v27 }
 0x5f7   : > { %v7937_v28 = vpop.eup %7936 }
 0x5f8   : > { %v7939_v33 = vpop.eup %7938  ;;  %v2740_v35 = vmul.f32 %v7937_v28, %v9649_v21 }
 0x5f9   : > { %v2739_v34 = vmul.f32 %v7939_v33, %v9651_v23 }
 0x5fb   : > { %7232 = vmatprep.mubr.msk.f32.mxu0 %vm1587_vm1, %v2739_v34 }
 0x5fc   : > { %v2708_v8 = vpop.xlane.xlu0 %2707  ;;  %7233 = vmatmul.mubr.msk.f32.vlgmr.msra.gmra.mrb[12].mxu0 %vm1587_vm1, %v2740_v35  ;;  %v6746_v35 = vld [vmem:[#allocation21] ss:$0 sm:$0xff] }
 0x5fd   : > { %7944 = vrcp.f32 %v2708_v8  ;;  %7511 = vmatpush3.bf16.msra.mxu0 %v7508_v42  ;;  %v2705_v6 = vpop.xlane.xlu1 %2704 }
 0x5fe   : > { %7946 = vrcp.f32 %v2705_v6  ;;  %7256 = vmatprep.subr.bf16.mxu0 %v8739_v0 }
 0x5ff   : > { %v7941_v16 = vpop.eup %7940 }
 0x600   : > { %v7943_v17 = vpop.eup %7942  ;;  %v2742_v18 = vmul.f32 %v7941_v16, %v9659_v36 }
 0x601   : > { %v2741_v40 = vmul.f32 %v7943_v17, %v9661_v39 }
 0x603   : > { %7239 = vmatprep.mubr.msk.f32.mxu1 %vm1587_vm1, %v2741_v40 }
 0x604   : > { %7240 = vmatmul.mubr.msk.f32.vlgmr.msra.gmra.mrb[24].mxu1 %vm1587_vm1, %v2742_v18  ;;  %v2714_v21 = vpop.xlane.xlu0 %2713 }
 0x605   : > { %v2711_v23 = vpop.xlane.xlu1 %2710 }
 0x606   : > { %7948 = vrcp.f32 %v2711_v23 }
 0x607   : > { %v7945_v41 = vpop.eup %7944  ;;  %7950 = vrcp.f32 %v2714_v21  ;;  %v8040_v21 = vld [vmem:[%s9281_s9] sm:$0xff] }
 0x608   : > { %v7947_v43 = vpop.eup %7946  ;;  %v1781_v44 = vpop.permute.xlu0 %1780  ;;  %v2744_v36 = vmul.f32 %v7945_v41, %v9671_v51  ;;  %v8041_v41 = vld [vmem:[%s9281_s9 + $0x8] sm:$0xff]  ;;  %s10359_s9 = sld [smem:[#allocation65_spill]] }
 0x609   : > { %1787 = vst.msk [vmem:[#allocation4 + $0x70] sm:$0xff] %vm1587_vm1, %v1781_v44  ;;  %v1783_v45 = vpop.permute.xlu1 %1782  ;;  %v2743_v48 = vmul.f32 %v7947_v43, %v9673_v30  ;;  %v7816_v44 = vld [vmem:[#allocation29] sm:$0xff]  }
 0x60a   : > { %1788 = vst.msk [vmem:[#allocation4 + $0x78] sm:$0xff] %vm1587_vm1, %v1783_v45  ;;  %v7817_v45 = vld [vmem:[#allocation29 + $0x8] sm:$0xff]  }
 0x60b   : > { %7246 = vmatprep.mubr.msk.f32.mxu0 %vm1587_vm1, %v2743_v48  ;;  %v7818_v48 = vld [vmem:[#allocation29 + $0x10] sm:$0xff]  }
 0x60c   : > { %7247 = vmatmul.mubr.msk.f32.vlgmr.msra.gmra.mrb[14].mxu0 %vm1587_vm1, %v2744_v36  ;;  %v7819_v36 = vld [vmem:[#allocation29 + $0x18] sm:$0xff]  }
 0x60d   : > { %7272 = vmatprep.mubr.msk.bf16.mxu0 %vm8740_vm0, %v8739_v0  ;;  %7257 = vmatpush3.bf16.msra.mxu0 %v7808_v47 }
 0x60e   : > { %7258 = vmatprep.subr.bf16.mxu0 %v8739_v0 }
 0x610   : > { %v7949_v39 = vpop.eup %7948  ;;  %v1835_v49 = vld [vmem:[#allocation4 + $0x70] sm:$0xff] }
 0x611   : > { %v2745_v29 = vmul.f32 %v7949_v39, %v9686_v46  ;;  %v1836_v54 = vld [vmem:[#allocation4 + $0x78] sm:$0xff]  ;;  %v7951_v31 = vpop.eup %7950  ;;  %7259 = vmatpush3.bf16.msra.mxu0 %v7809_v22 }
 0x612   : > { %v7512_v32 = vpack.c.bf16 %v1836_v54, %v1835_v49  ;;  %v2746_v51 = vmul.f32 %v7951_v31, %v9683_v63  ;;  %7260 = vmatprep.subr.bf16.mxu0 %v8739_v0  ;;  %v7826_v22 = vld [vmem:[#allocation26 + $0x10] sm:$0xff]  }
 0x613   : > { %7253 = vmatprep.mubr.msk.f32.mxu1 %vm1587_vm1, %v2745_v29 }
 0x614   : > { %7513 = vmatprep.subr.bf16.mxu1 %v7512_v32 }
 0x615   : > { %7515 = vmatpush3.bf16.msra.mxu1 %v7512_v32  ;;  %7261 = vmatpush3.bf16.msra.mxu0 %v7810_v1  ;;  %v7829_v1 = vld [vmem:[#allocation26 + $0x28] sm:$0xff]  }
 0x616   : > { %7276 = vmatprep.subr.bf16.mxu1 %v8739_v0  ;;  %7262 = vmatprep.subr.bf16.mxu0 %v8739_v0 }
 0x618   : > { %7254 = vmatmul.mubr.msk.f32.vlgmr.msra.gmra.mrb[26].mxu1 %vm1587_vm1, %v2746_v51 }
 0x619   : > { %7292 = vmatprep.mubr.msk.bf16.mxu1 %vm8740_vm0, %v8739_v0  ;;  %7263 = vmatpush3.bf16.msra.mxu0 %v7811_v2  ;;  %v7830_v2 = vld [vmem:[#allocation26 + $0x30] sm:$0xff]  }
 0x61a   : > { %7264 = vmatprep.subr.bf16.mxu0 %v8739_v0 }
 0x61d   : > { %7265 = vmatpush3.bf16.msra.mxu0 %v7812_v5 }
 0x61e   : > { %7266 = vmatprep.subr.bf16.mxu0 %v8739_v0 }
 0x621   : > { %7267 = vmatpush3.bf16.msra.mxu0 %v7813_v56 }
 0x622   : > { %7268 = vmatprep.subr.bf16.mxu0 %v8739_v0 }
 0x625   : > { %7269 = vmatpush3.bf16.msra.mxu0 %v7814_v53 }
 0x626   : > { %7270 = vmatprep.subr.bf16.mxu0 %v8739_v0 }
 0x629   : > { %7271 = vmatpush3.bf16.msra.mxu0 %v7815_v12 }
 0x62a   : > { %7296 = vmatprep.subr.bf16.mxu0 %v8739_v0 }
 0x647   : > { %v7206_v30 = vpop.f32.mrb[8].mxu0 }
 0x648   : > { %3396 = vst.msk [vmem:[#allocation5 + $0x8] sm:$0xff] %vm1587_vm1, %v7206_v30  ;;  %v2819_v55 = vpop.f32.mrb[9].mxu0 }
 0x649   : > { %3395 = vst.msk [vmem:[#allocation5] sm:$0xff] %vm1587_vm1, %v2819_v55  ;;  %v7820_v55 = vld [vmem:[#allocation29 + $0x20] sm:$0xff]  }
 0x6ba   : > { %v7213_v58 = vpop.f32.mrb[20].mxu1 }
 0x6bb   : > { %3401 = vrot.lane.b32.xlu1 %v7213_v58, %s8747_s21  ;;  %v2900_v59 = vpop.f32.mrb[21].mxu1  ;;  %v7821_v58 = vld [vmem:[#allocation29 + $0x28] sm:$0xff]  }
 0x6bc   : > { %3399 = vrot.lane.b32.xlu0 %v2900_v59, %s8747_s21  ;;  %v7822_v59 = vld [vmem:[#allocation26] sm:$0xff]  }
 0x6bd   : > { %7277 = vmatpush3.bf16.msra.mxu1 %v7822_v59 }
 0x6be   : > { %7278 = vmatprep.subr.bf16.mxu1 %v8739_v0 }
 0x6bf   : > { %v7220_v38 = vpop.f32.mrb[10].mxu0 }
 0x6c0   : > { %3412 = vrot.lane.b32.xlu1 %v7220_v38, %s8746_s5  ;;  %v2981_v60 = vpop.f32.mrb[11].mxu0  ;;  %v7823_v38 = vld [vmem:[#allocation29 + $0x30] sm:$0xff]  }
 0x6c1   : > { %3410 = vrot.lane.b32.xlu0 %v2981_v60, %s8746_s5  ;;  %v7824_v60 = vld [vmem:[#allocation26 + $0x8] sm:$0xff]  }
 0x6c2   : > { %7279 = vmatpush3.bf16.msra.mxu1 %v7824_v60 }
 0x6c3   : > { %7280 = vmatprep.subr.bf16.mxu1 %v8739_v0 }
 0x6c6   : > { %7281 = vmatpush3.bf16.msra.mxu1 %v7826_v22 }
 0x6c7   : > { %v7227_v63 = vpop.f32.mrb[22].mxu1  ;;  %7282 = vmatprep.subr.bf16.mxu1 %v8739_v0 }
 0x6c8   : > { %v3062_v46 = vpop.f32.mrb[23].mxu1  ;;  %3423 = vrot.lane.b32.xlu1 %v7227_v63, %s8745_s4  ;;  %v7825_v63 = vld [vmem:[#allocation29 + $0x38] sm:$0xff]  }
 0x6c9   : > { %3421 = vrot.lane.b32.xlu0 %v3062_v46, %s8745_s4  ;;  %v1247_v46 = vld [vmem:[%s9289_s28] sm:$0xff]  ;;  %s10362_s28 = sld [smem:[#allocation68_spill]] }
 0x6ca   : > { %v9793_v47 = vpack.c.bf16 %v1247_v46, %v1247_v46 }
 0x6cf   : > { %v7234_v20 = vpop.f32.mrb[12].mxu0 }
 0x6d0   : > { %3434 = vrot.lane.b32.xlu1 %v7234_v20, %s8744_s17  ;;  %v3143_v9 = vpop.f32.mrb[13].mxu0  ;;  %v7827_v20 = vld [vmem:[#allocation26 + $0x18] sm:$0xff]  }
 0x6d1   : > { %3432 = vrot.lane.b32.xlu0 %v3143_v9, %s8744_s17  ;;  %7283 = vmatpush3.bf16.msra.mxu1 %v7827_v20  ;;  %v7828_v9 = vld [vmem:[#allocation26 + $0x20] sm:$0xff]  }
 0x6d2   : > { %7284 = vmatprep.subr.bf16.mxu1 %v8739_v0 }
 0x6d5   : > { %7285 = vmatpush3.bf16.msra.mxu1 %v7828_v9 }
 0x6d6   : > { %7286 = vmatprep.subr.bf16.mxu1 %v8739_v0 }
 0x6d7   : > { %v7241_v3 = vpop.f32.mrb[24].mxu1 }
 0x6d8   : > { %v3224_v4 = vpop.f32.mrb[25].mxu1  ;;  %3445 = vrot.lane.b32.xlu1 %v7241_v3, %s8743_s23  ;;  %v7831_v3 = vld [vmem:[#allocation26 + $0x38] sm:$0xff]  }
 0x6d9   : > { %3443 = vrot.lane.b32.xlu0 %v3224_v4, %s8743_s23  ;;  %7287 = vmatpush3.bf16.msra.mxu1 %v7829_v1 }
 0x6da   : > { %7288 = vmatprep.subr.bf16.mxu1 %v8739_v0 }
 0x6dd   : > { %7289 = vmatpush3.bf16.msra.mxu1 %v7830_v2 }
 0x6de   : > { %7290 = vmatprep.subr.bf16.mxu1 %v8739_v0 }
 0x6df   : > { %v7248_v10 = vpop.f32.mrb[14].mxu0 }
 0x6e0   : > { %3456 = vrot.lane.b32.xlu1 %v7248_v10, %s8741_s10  ;;  %v3305_v11 = vpop.f32.mrb[15].mxu0 }
 0x6e1   : > { %3454 = vrot.lane.b32.xlu0 %v3305_v11, %s8741_s10  ;;  %7291 = vmatpush3.bf16.msra.mxu1 %v7831_v3  ;;  %v6775_v3 = vld [vmem:[%s10360_s8] ss:$0 sm:$0xff]  ;;  %s6306_s8 = scalar_lea.sflag [#allocation8], %s9275_s25 }
 0x6e2   : > { %7316 = vmatprep.subr.bf16.mxu1 %v8739_v0 }
 0x6eb   : > { %v7255_v50 = vpop.f32.mrb[26].mxu1 }
 0x6ec   : > { %v3386_v57 = vpop.f32.mrb[27].mxu1  ;;  %3467 = vrot.lane.b32.xlu1 %v7255_v50, %s8742_s12 }
 0x6ed   : > { %3465 = vrot.lane.b32.xlu0 %v3386_v57, %s8742_s12 }
 0x72d   : > { %v3402_v13 = vpop.permute.xlu1 %3401 }
 0x72e   : > { %3407 = vst.msk [vmem:[#allocation5 + $0x8] sm:$0xff] %vm3405_vm3, %v3402_v13  ;;  %v3400_v14 = vpop.permute.xlu0 %3399 }
 0x72f   : > { %3406 = vst.msk [vmem:[#allocation5] sm:$0xff] %vm3405_vm3, %v3400_v14 }
 0x732   : > { %v3413_v37 = vpop.permute.xlu1 %3412 }
 0x733   : > { %3418 = vst.msk [vmem:[#allocation5 + $0x8] sm:$0xff] %vm3416_vm4, %v3413_v37  ;;  %v3411_v19 = vpop.permute.xlu0 %3410 }
 0x734   : > { %3417 = vst.msk [vmem:[#allocation5] sm:$0xff] %vm3416_vm4, %v3411_v19 }
 0x73a   : > { %v3424_v24 = vpop.permute.xlu1 %3423 }
 0x73b   : > { %3429 = vst.msk [vmem:[#allocation5 + $0x8] sm:$0xff] %vm3427_vm5, %v3424_v24  ;;  %v3422_v52 = vpop.permute.xlu0 %3421 }
 0x73c   : > { %3428 = vst.msk [vmem:[#allocation5] sm:$0xff] %vm3427_vm5, %v3422_v52 }
 0x742   : > { %v3435_v42 = vpop.permute.xlu1 %3434 }
 0x743   : > { %3440 = vst.msk [vmem:[#allocation5 + $0x8] sm:$0xff] %vm3438_vm6, %v3435_v42  ;;  %v3433_v25 = vpop.permute.xlu0 %3432 }
 0x744   : > { %3439 = vst.msk [vmem:[#allocation5] sm:$0xff] %vm3438_vm6, %v3433_v25  ;;  %v6755_v25 = vld [vmem:[#allocation23] ss:$0 sm:$0xff] }
 0x74a   : > { %v3446_v26 = vpop.permute.xlu1 %3445 }
 0x74b   : > { %3451 = vst.msk [vmem:[#allocation5 + $0x8] sm:$0xff] %vm3449_vm7, %v3446_v26  ;;  %v3444_v15 = vpop.permute.xlu0 %3443 }
 0x74c   : > { %3450 = vst.msk [vmem:[#allocation5] sm:$0xff] %vm3449_vm7, %v3444_v15 }
 0x752   : > { %v3457_v7 = vpop.permute.xlu1 %3456 }
 0x753   : > { %3462 = vst.msk [vmem:[#allocation5 + $0x8] sm:$0xff] %vm3460_vm8, %v3457_v7  ;;  %v3455_v62 = vpop.permute.xlu0 %3454 }
 0x754   : > { %3461 = vst.msk [vmem:[#allocation5] sm:$0xff] %vm3460_vm8, %v3455_v62 }
 0x75e   : > { %v3468_v61 = vpop.permute.xlu1 %3467 }
 0x75f   : > { %3473 = vst.msk [vmem:[#allocation5 + $0x8] sm:$0xff] %vm3471_vm9, %v3468_v61  ;;  %v3466_v27 = vpop.permute.xlu0 %3465 }
 0x760   : > { %3472 = vst.msk [vmem:[#allocation5] sm:$0xff] %vm3471_vm9, %v3466_v27  ;;  %v6756_v27 = vld [vmem:[#allocation24] ss:$0 sm:$0xff] }
 0x766   : > { %v3475_v28 = vld [vmem:[#allocation5 + $0x8] sm:$0xff] }
 0x767   : > { %v3474_v33 = vld [vmem:[#allocation5] sm:$0xff] }
 0x768   : > { %v3476_v34 = vpack.c.bf16 %v3475_v28, %v3474_v33 }
 0x76a   : > { %7273 = vmatmul.mubr.bf16.vlgmr.msra.gmra.mrb[16].mxu0 %v3476_v34 }
 0x76b   : > { %7312 = vmatprep.mubr.msk.bf16.mxu0 %vm8740_vm0, %v8739_v0  ;;  %7297 = vmatpush3.bf16.msra.mxu0 %v7816_v44 }
 0x76c   : > { %7298 = vmatprep.subr.bf16.mxu0 %v8739_v0 }
 0x76f   : > { %7299 = vmatpush3.bf16.msra.mxu0 %v7817_v45 }
 0x770   : > { %7300 = vmatprep.subr.bf16.mxu0 %v8739_v0 }
 0x773   : > { %7301 = vmatpush3.bf16.msra.mxu0 %v7818_v48 }
 0x774   : > { %7302 = vmatprep.subr.bf16.mxu0 %v8739_v0 }
 0x777   : > { %7303 = vmatpush3.bf16.msra.mxu0 %v7819_v36 }
 0x778   : > { %7304 = vmatprep.subr.bf16.mxu0 %v8739_v0 }
 0x77b   : > { %7305 = vmatpush3.bf16.msra.mxu0 %v7820_v55 }
 0x77c   : > { %7306 = vmatprep.subr.bf16.mxu0 %v8739_v0 }
 0x77f   : > { %7307 = vmatpush3.bf16.msra.mxu0 %v7821_v58 }
 0x780   : > { %7308 = vmatprep.subr.bf16.mxu0 %v8739_v0 }
 0x783   : > { %7309 = vmatpush3.bf16.msra.mxu0 %v7823_v38  ;;  %v6757_v38 = vld [vmem:[#allocation27] ss:$0 sm:$0xff] }
 0x784   : > { %7310 = vmatprep.subr.bf16.mxu0 %v8739_v0 }
 0x787   : > { %7311 = vmatpush3.bf16.msra.mxu0 %v7825_v63 }
 0x78a   : > { %7313 = vmatmul.mubr.bf16.vlgmr.msra.gmra.mrb[20].mxu0 %v9793_v47 }
 0x83d   : > { %v3582_v8 = vpop.f32.mrb[16].mxu0 }
 0x83e   : > { %v3583_v6 = vadd.f32 %v6746_v35, %v3582_v8  ;;  %v7274_v16 = vpop.f32.mrb[17].mxu0 }
 0x83f   : > { %v3585_v17 = vpop.f32.mrb[18].mxu0  ;;  %v7834_v16 = vld [vmem:[%s10359_s9 + $0x10] sm:$0xff]  }
 0x840   : > { %v3586_v40 = vadd.f32 %v6746_v35, %v3585_v17  ;;  %v7275_v18 = vpop.f32.mrb[19].mxu0  ;;  %v3589_v23 = vadd.f32 %v8040_v21, %v3583_v6  ;;  %v7832_v35 = vld [vmem:[%s10359_s9] sm:$0xff]   ;;  %v7833_v6 = vld [vmem:[%s10359_s9 + $0x8] sm:$0xff]   ;;  %v7835_v17 = vld [vmem:[%s10359_s9 + $0x18] sm:$0xff]  }
 0x841   : > { %v7837_v18 = vld [vmem:[%s10359_s9 + $0x28] sm:$0xff]   ;;  %v7838_v21 = vld [vmem:[%s10359_s9 + $0x30] sm:$0xff]  }
 0x842   : > { %3593 = vadd.xlane.f32.xlu0 %v3589_v23  ;;  %v3590_v43 = vadd.f32 %v8041_v41, %v3586_v40  ;;  %v7836_v40 = vld [vmem:[%s10359_s9 + $0x20] sm:$0xff]   ;;  %v6766_v41 = vld [vmem:[#allocation30] ss:$0 sm:$0xff] }
 0x844   : > { %3595 = vadd.xlane.f32.xlu1 %v3590_v43 }
 0x8cf   : > { %v3594_v39 = vpop.xlane.xlu0 %3593 }
 0x8d0   : > { %v3598_v49 = vmul.f32 0.0078125, %v3594_v39 }
 0x8d1   : > { %v3596_v29 = vpop.xlane.xlu1 %3595 }
 0x8d2   : > { %v9779_v54 = vsub.f32 %v3589_v23, %v3598_v49  ;;  %v3599_v32 = vmul.f32 0.0078125, %v3596_v29  ;;  %v7839_v23 = vld [vmem:[%s10359_s9 + $0x38] sm:$0xff]  }
 0x8d4   : > { %v9781_v31 = vsub.f32 %v3590_v43, %v3599_v32  ;;  %v3602_v51 = vmul.f32 %v9779_v54, %v9779_v54  ;;  %v3635_v15 = vmul.f32 %v6755_v25, %v9779_v54  ;;  %v3866_v43 = vpop.f32.mrb[20].mxu0 }
 0x8d5   : > { %v3867_v44 = vadd.f32 %v6766_v41, %v3866_v43  ;;  %v7314_v45 = vpop.f32.mrb[21].mxu0 }
 0x8d6   : > { %3604 = vadd.xlane.f32.xlu0 %v3602_v51  ;;  %v3603_v30 = vmul.f32 %v9781_v31, %v9781_v31  ;;  %v3636_v7 = vmul.f32 %v6755_v25, %v9781_v31  ;;  %v3869_v48 = vpop.f32.mrb[22].mxu0 }
 0x8d7   : > { %3985 = vst.msk [vmem:[#allocation3] sm:$0xff] %vm1587_vm1, %v3867_v44  ;;  %3998 = vrot.lane.b32.xlu1 %v3867_v44, %s8742_s12  ;;  %v7315_v36 = vpop.f32.mrb[23].mxu0  ;;  %v9922_v48 = vld [vmem:[%s1243_s20] ss:$0 sm:$0xff] }
 0x8da   : > { %3606 = vadd.xlane.f32.xlu0 %v3603_v30 }
 0x8db   : > { %4015 = vrot.lane.b32.xlu1 %v3867_v44, %s8741_s10 }
 0x8de   : > { %v4119_v39 = vld [vmem:[#allocation3] sm:$0xff] }
 0x8df   : > { %7336 = vmatprep.subr.msk.mxu0 %vm1587_vm1, %v4119_v39 }
 0x8e0   : > { %7337 = vmatpush3.xpose.msk.msra.mxu0 %vm1587_vm1, %v4119_v39 }
 0x8f0   : > { %4031 = vrot.lane.b32.xlu0 %v3867_v44, %s8743_s23 }
 0x8f4   : > { %4047 = vrot.lane.b32.xlu0 %v3867_v44, %s8744_s17 }
 0x8f8   : > { %4063 = vrot.lane.b32.xlu0 %v3867_v44, %s8745_s4 }
 0x8fc   : > { %4079 = vrot.lane.b32.xlu0 %v3867_v44, %s8746_s5 }
 0x900   : > { %4095 = vrot.lane.b32.xlu0 %v3867_v44, %s8747_s21 }
 0x949   : > { %v3999_v29 = vpop.permute.xlu1 %3998 }
 0x94a   : > { %4001 = vst.msk [vmem:[#allocation3 + $0x10] sm:$0xff] %vm1587_vm1, %v3999_v29 }
 0x94d   : > { %v4016_v32 = vpop.permute.xlu1 %4015 }
 0x94e   : > { %4018 = vst.msk [vmem:[#allocation3 + $0x20] sm:$0xff] %vm1587_vm1, %v4016_v32 }
 0x951   : > { %v4120_v51 = vld [vmem:[#allocation3 + $0x10] sm:$0xff] }
 0x955   : > { %v4121_v55 = vld [vmem:[#allocation3 + $0x20] sm:$0xff] }
 0x956   : > { %7346 = vmatprep.subr.msk.mxu0 %vm1587_vm1, %v4121_v55 }
 0x963   : > { %v3605_v4 = vpop.xlane.xlu0 %3604 }
 0x964   : > { %v3609_v5 = vmul.f32 0.007874016, %v3605_v4 }
 0x966   : > { %7952 = vrsqrt.f32 %v3609_v5  ;;  %vm3613_vm10 = vcmp.eq.f32.partialorder %v3609_v5, inf  ;;  %v3616_v12 = vand.u32 2147483648, %v3609_v5  ;;  %vm3615_vm11 = vcmp.eq.f32.partialorder %v3609_v5, 0.0 }
 0x967   : > { %v3607_v10 = vpop.xlane.xlu0 %3606 }
 0x968   : > { %v3610_v56 = vmul.f32 0.007874016, %v3607_v10 }
 0x96a   : > { %7954 = vrsqrt.f32 %v3610_v56  ;;  %vm3620_vm12 = vcmp.eq.f32.partialorder %v3610_v56, inf  ;;  %v3623_v19 = vand.u32 2147483648, %v3610_v56  ;;  %vm3622_vm13 = vcmp.eq.f32.partialorder %v3610_v56, 0.0 }
 0x96b   : > { %v4032_v49 = vpop.permute.xlu0 %4031 }
 0x96c   : > { %4034 = vst.msk [vmem:[#allocation3 + $0x30] sm:$0xff] %vm1587_vm1, %v4032_v49 }
 0x96f   : > { %v4048_v54 = vpop.permute.xlu0 %4047 }
 0x970   : > { %v7953_v11 = vpop.eup %7952  ;;  %4050 = vst.msk [vmem:[#allocation3 + $0x40] sm:$0xff] %vm1587_vm1, %v4048_v54 }
 0x971   : > { %v3612_v53 = vmul.f32 %v7953_v11, %v3609_v5 }
 0x973   : > { %v3614_v50 = vsel %vm3613_vm10, %v3609_v5, %v3612_v53  ;;  %v4064_v31 = vpop.permute.xlu0 %4063  ;;  %v9848_v59 = vld [vmem:[#allocation3 + $0x30] sm:$0xff] }
 0x974   : > { %v7955_v57 = vpop.eup %7954  ;;  %v3617_v13 = vsel %vm3615_vm11, %v3616_v12, %v3614_v50  ;;  %4066 = vst.msk [vmem:[#allocation3 + $0x50] sm:$0xff] %vm1587_vm1, %v4064_v31 }
 0x975   : > { %v3625_v14 = vadd.f32 1e-06, %v3617_v13  ;;  %v3619_v37 = vmul.f32 %v7955_v57, %v3610_v56 }
 0x977   : > { %7956 = vrcp.f32 %v3625_v14  ;;  %v3621_v24 = vsel %vm3620_vm12, %v3610_v56, %v3619_v37  ;;  %v4080_v30 = vpop.permute.xlu0 %4079  ;;  %v4123_v2 = vld [vmem:[#allocation3 + $0x40] sm:$0xff] }
 0x978   : > { %v3624_v52 = vsel %vm3622_vm13, %v3623_v19, %v3621_v24  ;;  %4082 = vst.msk [vmem:[#allocation3 + $0x60] sm:$0xff] %vm1587_vm1, %v4080_v30 }
 0x979   : > { %v3626_v42 = vadd.f32 1e-06, %v3624_v52 }
 0x97b   : > { %7958 = vrcp.f32 %v3626_v42  ;;  %v4096_v58 = vpop.permute.xlu0 %4095 }
 0x97c   : > { %4098 = vst.msk [vmem:[#allocation3 + $0x70] sm:$0xff] %vm1587_vm1, %v4096_v58 }
 0x97f   : > { %v4125_v25 = vld [vmem:[#allocation3 + $0x60] sm:$0xff] }
 0x981   : > { %v7957_v26 = vpop.eup %7956 }
 0x982   : > { %v3637_v62 = vmul.f32 %v7957_v26, %v3635_v15 }
 0x983   : > { %v4126_v41 = vld [vmem:[#allocation3 + $0x70] sm:$0xff] }
 0x984   : > { %v9804_v33 = vadd.f32 %v6756_v27, %v3637_v62 }
 0x985   : > { %v7959_v61 = vpop.eup %7958 }
 0x986   : > { %v3638_v28 = vmul.f32 %v7959_v61, %v3636_v7 }
 0x988   : > { %v9806_v34 = vadd.f32 %v6756_v27, %v3638_v28 }
 0x98a   : > { %v3647_v8 = vpack.c.bf16 %v9806_v34, %v9804_v33 }
 0x98c   : > { %7293 = vmatmul.mubr.bf16.vlgmr.msra.gmra.mrb[28].mxu1 %v3647_v8 }
 0x98d   : > { %7317 = vmatpush3.bf16.msra.mxu1 %v7832_v35  ;;  %7332 = vmatprep.mubr.msk.bf16.mxu1 %vm8740_vm0, %v8739_v0 }
 0x98e   : > { %7318 = vmatprep.subr.bf16.mxu1 %v8739_v0 }
 0x991   : > { %7319 = vmatpush3.bf16.msra.mxu1 %v7833_v6 }
 0x992   : > { %7320 = vmatprep.subr.bf16.mxu1 %v8739_v0 }
 0x995   : > { %7321 = vmatpush3.bf16.msra.mxu1 %v7834_v16 }
 0x996   : > { %7322 = vmatprep.subr.bf16.mxu1 %v8739_v0 }
 0x999   : > { %7323 = vmatpush3.bf16.msra.mxu1 %v7835_v17 }
 0x99a   : > { %7324 = vmatprep.subr.bf16.mxu1 %v8739_v0 }
 0x99d   : > { %7325 = vmatpush3.bf16.msra.mxu1 %v7836_v40  ;;  %v4124_v40 = vld [vmem:[#allocation3 + $0x50] sm:$0xff] }
 0x99e   : > { %7326 = vmatprep.subr.bf16.mxu1 %v8739_v0 }
 0x9a1   : > { %7327 = vmatpush3.bf16.msra.mxu1 %v7837_v18 }
 0x9a2   : > { %7328 = vmatprep.subr.bf16.mxu1 %v8739_v0 }
 0x9a5   : > { %7329 = vmatpush3.bf16.msra.mxu1 %v7838_v21 }
 0x9a6   : > { %7330 = vmatprep.subr.bf16.mxu1 %v8739_v0 }
 0x9a9   : > { %7331 = vmatpush3.bf16.msra.mxu1 %v7839_v23 }
 0x9aa   : > { %7341 = vmatprep.subr.msk.mxu1 %vm1587_vm1, %v4120_v51 }
 0x9ac   : > { %7333 = vmatmul.mubr.bf16.vlgmr.msra.gmra.mrb[32].mxu1 %v9793_v47 }
 0x9b2   : > { %7342 = vmatpush3.xpose.msk.msra.mxu1 %vm1587_vm1, %v4120_v51 }
 0x9b3   : > { %7351 = vmatprep.subr.msk.mxu1 %vm1587_vm1, %v9848_v59 }
 0xa5f   : > { %v3754_v60 = vpop.f32.mrb[28].mxu1 }
 0xa60   : > { %v3755_v63 = vadd.f32 %v6757_v38, %v3754_v60  ;;  %v7294_v46 = vpop.f32.mrb[29].mxu1 }
 0xa61   : > { %v3757_v47 = vpop.f32.mrb[30].mxu1 }
 0xa62   : > { %3983 = vst.msk [vmem:[#allocation2] sm:$0xff] %vm1587_vm1, %v3755_v63  ;;  %v3758_v22 = vadd.f32 %v6757_v38, %v3757_v47  ;;  %v7295_v20 = vpop.f32.mrb[31].mxu1  ;;  %3989 = vrot.lane.b32.xlu0 %v3755_v63, %s8742_s12  ;;  %4007 = vrot.lane.b32.xlu1 %v3755_v63, %s8741_s10 }
 0xa64   : > { %3984 = vst.msk [vmem:[#allocation2 + $0x8] sm:$0xff] %vm1587_vm1, %v3758_v22 }
 0xa66   : > { %4009 = vrot.lane.b32.xlu0 %v3758_v22, %s8741_s10  ;;  %4023 = vrot.lane.b32.xlu1 %v3755_v63, %s8743_s23 }
 0xa69   : > { %v4103_v9 = vld [vmem:[#allocation2] sm:$0xff] }
 0xa6a   : > { %7338 = vmatprep.mubr.msk.f32.mxu0 %vm1587_vm1, %v4103_v9  ;;  %4041 = vrot.lane.b32.xlu0 %v3758_v22, %s8744_s17 }
 0xa6b   : > { %4039 = vrot.lane.b32.xlu1 %v3755_v63, %s8744_s17  ;;  %v4104_v1 = vld [vmem:[#allocation2 + $0x8] sm:$0xff] }
 0xa6c   : > { %7339 = vmatmul.mubr.msk.f32.vlgmr.msra.gmra.mrb[24].mxu0 %vm1587_vm1, %v4104_v1 }
 0xa6d   : > { %7347 = vmatpush3.xpose.msk.msra.mxu0 %vm1587_vm1, %v4121_v55 }
 0xa6e   : > { %4073 = vrot.lane.b32.xlu0 %v3758_v22, %s8746_s5  ;;  %7356 = vmatprep.subr.msk.mxu0 %vm1587_vm1, %v4123_v2 }
 0xa6f   : > { %4055 = vrot.lane.b32.xlu1 %v3755_v63, %s8745_s4 }
 0xa72   : > { %4089 = vrot.lane.b32.xlu0 %v3758_v22, %s8747_s21 }
 0xa73   : > { %4071 = vrot.lane.b32.xlu1 %v3755_v63, %s8746_s5 }
 0xa77   : > { %3991 = vrot.lane.b32.xlu1 %v3758_v22, %s8742_s12 }
 0xa7b   : > { %4025 = vrot.lane.b32.xlu1 %v3758_v22, %s8743_s23 }
 0xa7f   : > { %4057 = vrot.lane.b32.xlu1 %v3758_v22, %s8745_s4  ;;  %v3977_v4 = vpop.f32.mrb[32].mxu1 }
 0xa80   : > { %v9872_v5 = vadd.f32 %v6775_v3, %v3977_v4  ;;  %v7334_v10 = vpop.f32.mrb[33].mxu1 }
 0xa81   : > { %v3980_v56 = vpop.f32.mrb[34].mxu1 }
 0xa82   : > { %3986 = vst.msk [vmem:[#allocation4] sm:$0xff] %vm1587_vm1, %v9872_v5  ;;  %4003 = vrot.lane.b32.xlu0 %v9872_v5, %s8742_s12  ;;  %v7335_v11 = vpop.f32.mrb[35].mxu1 }
 0xa83   : > { %4087 = vrot.lane.b32.xlu1 %v3755_v63, %s8747_s21 }
 0xa87   : > { %4019 = vrot.lane.b32.xlu1 %v9872_v5, %s8741_s10 }
 0xa89   : > { %v4127_v61 = vld [vmem:[#allocation4] sm:$0xff] }
 0xa8b   : > { %4035 = vrot.lane.b32.xlu1 %v9872_v5, %s8743_s23 }
 0xad4   : > { %v3990_v53 = vpop.permute.xlu0 %3989  ;;  %v4008_v12 = vpop.permute.xlu1 %4007 }
 0xad5   : > { %3995 = vst.msk [vmem:[#allocation2 + $0x10] sm:$0xff] %vm1587_vm1, %v3990_v53  ;;  %4013 = vst.msk [vmem:[#allocation2 + $0x20] sm:$0xff] %vm1587_vm1, %v4008_v12 }
 0xad8   : > { %v4010_v50 = vpop.permute.xlu0 %4009  ;;  %v4024_v57 = vpop.permute.xlu1 %4023 }
 0xad9   : > { %4014 = vst.msk [vmem:[#allocation2 + $0x28] sm:$0xff] %vm1587_vm1, %v4010_v50  ;;  %4029 = vst.msk [vmem:[#allocation2 + $0x30] sm:$0xff] %vm1587_vm1, %v4024_v57 }
 0xadc   : > { %v4042_v13 = vpop.permute.xlu0 %4041  ;;  %v4105_v14 = vld [vmem:[#allocation2 + $0x10] sm:$0xff]  ;;  %v4107_v37 = vld [vmem:[#allocation2 + $0x20] sm:$0xff] }
 0xadd   : > { %4046 = vst.msk [vmem:[#allocation2 + $0x48] sm:$0xff] %vm1587_vm1, %v4042_v13  ;;  %v4040_v19 = vpop.permute.xlu1 %4039  ;;  %7343 = vmatprep.mubr.msk.f32.mxu1 %vm1587_vm1, %v4105_v14  ;;  %7348 = vmatprep.mubr.msk.f32.mxu0 %vm1587_vm1, %v4107_v37 }
 0xade   : > { %4045 = vst.msk [vmem:[#allocation2 + $0x40] sm:$0xff] %vm1587_vm1, %v4040_v19 }
 0xae0   : > { %v4074_v24 = vpop.permute.xlu0 %4073  ;;  %v4108_v52 = vld [vmem:[#allocation2 + $0x28] sm:$0xff]  ;;  %v4109_v17 = vld [vmem:[#allocation2 + $0x30] sm:$0xff] }
 0xae1   : > { %4078 = vst.msk [vmem:[#allocation2 + $0x68] sm:$0xff] %vm1587_vm1, %v4074_v24  ;;  %v4056_v42 = vpop.permute.xlu1 %4055  ;;  %7349 = vmatmul.mubr.msk.f32.vlgmr.msra.gmra.mrb[26].mxu0 %vm1587_vm1, %v4108_v52 }
 0xae2   : > { %4061 = vst.msk [vmem:[#allocation2 + $0x50] sm:$0xff] %vm1587_vm1, %v4056_v42  ;;  %7357 = vmatpush3.xpose.msk.msra.mxu0 %vm1587_vm1, %v4123_v2 }
 0xae3   : > { %7366 = vmatprep.subr.msk.mxu0 %vm1587_vm1, %v4125_v25 }
 0xae4   : > { %v4090_v26 = vpop.permute.xlu0 %4089  ;;  %v4112_v15 = vld [vmem:[#allocation2 + $0x48] sm:$0xff] }
 0xae5   : > { %4094 = vst.msk [vmem:[#allocation2 + $0x78] sm:$0xff] %vm1587_vm1, %v4090_v26  ;;  %v4072_v7 = vpop.permute.xlu1 %4071  ;;  %v4111_v62 = vld [vmem:[#allocation2 + $0x40] sm:$0xff] }
 0xae6   : > { %4077 = vst.msk [vmem:[#allocation2 + $0x60] sm:$0xff] %vm1587_vm1, %v4072_v7  ;;  %7358 = vmatprep.mubr.msk.f32.mxu0 %vm1587_vm1, %v4111_v62 }
 0xae7   : > { %7359 = vmatmul.mubr.msk.f32.vlgmr.msra.gmra.mrb[28].mxu0 %vm1587_vm1, %v4112_v15 }
 0xae8   : > { %7367 = vmatpush3.xpose.msk.msra.mxu0 %vm1587_vm1, %v4125_v25  ;;  %v4116_v8 = vld [vmem:[#allocation2 + $0x68] sm:$0xff] }
 0xae9   : > { %v3992_v27 = vpop.permute.xlu1 %3991  ;;  %7376 = vmatprep.subr.mxu0 %v4127_v61  ;;  %v4113_v23 = vld [vmem:[#allocation2 + $0x50] sm:$0xff] }
 0xaea   : > { %3996 = vst.msk [vmem:[#allocation2 + $0x18] sm:$0xff] %vm1587_vm1, %v3992_v27 }
 0xaec   : > { %v4118_v45 = vld [vmem:[#allocation2 + $0x78] sm:$0xff] }
 0xaed   : > { %v4026_v28 = vpop.permute.xlu1 %4025  ;;  %v4115_v35 = vld [vmem:[#allocation2 + $0x60] sm:$0xff] }
 0xaee   : > { %4030 = vst.msk [vmem:[#allocation2 + $0x38] sm:$0xff] %vm1587_vm1, %v4026_v28  ;;  %7368 = vmatprep.mubr.msk.f32.mxu0 %vm1587_vm1, %v4115_v35 }
 0xaef   : > { %7369 = vmatmul.mubr.msk.f32.vlgmr.msra.gmra.mrb[30].mxu0 %vm1587_vm1, %v4116_v8 }
 0xaf0   : > { %7377 = vmatpush3.msra.mxu0 %v4127_v61 }
 0xaf1   : > { %v4058_v6 = vpop.permute.xlu1 %4057  ;;  %v4106_v16 = vld [vmem:[#allocation2 + $0x18] sm:$0xff] }
 0xaf2   : > { %4062 = vst.msk [vmem:[#allocation2 + $0x58] sm:$0xff] %vm1587_vm1, %v4058_v6  ;;  %7344 = vmatmul.mubr.msk.f32.vlgmr.msra.gmra.mrb[36].mxu1 %vm1587_vm1, %v4106_v16 }
 0xaf3   : > { %7352 = vmatpush3.xpose.msk.msra.mxu1 %vm1587_vm1, %v9848_v59  ;;  %7353 = vmatprep.mubr.msk.f32.mxu1 %vm1587_vm1, %v4109_v17 }
 0xaf4   : > { %7361 = vmatprep.subr.msk.mxu1 %vm1587_vm1, %v4124_v40  ;;  %v4004_v55 = vpop.permute.xlu0 %4003 }
 0xaf5   : > { %v4088_v18 = vpop.permute.xlu1 %4087  ;;  %v4110_v21 = vld [vmem:[#allocation2 + $0x38] sm:$0xff]  ;;  %4006 = vst.msk [vmem:[#allocation4 + $0x10] sm:$0xff] %vm1587_vm1, %v4004_v55 }
 0xaf6   : > { %4093 = vst.msk [vmem:[#allocation2 + $0x70] sm:$0xff] %vm1587_vm1, %v4088_v18  ;;  %7354 = vmatmul.mubr.msk.f32.vlgmr.msra.gmra.mrb[38].mxu1 %vm1587_vm1, %v4110_v21 }
 0xaf7   : > { %7362 = vmatpush3.xpose.msk.msra.mxu1 %vm1587_vm1, %v4124_v40  ;;  %7363 = vmatprep.mubr.msk.f32.mxu1 %vm1587_vm1, %v4113_v23 }
 0xaf8   : > { %7371 = vmatprep.subr.msk.mxu1 %vm1587_vm1, %v4126_v41 }
 0xaf9   : > { %v4114_v43 = vld [vmem:[#allocation2 + $0x58] sm:$0xff]  ;;  %v4020_v30 = vpop.permute.xlu1 %4019 }
 0xafa   : > { %7364 = vmatmul.mubr.msk.f32.vlgmr.msra.gmra.mrb[40].mxu1 %vm1587_vm1, %v4114_v43  ;;  %4022 = vst.msk [vmem:[#allocation4 + $0x20] sm:$0xff] %vm1587_vm1, %v4020_v30 }
 0xafb   : > { %7372 = vmatpush3.xpose.msk.msra.mxu1 %vm1587_vm1, %v4126_v41 }
 0xafc   : > { %v4128_v59 = vld [vmem:[#allocation4 + $0x10] sm:$0xff] }
 0xafd   : > { %v4117_v44 = vld [vmem:[#allocation2 + $0x70] sm:$0xff]  ;;  %v4036_v58 = vpop.permute.xlu1 %4035  ;;  %7381 = vmatprep.subr.mxu1 %v4128_v59 }
 0xafe   : > { %7373 = vmatprep.mubr.msk.f32.mxu1 %vm1587_vm1, %v4117_v44  ;;  %4038 = vst.msk [vmem:[#allocation4 + $0x30] sm:$0xff] %vm1587_vm1, %v4036_v58 }
 0xaff   : > { %7374 = vmatmul.mubr.msk.f32.vlgmr.msra.gmra.mrb[42].mxu1 %vm1587_vm1, %v4118_v45 }
 0xb00   : > { %7382 = vmatpush3.msra.mxu1 %v4128_v59 }
 0xb01   : > { %v9937_v38 = vld [vmem:[#allocation4 + $0x20] sm:$0xff] }
 0xb02   : > { %7386 = vmatprep.subr.mxu0 %v9937_v38 }
 0xb05   : > { %v9939_v60 = vld [vmem:[#allocation4 + $0x30] sm:$0xff] }
 0xb06   : > { %7391 = vmatprep.subr.mxu1 %v9939_v60 }
 0xb3f   : > { %v7340_v36 = vpop.f32.mrb[24].mxu0 }
 0xb40   : > { %v4808_v39 = vmul.f32 0.25, %v7340_v36  ;;  %v4210_v49 = vpop.f32.mrb[25].mxu0 }
 0xb41   : > { %v4807_v29 = vmul.f32 0.25, %v4210_v49 }
 0xb42   : > { %v9925_v54 = vadd.f32 %v9922_v48, %v4808_v39 }
 0xb43   : > { %v9928_v32 = vadd.f32 %v9922_v48, %v4807_v29 }
 0xb44   : > { %v4849_v31 = vsel %vm4845_vm14, %v9925_v54, -inf }
 0xb45   : > { %4850 = vmax.xlane.f32.xlu0 %v4849_v31  ;;  %v4846_v51 = vsel %vm4845_vm14, %v9928_v32, -inf }
 0xb46   : > { %4847 = vmax.xlane.f32.xlu1 %v4846_v51 }
 0xbb4   : > { %v7350_v63 = vpop.f32.mrb[26].mxu0 }
 0xbb5   : > { %v4378_v46 = vpop.f32.mrb[27].mxu0  ;;  %v4812_v2 = vmul.f32 0.25, %v7350_v63 }
 0xbb6   : > { %v4811_v10 = vmul.f32 0.25, %v4378_v46 }
 0xbb7   : > { %v9950_v50 = vadd.f32 %v9922_v48, %v4812_v2 }
 0xbb8   : > { %v9955_v37 = vadd.f32 %v9922_v48, %v4811_v10 }
 0xbb9   : > { %v4861_v15 = vsel %vm4845_vm14, %v9950_v50, -inf }
 0xbba   : > { %v7360_v47 = vpop.f32.mrb[28].mxu0  ;;  %v4858_v61 = vsel %vm4845_vm14, %v9955_v37, -inf }
 0xbbb   : > { %v4546_v22 = vpop.f32.mrb[29].mxu0  ;;  %v4816_v42 = vmul.f32 0.25, %v7360_v47 }
 0xbbc   : > { %v4815_v7 = vmul.f32 0.25, %v4546_v22 }
 0xbbd   : > { %v9970_v27 = vadd.f32 %v9922_v48, %v4816_v42 }
 0xbbe   : > { %v9975_v6 = vadd.f32 %v9922_v48, %v4815_v7 }
 0xbbf   : > { %v4873_v23 = vsel %vm4845_vm14, %v9970_v27, -inf }
 0xbc0   : > { %v4870_v44 = vsel %vm4845_vm14, %v9975_v6, -inf }
 0xbc2   : > { %v7370_v20 = vpop.f32.mrb[30].mxu0 }
 0xbc3   : > { %v4714_v9 = vpop.f32.mrb[31].mxu0  ;;  %v4820_v18 = vmul.f32 0.25, %v7370_v20 }
 0xbc4   : > { %v4819_v41 = vmul.f32 0.25, %v4714_v9 }
 0xbc5   : > { %v7345_v1 = vpop.f32.mrb[36].mxu1  ;;  %v9990_v45 = vadd.f32 %v9922_v48, %v4820_v18 }
 0xbc6   : > { %v4810_v3 = vmul.f32 0.25, %v7345_v1  ;;  %v4294_v4 = vpop.f32.mrb[37].mxu1  ;;  %v9995_v49 = vadd.f32 %v9922_v48, %v4819_v41 }
 0xbc7   : > { %v4809_v56 = vmul.f32 0.25, %v4294_v4  ;;  %v4885_v30 = vsel %vm4845_vm14, %v9990_v45, -inf }
 0xbc8   : > { %v9944_v11 = vadd.f32 %v9922_v48, %v4810_v3  ;;  %v4882_v58 = vsel %vm4845_vm14, %v9995_v49, -inf }
 0xbc9   : > { %v9947_v53 = vadd.f32 %v9922_v48, %v4809_v56  ;;  %v7355_v12 = vpop.f32.mrb[38].mxu1 }
 0xbca   : > { %v4814_v57 = vmul.f32 0.25, %v7355_v12  ;;  %v4462_v13 = vpop.f32.mrb[39].mxu1  ;;  %v4855_v14 = vsel %vm4845_vm14, %v9944_v11, -inf }
 0xbcb   : > { %v4813_v19 = vmul.f32 0.25, %v4462_v13  ;;  %4856 = vmax.xlane.f32.xlu1 %v4855_v14  ;;  %v4852_v24 = vsel %vm4845_vm14, %v9947_v53, -inf }
 0xbcc   : > { %4853 = vmax.xlane.f32.xlu0 %v4852_v24  ;;  %v9960_v25 = vadd.f32 %v9922_v48, %v4814_v57 }
 0xbcd   : > { %v7365_v52 = vpop.f32.mrb[40].mxu1  ;;  %v9965_v62 = vadd.f32 %v9922_v48, %v4813_v19 }
 0xbce   : > { %v4630_v26 = vpop.f32.mrb[41].mxu1  ;;  %v4818_v28 = vmul.f32 0.25, %v7365_v52  ;;  %v4867_v8 = vsel %vm4845_vm14, %v9960_v25, -inf }
 0xbcf   : > { %4862 = vmax.xlane.f32.xlu1 %v4861_v15  ;;  %v4817_v16 = vmul.f32 0.25, %v4630_v26  ;;  %v4864_v40 = vsel %vm4845_vm14, %v9965_v62, -inf }
 0xbd0   : > { %4859 = vmax.xlane.f32.xlu0 %v4858_v61  ;;  %v9980_v21 = vadd.f32 %v9922_v48, %v4818_v28 }
 0xbd1   : > { %v9985_v43 = vadd.f32 %v9922_v48, %v4817_v16 }
 0xbd2   : > { %v7375_v35 = vpop.f32.mrb[42].mxu1  ;;  %v4879_v39 = vsel %vm4845_vm14, %v9980_v21, -inf }
 0xbd3   : > { %v4798_v17 = vpop.f32.mrb[43].mxu1  ;;  %4868 = vmax.xlane.f32.xlu1 %v4867_v8  ;;  %v4822_v36 = vmul.f32 0.25, %v7375_v35  ;;  %v4876_v31 = vsel %vm4845_vm14, %v9985_v43, -inf  ;;  %v4848_v46 = vpop.xlane.xlu1 %4847 }
 0xbd4   : > { %4865 = vmax.xlane.f32.xlu0 %v4864_v40  ;;  %v4821_v29 = vmul.f32 0.25, %v4798_v17  ;;  %v4894_v22 = vsub.f32 %v9928_v32, %v4848_v46 }
 0xbd5   : > { %v10000_v51 = vadd.f32 %v9922_v48, %v4822_v36 }
 0xbd6   : > { %v10005_v55 = vadd.f32 %v9922_v48, %v4821_v29  ;;  %v4851_v48 = vpop.xlane.xlu0 %4850  ;;  %v4910_v9 = vmul.f32 1.442695, %v4894_v22 }
 0xbd7   : > { %4874 = vmax.xlane.f32.xlu1 %v4873_v23  ;;  %v4891_v59 = vsel %vm4845_vm14, %v10000_v51, -inf  ;;  %v4895_v47 = vsub.f32 %v9925_v54, %v4851_v48 }
 0xbd8   : > { %4871 = vmax.xlane.f32.xlu0 %v4870_v44  ;;  %v4888_v63 = vsel %vm4845_vm14, %v10005_v55, -inf }
 0xbd9   : > { %v4912_v20 = vmul.f32 1.442695, %v4895_v47 }
 0xbdb   : > { %4880 = vmax.xlane.f32.xlu1 %v4879_v39  ;;  %7960 = vpow2.f32 %v4912_v20 }
 0xbdc   : > { %4877 = vmax.xlane.f32.xlu0 %v4876_v31  ;;  %7962 = vpow2.f32 %v4910_v9 }
 0xbdf   : > { %4886 = vmax.xlane.f32.xlu1 %v4885_v30 }
 0xbe0   : > { %4883 = vmax.xlane.f32.xlu0 %v4882_v58 }
 0xbe3   : > { %4892 = vmax.xlane.f32.xlu1 %v4891_v59 }
 0xbe4   : > { %4889 = vmax.xlane.f32.xlu0 %v4888_v63 }
 0xbe5   : > { %v10019_v1 = vpop.eup %7960 }
 0xbe6   : > { %v10021_v2 = vpop.eup %7962  ;;  %v4945_v3 = vsel %vm4845_vm14, %v10019_v1, 0.0 }
 0xbe7   : > { %v4942_v4 = vsel %vm4845_vm14, %v10021_v2, 0.0 }
 0xbf4   : > { %4067 = vrot.lane.b32.xlu1 %v9872_v5, %s8745_s4 }
 0xbfa   : > { %4051 = vrot.lane.b32.xlu0 %v9872_v5, %s8744_s17 }
 0xc18   : > { %4946 = vadd.xlane.f32.xlu1 %v4945_v3 }
 0xc19   : > { %4943 = vadd.xlane.f32.xlu0 %v4942_v4 }
 0xc58   : > { %v4857_v10 = vpop.xlane.xlu1 %4856 }
 0xc59   : > { %v4897_v54 = vsub.f32 %v9944_v11, %v4857_v10  ;;  %v4854_v32 = vpop.xlane.xlu0 %4853 }
 0xc5a   : > { %v4896_v56 = vsub.f32 %v9947_v53, %v4854_v32 }
 0xc5b   : > { %v4916_v12 = vmul.f32 1.442695, %v4897_v54 }
 0xc5c   : > { %v4914_v57 = vmul.f32 1.442695, %v4896_v56  ;;  %v4863_v13 = vpop.xlane.xlu1 %4862 }
 0xc5d   : > { %7964 = vpow2.f32 %v4916_v12  ;;  %v4899_v14 = vsub.f32 %v9950_v50, %v4863_v13  ;;  %v4860_v19 = vpop.xlane.xlu0 %4859 }
 0xc5e   : > { %7966 = vpow2.f32 %v4914_v57  ;;  %v4898_v24 = vsub.f32 %v9955_v37, %v4860_v19 }
 0xc5f   : > { %v4920_v52 = vmul.f32 1.442695, %v4899_v14 }
 0xc60   : > { %v4918_v42 = vmul.f32 1.442695, %v4898_v24  ;;  %v4869_v26 = vpop.xlane.xlu1 %4868 }
 0xc61   : > { %7968 = vpow2.f32 %v4920_v52  ;;  %v4901_v15 = vsub.f32 %v9960_v25, %v4869_v26  ;;  %v4866_v11 = vpop.xlane.xlu0 %4865 }
 0xc62   : > { %7970 = vpow2.f32 %v4918_v42  ;;  %v4900_v53 = vsub.f32 %v9965_v62, %v4866_v11 }
 0xc63   : > { %v4924_v7 = vmul.f32 1.442695, %v4901_v15 }
 0xc64   : > { %v4922_v61 = vmul.f32 1.442695, %v4900_v53  ;;  %v4875_v28 = vpop.xlane.xlu1 %4874 }
 0xc65   : > { %7972 = vpow2.f32 %v4924_v7  ;;  %v4903_v50 = vsub.f32 %v9970_v27, %v4875_v28  ;;  %v4872_v35 = vpop.xlane.xlu0 %4871 }
 0xc66   : > { %7974 = vpow2.f32 %v4922_v61  ;;  %v4902_v37 = vsub.f32 %v9975_v6, %v4872_v35 }
 0xc67   : > { %v10035_v8 = vpop.eup %7964  ;;  %v4928_v16 = vmul.f32 1.442695, %v4903_v50 }
 0xc68   : > { %v10037_v17 = vpop.eup %7966  ;;  %v4926_v25 = vmul.f32 1.442695, %v4902_v37  ;;  %v4881_v40 = vpop.xlane.xlu1 %4880  ;;  %v4951_v62 = vsel %vm4845_vm14, %v10035_v8, 0.0 }
 0xc69   : > { %7976 = vpow2.f32 %v4928_v16  ;;  %v4905_v18 = vsub.f32 %v9980_v21, %v4881_v40  ;;  %v4878_v23 = vpop.xlane.xlu0 %4877  ;;  %4952 = vadd.xlane.f32.xlu1 %v4951_v62  ;;  %v4948_v27 = vsel %vm4845_vm14, %v10037_v17, 0.0 }
 0xc6a   : > { %7978 = vpow2.f32 %v4926_v25  ;;  %v4904_v6 = vsub.f32 %v9985_v43, %v4878_v23  ;;  %4949 = vadd.xlane.f32.xlu0 %v4948_v27 }
 0xc6b   : > { %v10045_v41 = vpop.eup %7968  ;;  %v4932_v44 = vmul.f32 1.442695, %v4905_v18 }
 0xc6c   : > { %v10047_v36 = vpop.eup %7970  ;;  %v4930_v39 = vmul.f32 1.442695, %v4904_v6  ;;  %v4887_v29 = vpop.xlane.xlu1 %4886  ;;  %v4957_v31 = vsel %vm4845_vm14, %v10045_v41, 0.0 }
 0xc6d   : > { %7980 = vpow2.f32 %v4932_v44  ;;  %v4907_v21 = vsub.f32 %v9990_v45, %v4887_v29  ;;  %4958 = vadd.xlane.f32.xlu1 %v4957_v31  ;;  %v4884_v30 = vpop.xlane.xlu0 %4883  ;;  %v4954_v58 = vsel %vm4845_vm14, %v10047_v36, 0.0 }
 0xc6e   : > { %7982 = vpow2.f32 %v4930_v39  ;;  %v4906_v43 = vsub.f32 %v9995_v49, %v4884_v30  ;;  %4955 = vadd.xlane.f32.xlu0 %v4954_v58 }
 0xc6f   : > { %v10055_v59 = vpop.eup %7972  ;;  %v4936_v63 = vmul.f32 1.442695, %v4907_v21 }
 0xc70   : > { %v10057_v48 = vpop.eup %7974  ;;  %v4934_v46 = vmul.f32 1.442695, %v4906_v43  ;;  %v4893_v47 = vpop.xlane.xlu1 %4892  ;;  %v4963_v22 = vsel %vm4845_vm14, %v10055_v59, 0.0 }
 0xc71   : > { %7984 = vpow2.f32 %v4936_v63  ;;  %v4909_v45 = vsub.f32 %v10000_v51, %v4893_v47  ;;  %4964 = vadd.xlane.f32.xlu1 %v4963_v22  ;;  %v4890_v20 = vpop.xlane.xlu0 %4889  ;;  %v4960_v9 = vsel %vm4845_vm14, %v10057_v48, 0.0 }
 0xc72   : > { %7986 = vpow2.f32 %v4934_v46  ;;  %v4908_v49 = vsub.f32 %v10005_v55, %v4890_v20  ;;  %4961 = vadd.xlane.f32.xlu0 %v4960_v9 }
 0xc73   : > { %v10065_v3 = vpop.eup %7976  ;;  %v4940_v4 = vmul.f32 1.442695, %v4909_v45 }
 0xc74   : > { %v10067_v10 = vpop.eup %7978  ;;  %v4938_v54 = vmul.f32 1.442695, %v4908_v49  ;;  %v4068_v32 = vpop.permute.xlu1 %4067  ;;  %v4969_v56 = vsel %vm4845_vm14, %v10065_v3, 0.0 }
 0xc75   : > { %7988 = vpow2.f32 %v4940_v4  ;;  %4070 = vst.msk [vmem:[#allocation4 + $0x50] sm:$0xff] %vm1587_vm1, %v4068_v32  ;;  %4970 = vadd.xlane.f32.xlu1 %v4969_v56  ;;  %v4052_v51 = vpop.permute.xlu0 %4051  ;;  %v4966_v12 = vsel %vm4845_vm14, %v10067_v10, 0.0 }
 0xc76   : > { %7990 = vpow2.f32 %v4938_v54  ;;  %4054 = vst.msk [vmem:[#allocation4 + $0x40] sm:$0xff] %vm1587_vm1, %v4052_v51  ;;  %4967 = vadd.xlane.f32.xlu0 %v4966_v12 }
 0xc77   : > { %v10075_v55 = vpop.eup %7980 }
 0xc78   : > { %v10077_v57 = vpop.eup %7982  ;;  %v4975_v13 = vsel %vm4845_vm14, %v10075_v55, 0.0 }
 0xc79   : > { %4976 = vadd.xlane.f32.xlu1 %v4975_v13  ;;  %v4972_v14 = vsel %vm4845_vm14, %v10077_v57, 0.0 }
 0xc7a   : > { %4973 = vadd.xlane.f32.xlu0 %v4972_v14 }
 0xc7b   : > { %v10083_v19 = vpop.eup %7984 }
 0xc7c   : > { %v10085_v24 = vpop.eup %7986  ;;  %v4981_v52 = vsel %vm4845_vm14, %v10083_v19, 0.0  ;;  %v4132_v21 = vld [vmem:[#allocation4 + $0x50] sm:$0xff] }
 0xc7d   : > { %4982 = vadd.xlane.f32.xlu1 %v4981_v52  ;;  %v4978_v42 = vsel %vm4845_vm14, %v10085_v24, 0.0  ;;  %v4131_v16 = vld [vmem:[#allocation4 + $0x40] sm:$0xff] }
 0xc7e   : > { %4979 = vadd.xlane.f32.xlu0 %v4978_v42  ;;  %v7840_v42 = vld [vmem:[#allocation32] sm:$0xff]  }
 0xc7f   : > { %v10091_v26 = vpop.eup %7988 }
 0xc80   : > { %v10093_v15 = vpop.eup %7990  ;;  %v4987_v11 = vsel %vm4845_vm14, %v10091_v26, 0.0 }
 0xc81   : > { %4988 = vadd.xlane.f32.xlu1 %v4987_v11  ;;  %v4984_v53 = vsel %vm4845_vm14, %v10093_v15, 0.0 }
 0xc82   : > { %4985 = vadd.xlane.f32.xlu0 %v4984_v53 }
 0xc92   : > { %4099 = vrot.lane.b32.xlu1 %v9872_v5, %s8747_s21 }
 0xc98   : > { %4083 = vrot.lane.b32.xlu0 %v9872_v5, %s8746_s5 }
 0xca5   : > { %v4947_v7 = vpop.xlane.xlu1 %4946 }
 0xca6   : > { %7992 = vrcp.f32 %v4947_v7  ;;  %v4944_v61 = vpop.xlane.xlu0 %4943  ;;  %v7842_v7 = vld [vmem:[#allocation32 + $0x10] sm:$0xff]  }
 0xca7   : > { %7994 = vrcp.f32 %v4944_v61 }
 0xcb0   : > { %v7993_v28 = vpop.eup %7992 }
 0xcb1   : > { %v7995_v50 = vpop.eup %7994  ;;  %v5007_v37 = vmul.f32 %v7993_v28, %v10019_v1  ;;  %v7843_v28 = vld [vmem:[#allocation32 + $0x18] sm:$0xff]  }
 0xcb2   : > { %v5006_v35 = vmul.f32 %v7995_v50, %v10021_v2 }
 0xcb4   : > { %7378 = vmatprep.mubr.msk.f32.mxu0 %vm4845_vm14, %v5006_v35 }
 0xcb5   : > { %7379 = vmatmul.mubr.msk.f32.vlgmr.msra.gmra.mrb[32].mxu0 %vm4845_vm14, %v5007_v37 }
 0xcb6   : > { %7387 = vmatpush3.msra.mxu0 %v9937_v38 }
 0xcb7   : > { %7396 = vmatprep.subr.mxu0 %v4131_v16 }
 0xcf6   : > { %v4953_v25 = vpop.xlane.xlu1 %4952 }
 0xcf7   : > { %7996 = vrcp.f32 %v4953_v25  ;;  %v4950_v5 = vpop.xlane.xlu0 %4949 }
 0xcf8   : > { %7998 = vrcp.f32 %v4950_v5 }
 0xcfa   : > { %v4959_v40 = vpop.xlane.xlu1 %4958 }
 0xcfb   : > { %8000 = vrcp.f32 %v4959_v40  ;;  %v4956_v62 = vpop.xlane.xlu0 %4955  ;;  %v7845_v40 = vld [vmem:[#allocation32 + $0x28] sm:$0xff]  }
 0xcfc   : > { %8002 = vrcp.f32 %v4956_v62 }
 0xcfe   : > { %v4965_v18 = vpop.xlane.xlu1 %4964 }
 0xcff   : > { %8004 = vrcp.f32 %v4965_v18  ;;  %v4962_v2 = vpop.xlane.xlu0 %4961  ;;  %v7846_v18 = vld [vmem:[#allocation32 + $0x30] sm:$0xff]  }
 0xd00   : > { %8006 = vrcp.f32 %v4962_v2  ;;  %v7847_v2 = vld [vmem:[#allocation32 + $0x38] sm:$0xff]  }
 0xd01   : > { %v7997_v1 = vpop.eup %7996 }
 0xd02   : > { %v7999_v23 = vpop.eup %7998  ;;  %v4971_v27 = vpop.xlane.xlu1 %4970  ;;  %v5009_v44 = vmul.f32 %v7997_v1, %v10035_v8 }
 0xd03   : > { %8008 = vrcp.f32 %v4971_v27  ;;  %v4968_v6 = vpop.xlane.xlu0 %4967  ;;  %v5008_v38 = vmul.f32 %v7999_v23, %v10037_v17 }
 0xd04   : > { %8010 = vrcp.f32 %v4968_v6 }
 0xd05   : > { %v8001_v39 = vpop.eup %8000  ;;  %7383 = vmatprep.mubr.msk.f32.mxu1 %vm4845_vm14, %v5008_v38 }
 0xd06   : > { %v8003_v29 = vpop.eup %8002  ;;  %v4977_v31 = vpop.xlane.xlu1 %4976  ;;  %7384 = vmatmul.mubr.msk.f32.vlgmr.msra.gmra.mrb[44].mxu1 %vm4845_vm14, %v5009_v44  ;;  %v5011_v43 = vmul.f32 %v8001_v39, %v10045_v41 }
 0xd07   : > { %8012 = vrcp.f32 %v4977_v31  ;;  %7392 = vmatpush3.msra.mxu1 %v9939_v60  ;;  %v4974_v30 = vpop.xlane.xlu0 %4973  ;;  %v5010_v58 = vmul.f32 %v8003_v29, %v10047_v36 }
 0xd08   : > { %7401 = vmatprep.subr.mxu1 %v4132_v21  ;;  %8014 = vrcp.f32 %v4974_v30 }
 0xd09   : > { %v8005_v8 = vpop.eup %8004  ;;  %7388 = vmatprep.mubr.msk.f32.mxu0 %vm4845_vm14, %v5010_v58 }
 0xd0a   : > { %v8007_v17 = vpop.eup %8006  ;;  %v4983_v63 = vpop.xlane.xlu1 %4982  ;;  %7389 = vmatmul.mubr.msk.f32.vlgmr.msra.gmra.mrb[34].mxu0 %vm4845_vm14, %v5011_v43  ;;  %v5013_v60 = vmul.f32 %v8005_v8, %v10055_v59 }
 0xd0b   : > { %7397 = vmatpush3.msra.mxu0 %v4131_v16  ;;  %v4980_v46 = vpop.xlane.xlu0 %4979  ;;  %v5012_v47 = vmul.f32 %v8007_v17, %v10057_v48  ;;  %v7844_v16 = vld [vmem:[#allocation32 + $0x20] sm:$0xff]  }
 0xd0c   : > { %8016 = vrcp.f32 %v4980_v46 }
 0xd0d   : > { %v8009_v22 = vpop.eup %8008  ;;  %7393 = vmatprep.mubr.msk.f32.mxu1 %vm4845_vm14, %v5012_v47  ;;  %8018 = vrcp.f32 %v4983_v63 }
 0xd0e   : > { %v8011_v41 = vpop.eup %8010  ;;  %v4989_v36 = vpop.xlane.xlu1 %4988  ;;  %7394 = vmatmul.mubr.msk.f32.vlgmr.msra.gmra.mrb[46].mxu1 %vm4845_vm14, %v5013_v60  ;;  %v5015_v9 = vmul.f32 %v8009_v22, %v10065_v3 }
 0xd0f   : > { %8020 = vrcp.f32 %v4989_v36  ;;  %7402 = vmatpush3.msra.mxu1 %v4132_v21  ;;  %v4986_v45 = vpop.xlane.xlu0 %4985  ;;  %v5014_v20 = vmul.f32 %v8011_v41, %v10067_v10  ;;  %v6825_v41 = vld [vmem:[%s10362_s28] ss:$0 sm:$0xff] }
 0xd10   : > { %8022 = vrcp.f32 %v4986_v45 }
 0xd11   : > { %v8013_v48 = vpop.eup %8012  ;;  %7398 = vmatprep.mubr.msk.f32.mxu0 %vm4845_vm14, %v5014_v20 }
 0xd12   : > { %v8015_v59 = vpop.eup %8014  ;;  %v4100_v49 = vpop.permute.xlu1 %4099  ;;  %7399 = vmatmul.mubr.msk.f32.vlgmr.msra.gmra.mrb[36].mxu0 %vm4845_vm14, %v5015_v9  ;;  %v5017_v32 = vmul.f32 %v8013_v48, %v10075_v55 }
 0xd13   : > { %4102 = vst.msk [vmem:[#allocation4 + $0x70] sm:$0xff] %vm1587_vm1, %v4100_v49  ;;  %v4084_v4 = vpop.permute.xlu0 %4083  ;;  %v5016_v54 = vmul.f32 %v8015_v59, %v10077_v57 }
 0xd14   : > { %4086 = vst.msk [vmem:[#allocation4 + $0x60] sm:$0xff] %vm1587_vm1, %v4084_v4 }
 0xd15   : > { %7403 = vmatprep.mubr.msk.f32.mxu1 %vm4845_vm14, %v5016_v54 }
 0xd16   : > { %v8017_v3 = vpop.eup %8016  ;;  %7404 = vmatmul.mubr.msk.f32.vlgmr.msra.gmra.mrb[48].mxu1 %vm4845_vm14, %v5017_v32 }
 0xd17   : > { %v5018_v10 = vmul.f32 %v8017_v3, %v10085_v24  ;;  %v8019_v56 = vpop.eup %8018 }
 0xd18   : > { %v5019_v55 = vmul.f32 %v8019_v56, %v10083_v19 }
 0xd19   : > { %v8021_v51 = vpop.eup %8020  ;;  %7408 = vmatprep.mubr.msk.f32.mxu0 %vm4845_vm14, %v5018_v10 }
 0xd1a   : > { %v8023_v12 = vpop.eup %8022  ;;  %v4134_v13 = vld [vmem:[#allocation4 + $0x70] sm:$0xff]  ;;  %v5021_v52 = vmul.f32 %v8021_v51, %v10091_v26 }
 0xd1b   : > { %7411 = vmatprep.subr.mxu1 %v4134_v13  ;;  %v4133_v14 = vld [vmem:[#allocation4 + $0x60] sm:$0xff]  ;;  %v5020_v57 = vmul.f32 %v8023_v12, %v10093_v15  ;;  %v7841_v15 = vld [vmem:[#allocation32 + $0x8] sm:$0xff]  }
 0xd1c   : > { %7406 = vmatprep.subr.mxu0 %v4133_v14  ;;  %7412 = vmatpush3.msra.mxu1 %v4134_v13  ;;  %v7850_v13 = vld [vmem:[#allocation33 + $0x4] ss:$8 sps:$4 sm:$0xff]  }
 0xd1d   : > { %7407 = vmatpush3.msra.mxu0 %v4133_v14  ;;  %7413 = vmatprep.mubr.msk.f32.mxu1 %vm4845_vm14, %v5020_v57  ;;  %v7853_v14 = vld [vmem:[#allocation33 + $0x14] ss:$8 sps:$4 sm:$0xff]   ;;  %v7851_v57 = vld [vmem:[#allocation33 + $0x10] ss:$8 sps:$4 sm:$0xff]  }
 0xd1e   : > { %7409 = vmatmul.mubr.msk.f32.vlgmr.msra.gmra.mrb[38].mxu0 %vm4845_vm14, %v5019_v55  ;;  %7414 = vmatmul.mubr.msk.f32.vlgmr.msra.gmra.mrb[50].mxu1 %vm4845_vm14, %v5021_v52  ;;  %v7856_v55 = vld [vmem:[#allocation33 + $0x24] ss:$8 sps:$4 sm:$0xff]   ;;  %v7854_v52 = vld [vmem:[#allocation33 + $0x20] ss:$8 sps:$4 sm:$0xff]  }
 0xd1f   : > { %7416 = vmatprep.subr.bf16.mxu0 %v8739_v0  ;;  %7432 = vmatprep.mubr.msk.bf16.mxu0 %vm8740_vm0, %v8739_v0 }
 0xd20   : > { %7417 = vmatpush3.bf16.msra.mxu0 %v7840_v42  ;;  %6022 = vmatprep.subr.bf16.mxu1 %v7850_v13  ;;  %v7860_v42 = vld [vmem:[#allocation33 + $0x40] ss:$8 sps:$4 sm:$0xff]  }
 0xd21   : > { %7418 = vmatprep.subr.bf16.mxu0 %v8739_v0 }
 0xd24   : > { %7419 = vmatpush3.bf16.msra.mxu0 %v7841_v15  ;;  %v7865_v15 = vld [vmem:[#allocation33 + $0x54] ss:$8 sps:$4 sm:$0xff]  }
 0xd25   : > { %7420 = vmatprep.subr.bf16.mxu0 %v8739_v0 }
 0xd28   : > { %7421 = vmatpush3.bf16.msra.mxu0 %v7842_v7  ;;  %v7868_v7 = vld [vmem:[#allocation33 + $0x64] ss:$8 sps:$4 sm:$0xff]  }
 0xd29   : > { %7422 = vmatprep.subr.bf16.mxu0 %v8739_v0 }
 0xd2c   : > { %7423 = vmatpush3.bf16.msra.mxu0 %v7843_v28  ;;  %v7871_v28 = vld [vmem:[#allocation33 + $0x74] ss:$8 sps:$4 sm:$0xff]  }
 0xd2d   : > { %7424 = vmatprep.subr.bf16.mxu0 %v8739_v0 }
 0xd30   : > { %7425 = vmatpush3.bf16.msra.mxu0 %v7844_v16  ;;  %v7874_v16 = vld [vmem:[#allocation35 + $0x48] sm:$0xff]  }
 0xd31   : > { %7426 = vmatprep.subr.bf16.mxu0 %v8739_v0 }
 0xd34   : > { %7427 = vmatpush3.bf16.msra.mxu0 %v7845_v40  ;;  %v7877_v40 = vld [vmem:[#allocation35 + $0x10] sm:$0xff]  }
 0xd35   : > { %7428 = vmatprep.subr.bf16.mxu0 %v8739_v0 }
 0xd38   : > { %7429 = vmatpush3.bf16.msra.mxu0 %v7846_v18  ;;  %v7879_v18 = vld [vmem:[#allocation35 + $0x18] sm:$0xff]  }
 0xd39   : > { %7430 = vmatprep.subr.bf16.mxu0 %v8739_v0 }
 0xd3c   : > { %7431 = vmatpush3.bf16.msra.mxu0 %v7847_v2  ;;  %v7880_v2 = vld [vmem:[#allocation35 + $0x60] sm:$0xff]  }
 0xd88   : > { %v7380_v24 = vpop.f32.mrb[32].mxu0 }
 0xd89   : > { %5671 = vst.msk [vmem:[#allocation5 + $0x8] sm:$0xff] %vm1587_vm1, %v7380_v24  ;;  %v5094_v19 = vpop.f32.mrb[33].mxu0  ;;  %v7859_v24 = vld [vmem:[#allocation33 + $0x34] ss:$8 sps:$4 sm:$0xff]  }
 0xd8a   : > { %5670 = vst.msk [vmem:[#allocation5] sm:$0xff] %vm1587_vm1, %v5094_v19  ;;  %v7857_v19 = vld [vmem:[#allocation33 + $0x30] ss:$8 sps:$4 sm:$0xff]  }
 0xdd9   : > { %v7385_v26 = vpop.f32.mrb[44].mxu1 }
 0xdda   : > { %5676 = vrot.lane.b32.xlu1 %v7385_v26, %s8747_s21  ;;  %v5175_v11 = vpop.f32.mrb[45].mxu1  ;;  %v7862_v26 = vld [vmem:[#allocation33 + $0x44] ss:$8 sps:$4 sm:$0xff]  }
 0xddb   : > { %5674 = vrot.lane.b32.xlu0 %v5175_v11, %s8747_s21  ;;  %v8748_v11 = vmov 0   ;;  %s6877_s21 = sshll.u32 %s8933_s26, 8  ;;  %s8749_s26 = smov [#allocation36]  }
 0xddc   : > { %6054 = vmatprep.mubr.bf16.mxu1 %v8748_v11  ;;  %s8582_s14 = sshll.u32 %s8749_s26, 4  ;;  %s8583_s14 = int_to_ptr.vmem [resolvable:$false] %s8582_s14 }
 0xddd   : > { %v7390_v53 = vpop.f32.mrb[34].mxu0  ;;  %s8584_s20 = scalar_lea.vmem %s8583_s14, 512  ;;  %p8585_p11 = scmp.lt.s32.totalorder %s10204_s22, %s8583_s14 }
 0xdde   : > { %5686 = vrot.lane.b32.xlu1 %v7390_v53, %s8746_s5  ;;  %v5256_v61 = vpop.f32.mrb[35].mxu0  ;;  %v7863_v53 = vld [vmem:[#allocation33 + $0x50] ss:$8 sps:$4 sm:$0xff]   ;;  %p8586_p4 = scmp.lt.s32.totalorder %s8584_s20, %s8578_s24 }
 0xddf   : > { %5684 = vrot.lane.b32.xlu0 %v5256_v61, %s8746_s5  ;;  %v7866_v61 = vld [vmem:[#allocation33 + $0x60] ss:$8 sps:$4 sm:$0xff]   ;;  %s10368_s5 = sld [smem:[#allocation76_spill]] }
 0xde0   : > { %p8587_p9 = por %p8586_p4, %p8585_p11 }
 0xde1   : > { %v7395_v50 = vpop.f32.mrb[46].mxu1 }
 0xde2   : > { %5696 = vrot.lane.b32.xlu1 %v7395_v50, %s8745_s4  ;;  %v5337_v35 = vpop.f32.mrb[47].mxu1  ;;  %v7869_v50 = vld [vmem:[#allocation33 + $0x70] ss:$8 sps:$4 sm:$0xff]   ;;  %p8588_p0 = pnand %p8587_p9, %p8581_p6 }
 0xde3   : > { %5694 = vrot.lane.b32.xlu0 %v5337_v35, %s8745_s4  ;;  %v7872_v35 = vld [vmem:[#allocation35 + $0x40] sm:$0xff]   ;;  %s10367_s4 = sld [smem:[#allocation75_spill]] }
 0xde4   : > { %7062 = vmatprep.subr.bf16.mxu0 %v7872_v35 }
 0xde5   : > { %v7400_v37 = vpop.f32.mrb[36].mxu0  ;;  %s10202_s3 = scalar_lea.hbm %s10368_s5, %s6877_s21 }
 0xde6   : > { %5706 = vrot.lane.b32.xlu1 %v7400_v37, %s8744_s17  ;;  %v5418_v25 = vpop.f32.mrb[37].mxu0  ;;  %v7873_v37 = vld [vmem:[#allocation35] sm:$0xff]  }
 0xde7   : > { %5704 = vrot.lane.b32.xlu0 %v5418_v25, %s8744_s17  ;;  %v7875_v25 = vld [vmem:[#allocation35 + $0x8] sm:$0xff]   ;;  %s10366_s17 = sld [smem:[#allocation74_spill]] }
 0xde9   : > { %v7405_v5 = vpop.f32.mrb[48].mxu1 }
 0xdea   : > { %5716 = vrot.lane.b32.xlu1 %v7405_v5, %s8743_s23  ;;  %v5499_v62 = vpop.f32.mrb[49].mxu1  ;;  %v7876_v5 = vld [vmem:[#allocation35 + $0x50] sm:$0xff]  }
 0xdeb   : > { %5714 = vrot.lane.b32.xlu0 %v5499_v62, %s8743_s23  ;;  %v7878_v62 = vld [vmem:[#allocation35 + $0x58] sm:$0xff]   ;;  %s10365_s23 = sld [smem:[#allocation72_spill]] }
 0xdf1   : > { %v7410_v1 = vpop.f32.mrb[38].mxu0  ;;  %v7415_v23 = vpop.f32.mrb[50].mxu1 }
 0xdf2   : > { %v5661_v27 = vpop.f32.mrb[51].mxu1  ;;  %5726 = vrot.lane.b32.xlu1 %v7410_v1, %s8741_s10  ;;  %v5580_v6 = vpop.f32.mrb[39].mxu0  ;;  %v7881_v1 = vld [vmem:[#allocation35 + $0x20] sm:$0xff]  }
 0xdf3   : > { %5724 = vrot.lane.b32.xlu0 %v5580_v6, %s8741_s10  ;;  %s10363_s10 = sld [smem:[#allocation69_spill]] }
 0xdf6   : > { %5736 = vrot.lane.b32.xlu1 %v7415_v23, %s8742_s12  ;;  %v7882_v23 = vld [vmem:[#allocation35 + $0x68] sm:$0xff]  }
 0xdf7   : > { %5734 = vrot.lane.b32.xlu0 %v5661_v27, %s8742_s12  ;;  %s10364_s12 = sld [smem:[#allocation70_spill]] }
 0xe4c   : > { %v5677_v38 = vpop.permute.xlu1 %5676 }
 0xe4d   : > { %5681 = vst.msk [vmem:[#allocation5 + $0x8] sm:$0xff] %vm3405_vm3, %v5677_v38  ;;  %v5675_v44 = vpop.permute.xlu0 %5674 }
 0xe4e   : > { %5680 = vst.msk [vmem:[#allocation5] sm:$0xff] %vm3405_vm3, %v5675_v44 }
 0xe50   : > { %v5687_v0 = vpop.permute.xlu1 %5686 }
 0xe51   : > { %5691 = vst.msk [vmem:[#allocation5 + $0x8] sm:$0xff] %vm3416_vm4, %v5687_v0  ;;  %v5685_v39 = vpop.permute.xlu0 %5684 }
 0xe52   : > { %5690 = vst.msk [vmem:[#allocation5] sm:$0xff] %vm3416_vm4, %v5685_v39 }
 0xe54   : > { %v5697_v29 = vpop.permute.xlu1 %5696 }
 0xe55   : > { %5701 = vst.msk [vmem:[#allocation5 + $0x8] sm:$0xff] %vm3427_vm5, %v5697_v29  ;;  %v5695_v31 = vpop.permute.xlu0 %5694 }
 0xe56   : > { %5700 = vst.msk [vmem:[#allocation5] sm:$0xff] %vm3427_vm5, %v5695_v31 }
 0xe58   : > { %v5707_v21 = vpop.permute.xlu1 %5706 }
 0xe59   : > { %5711 = vst.msk [vmem:[#allocation5 + $0x8] sm:$0xff] %vm3438_vm6, %v5707_v21  ;;  %v5705_v30 = vpop.permute.xlu0 %5704 }
 0xe5a   : > { %5710 = vst.msk [vmem:[#allocation5] sm:$0xff] %vm3438_vm6, %v5705_v30 }
 0xe5c   : > { %v5717_v58 = vpop.permute.xlu1 %5716 }
 0xe5d   : > { %5721 = vst.msk [vmem:[#allocation5 + $0x8] sm:$0xff] %vm3449_vm7, %v5717_v58  ;;  %v5715_v43 = vpop.permute.xlu0 %5714 }
 0xe5e   : > { %5720 = vst.msk [vmem:[#allocation5] sm:$0xff] %vm3449_vm7, %v5715_v43 }
 0xe64   : > { %v5727_v8 = vpop.permute.xlu1 %5726 }
 0xe65   : > { %5731 = vst.msk [vmem:[#allocation5 + $0x8] sm:$0xff] %vm3460_vm8, %v5727_v8  ;;  %v5725_v17 = vpop.permute.xlu0 %5724 }
 0xe66   : > { %5730 = vst.msk [vmem:[#allocation5] sm:$0xff] %vm3460_vm8, %v5725_v17 }
 0xe68   : > { %v5737_v63 = vpop.permute.xlu1 %5736 }
 0xe69   : > { %5741 = vst.msk [vmem:[#allocation5 + $0x8] sm:$0xff] %vm3471_vm9, %v5737_v63  ;;  %v5735_v46 = vpop.permute.xlu0 %5734 }
 0xe6a   : > { %5740 = vst.msk [vmem:[#allocation5] sm:$0xff] %vm3471_vm9, %v5735_v46 }
 0xe70   : > { %v5743_v47 = vld [vmem:[#allocation5 + $0x8] sm:$0xff] }
 0xe71   : > { %v5742_v60 = vld [vmem:[#allocation5] sm:$0xff] }
 0xe72   : > { %v5744_v22 = vpack.c.bf16 %v5743_v47, %v5742_v60  ;;  %v6834_v47 = vld [vmem:[%s10363_s10] ss:$0 sm:$0xff] }
 0xe74   : > { %7433 = vmatmul.mubr.bf16.vlgmr.msra.gmra.mrb[40].mxu0 %v5744_v22 }
 0xe75   : > { %7063 = vmatpush3.bf16.msra.mxu0 %v7873_v37  ;;  %v6852_v37 = vld [vmem:[%s8895_s13] ss:$0 sm:$0xff] }
 0xe76   : > { %7064 = vmatprep.subr.bf16.mxu0 %v7874_v16 }
 0xe79   : > { %7065 = vmatpush3.bf16.msra.mxu0 %v7875_v25 }
 0xe7a   : > { %7066 = vmatprep.subr.bf16.mxu0 %v7876_v5 }
 0xe7d   : > { %7067 = vmatpush3.bf16.msra.mxu0 %v7877_v40 }
 0xe7e   : > { %7068 = vmatprep.subr.bf16.mxu0 %v7878_v62 }
 0xe81   : > { %7069 = vmatpush3.bf16.msra.mxu0 %v7879_v18 }
 0xe82   : > { %7070 = vmatprep.subr.bf16.mxu0 %v7880_v2 }
 0xe85   : > { %7071 = vmatpush3.bf16.msra.mxu0 %v7881_v1 }
 0xe86   : > { %7072 = vmatprep.subr.bf16.mxu0 %v7882_v23 }
 0xf47   : > { %v5850_v36 = vpop.f32.mrb[40].mxu0 }
 0xf48   : > { %v5851_v45 = vadd.f32 %v6825_v41, %v5850_v36  ;;  %v7434_v20 = vpop.f32.mrb[41].mxu0 }
 0xf49   : > { %v5853_v9 = vpop.f32.mrb[42].mxu0  ;;  %v6835_v20 = vld [vmem:[%s10364_s12] ss:$0 sm:$0xff] }
 0xf4a   : > { %v5857_v48 = vadd.f32 %v5851_v45, %v9804_v33  ;;  %v5854_v59 = vadd.f32 %v6825_v41, %v5853_v9  ;;  %v7435_v49 = vpop.f32.mrb[43].mxu0 }
 0xf4c   : > { %v5858_v4 = vadd.f32 %v5854_v59, %v9806_v34  ;;  %5861 = vadd.xlane.f32.xlu0 %v5857_v48  ;;  %v7848_v34 = vld [vmem:[#allocation33] ss:$8 sps:$4 sm:$0xff]  }
 0xf4d   : > { %6023 = vmatpush1.bf16.msra.mxu1 %v7848_v34 }
 0xf4e   : > { %5863 = vadd.xlane.f32.xlu1 %v5858_v4  ;;  %6024 = vmatprep.subr.bf16.mxu1 %v7853_v14 }
 0xf51   : > { %6025 = vmatpush1.bf16.msra.mxu1 %v7851_v57 }
 0xf52   : > { %6026 = vmatprep.subr.bf16.mxu1 %v7856_v55 }
 0xf55   : > { %6027 = vmatpush1.bf16.msra.mxu1 %v7854_v52 }
 0xf56   : > { %6028 = vmatprep.subr.bf16.mxu1 %v7859_v24 }
 0xf59   : > { %6029 = vmatpush1.bf16.msra.mxu1 %v7857_v19 }
 0xf5a   : > { %6030 = vmatprep.subr.bf16.mxu1 %v7862_v26 }
 0xf5d   : > { %6031 = vmatpush1.bf16.msra.mxu1 %v7860_v42 }
 0xf5e   : > { %6032 = vmatprep.subr.bf16.mxu1 %v7865_v15 }
 0xf61   : > { %6033 = vmatpush1.bf16.msra.mxu1 %v7863_v53 }
 0xf62   : > { %6034 = vmatprep.subr.bf16.mxu1 %v7868_v7 }
 0xf65   : > { %6035 = vmatpush1.bf16.msra.mxu1 %v7866_v61 }
 0xf66   : > { %6036 = vmatprep.subr.bf16.mxu1 %v7871_v28 }
 0xf69   : > { %6037 = vmatpush1.bf16.msra.mxu1 %v7869_v50 }
 0xfd9   : > { %v5862_v54 = vpop.xlane.xlu0 %5861 }
 0xfda   : > { %v5865_v32 = vmul.f32 0.0078125, %v5862_v54  ;;  %v7884_v54 = vld [vmem:[#allocation35 + $0x70] sm:$0xff]  }
 0xfdb   : > { %v5864_v3 = vpop.xlane.xlu1 %5863 }
 0xfdc   : > { %v10182_v10 = vsub.f32 %v5857_v48, %v5865_v32  ;;  %v5866_v56 = vmul.f32 0.0078125, %v5864_v3  ;;  %v7885_v32 = vld [vmem:[#allocation35 + $0x30] sm:$0xff]   ;;  %v7886_v3 = vld [vmem:[#allocation35 + $0x78] sm:$0xff]  }
 0xfde   : > { %v10184_v51 = vsub.f32 %v5858_v4, %v5866_v56  ;;  %v5869_v12 = vmul.f32 %v10182_v10, %v10182_v10  ;;  %v5901_v22 = vmul.f32 %v6834_v47, %v10182_v10  ;;  %v7883_v4 = vld [vmem:[#allocation35 + $0x28] sm:$0xff]   ;;  %v7887_v56 = vld [vmem:[#allocation35 + $0x38] sm:$0xff]   ;;  %v5932_v10 = vlaneseq }
 0xfdf   : > { %7073 = vmatpush3.bf16.msra.mxu0 %v7883_v4  ;;  %v6870_v4 = vld [vmem:[%s10367_s4] ss:$0 sm:$0xff] }
 0xfe0   : > { %5871 = vadd.xlane.f32.xlu0 %v5869_v12  ;;  %v5870_v33 = vmul.f32 %v10184_v51, %v10184_v51  ;;  %v5902_v41 = vmul.f32 %v6834_v47, %v10184_v51  ;;  %7074 = vmatprep.subr.bf16.mxu0 %v7884_v54  ;;  %v5933_v51 = vshrl.u32 %v5932_v10, 7 }
 0xfe2   : > { %v5934_v12 = vsub.s32 0, %v5933_v51  ;;  %v5938_v13 = vsub.s32 1, %v5933_v51 }
 0xfe3   : > { %7075 = vmatpush3.bf16.msra.mxu0 %v7885_v32 }
 0xfe4   : > { %5873 = vadd.xlane.f32.xlu0 %v5870_v33  ;;  %7076 = vmatprep.subr.bf16.mxu0 %v7886_v3  ;;  %v5930_v33 = vld [vmem:[%s10365_s23] sm:$0x3] }
 0xfe5   : > { %v5935_v34 = vrot.slane %v5930_v33, %v5934_v12  ;;  %v5939_v14 = vrot.slane %v5930_v33, %v5938_v13 }
 0xfe7   : > { %7077 = vmatpush3.bf16.msra.mxu0 %v7887_v56 }
0x106d   : > { %v5872_v27 = vpop.xlane.xlu0 %5871 }
0x106e   : > { %v5875_v6 = vmul.f32 0.007874016, %v5872_v27 }
0x1070   : > { %8024 = vrsqrt.f32 %v5875_v6  ;;  %vm5879_vm15 = vcmp.eq.f32.partialorder %v5875_v6, inf  ;;  %v5882_v29 = vand.u32 2147483648, %v5875_v6  ;;  %vm5881_vm0 = vcmp.eq.f32.partialorder %v5875_v6, 0.0 }
0x1071   : > { %v5874_v38 = vpop.xlane.xlu0 %5873 }
0x1072   : > { %v5876_v44 = vmul.f32 0.007874016, %v5874_v38 }
0x1074   : > { %8026 = vrsqrt.f32 %v5876_v44  ;;  %vm5886_vm1 = vcmp.eq.f32.partialorder %v5876_v44, inf  ;;  %v5889_v8 = vand.u32 2147483648, %v5876_v44  ;;  %vm5888_vm2 = vcmp.eq.f32.partialorder %v5876_v44, 0.0 }
0x107a   : > { %v8025_v0 = vpop.eup %8024 }
0x107b   : > { %v5878_v39 = vmul.f32 %v8025_v0, %v5875_v6 }
0x107d   : > { %v5880_v31 = vsel %vm5879_vm15, %v5875_v6, %v5878_v39 }
0x107e   : > { %v8027_v21 = vpop.eup %8026  ;;  %v5883_v30 = vsel %vm5881_vm0, %v5882_v29, %v5880_v31 }
0x107f   : > { %v5891_v58 = vadd.f32 1e-06, %v5883_v30  ;;  %v5885_v43 = vmul.f32 %v8027_v21, %v5876_v44 }
0x1081   : > { %8028 = vrcp.f32 %v5891_v58  ;;  %v5887_v17 = vsel %vm5886_vm1, %v5876_v44, %v5885_v43 }
0x1082   : > { %v5890_v63 = vsel %vm5888_vm2, %v5889_v8, %v5887_v17 }
0x1083   : > { %v5892_v46 = vadd.f32 1e-06, %v5890_v63 }
0x1085   : > { %8030 = vrcp.f32 %v5892_v46 }
0x108b   : > { %v8029_v60 = vpop.eup %8028 }
0x108c   : > { %v5903_v36 = vmul.f32 %v8029_v60, %v5901_v22 }
0x108e   : > { %v5911_v48 = vadd.f32 %v6835_v20, %v5903_v36 }
0x108f   : > { %v8031_v45 = vpop.eup %8030 }
0x1090   : > { %v5904_v9 = vmul.f32 %v8031_v45, %v5902_v41 }
0x1092   : > { %v5912_v59 = vadd.f32 %v6835_v20, %v5904_v9 }
0x1094   : > { %v5913_v49 = vpack.c.bf16 %v5912_v59, %v5911_v48 }
0x1096   : > { %6055 = vmatmul.mubr.bf16.vlgmr.msra.gmra.mrb[52].mxu1 %v5913_v49 }
0x1169   : > { %v6056_v57 = vpop.f32.mrb[52].mxu1 }
0x116a   : > { %v6057_v55 = vadd.f32 %v6056_v57, %v5935_v34  ;;  %v6058_v52 = vpop.f32.mrb[53].mxu1 }
0x116b   : > { %v6059_v24 = vadd.f32 %v6058_v52, %v5939_v14  ;;  %v6060_v19 = vpop.f32.mrb[54].mxu1 }
0x116c   : > { %v6061_v42 = vadd.f32 %v6060_v19, %v5935_v34  ;;  %v6062_v26 = vpop.f32.mrb[55].mxu1  ;;  %v6065_v11 = vmax.f32 %v6057_v55, 0.0 }
0x116d   : > { %v6063_v15 = vadd.f32 %v6062_v26, %v5939_v14  ;;  %v6066_v7 = vmax.f32 %v6059_v24, 0.0 }
0x116e   : > { %v6067_v53 = vmax.f32 %v6061_v42, 0.0 }
0x116f   : > { %v6068_v61 = vmax.f32 %v6063_v15, 0.0 }
0x1170   : > { %v6069_v28 = vpack.c.bf16 %v6067_v53, %v6065_v11 }
0x1171   : > { %v6070_v50 = vpack.c.bf16 %v6068_v61, %v6066_v7 }
0x1173   : > { %6238 = vmatprep.mubr.bf16.mxu0 %v6070_v50 }
0x1174   : > { %6239 = vmatmul.mubr.bf16.vlgmr.msra.gmra.mrb[44].mxu0 %v6069_v28 }
0x1247   : > { %v7078_v35 = vpop.f32.mrb[44].mxu0 }
0x1248   : > { %v7079_v16 = vpop.f32.mrb[45].mxu0 }
0x1249   : > { %v7080_v25 = vadd.f32 %v7079_v16, %v7078_v35  ;;  %v7081_v5 = vpop.f32.mrb[46].mxu0 }
0x124a   : > { %v7082_v40 = vpop.f32.mrb[47].mxu0 }
0x124b   : > { %v6241_v62 = vadd.f32 %v7080_v25, %v6852_v37  ;;  %v7083_v18 = vadd.f32 %v7082_v40, %v7081_v5 }
0x124d   : > { %v6244_v2 = vadd.f32 %v7083_v18, %v6852_v37  ;;  %v6247_v1 = vadd.f32 %v6241_v62, %v5911_v48  ;;  %v6869_v48 = vld [vmem:[%s10366_s17] ss:$0 sm:$0xff] }
0x124f   : > { %6251 = vadd.xlane.f32.xlu1 %v6247_v1  ;;  %v6248_v23 = vadd.f32 %v6244_v2, %v5912_v59 }
0x1251   : > { %6253 = vadd.xlane.f32.xlu0 %v6248_v23 }
0x12dc   : > { %v6252_v27 = vpop.xlane.xlu1 %6251 }
0x12dd   : > { %v6255_v6 = vmul.f32 0.0078125, %v6252_v27 }
0x12de   : > { %v6254_v38 = vpop.xlane.xlu0 %6253 }
0x12df   : > { %v6257_v44 = vsub.f32 %v6247_v1, %v6255_v6  ;;  %v6256_v0 = vmul.f32 0.0078125, %v6254_v38 }
0x12e1   : > { %v6258_v39 = vsub.f32 %v6248_v23, %v6256_v0  ;;  %v6259_v29 = vmul.f32 %v6257_v44, %v6257_v44  ;;  %v6291_v59 = vmul.f32 %v6869_v48, %v6257_v44 }
0x12e3   : > { %6261 = vadd.xlane.f32.xlu1 %v6259_v29  ;;  %v6260_v31 = vmul.f32 %v6258_v39, %v6258_v39  ;;  %v6292_v32 = vmul.f32 %v6869_v48, %v6258_v39 }
0x12e5   : > { %6263 = vadd.xlane.f32.xlu0 %v6260_v31 }
0x1370   : > { %v6262_v21 = vpop.xlane.xlu1 %6261 }
0x1371   : > { %v6265_v30 = vmul.f32 0.007874016, %v6262_v21 }
0x1372   : > { %v6264_v58 = vpop.xlane.xlu0 %6263 }
0x1373   : > { %8032 = vrsqrt.f32 %v6265_v30  ;;  %v6266_v43 = vmul.f32 0.007874016, %v6264_v58  ;;  %vm6269_vm3 = vcmp.eq.f32.partialorder %v6265_v30, inf  ;;  %v6272_v63 = vand.u32 2147483648, %v6265_v30 }
0x1374   : > { %vm6271_vm4 = vcmp.eq.f32.partialorder %v6265_v30, 0.0 }
0x1375   : > { %8034 = vrsqrt.f32 %v6266_v43  ;;  %vm6276_vm5 = vcmp.eq.f32.partialorder %v6266_v43, inf  ;;  %v6279_v36 = vand.u32 2147483648, %v6266_v43  ;;  %vm6278_vm6 = vcmp.eq.f32.partialorder %v6266_v43, 0.0 }
0x137d   : > { %v8033_v8 = vpop.eup %8032 }
0x137e   : > { %v6268_v17 = vmul.f32 %v8033_v8, %v6265_v30 }
0x137f   : > { %v8035_v46 = vpop.eup %8034 }
0x1380   : > { %v6270_v47 = vsel %vm6269_vm3, %v6265_v30, %v6268_v17  ;;  %v6275_v22 = vmul.f32 %v8035_v46, %v6266_v43 }
0x1381   : > { %v6273_v60 = vsel %vm6271_vm4, %v6272_v63, %v6270_v47 }
0x1382   : > { %v6281_v41 = vadd.f32 1e-06, %v6273_v60  ;;  %v6277_v45 = vsel %vm6276_vm5, %v6266_v43, %v6275_v22 }
0x1383   : > { %v6280_v20 = vsel %vm6278_vm6, %v6279_v36, %v6277_v45 }
0x1384   : > { %8036 = vrcp.f32 %v6281_v41  ;;  %v6282_v9 = vadd.f32 1e-06, %v6280_v20 }
0x1386   : > { %8038 = vrcp.f32 %v6282_v9 }
0x138e   : > { %v8037_v49 = vpop.eup %8036 }
0x138f   : > { %v6293_v54 = vmul.f32 %v8037_v49, %v6291_v59 }
0x1390   : > { %v8039_v3 = vpop.eup %8038 }
0x1391   : > { %v6301_v56 = vadd.f32 %v6870_v4, %v6293_v54  ;;  %v6294_v10 = vmul.f32 %v8039_v3, %v6292_v32 }
0x1393   : > { %6303 = vst [vmem:[%s1237_s1] sm:$0xff] %v6301_v56  ;;  %v6302_v51 = vadd.f32 %v6870_v4, %v6294_v10 }
0x1395   : > { %6304 = vst [vmem:[%s1237_s1 + $0x8] sm:$0xff] %v6302_v51 }
0x1396   : > { %8591 = shalt.err (!%p8588_p0)
}
0x1397   : > { %s8592_s28 = scalar_lea.hbm %s10202_s3, 256  ;;  %s8596_s10 = scalar_lea.hbm %s10368_s5, 512 }
0x1398   : > { %p8593_p8 = scmp.ne.s32.totalorder %s10202_s3, %s8592_s28  ;;  %p8597_p12 = scmp.lt.u32.totalorder %s10202_s3, %s10368_s5 }
0x1399   : > { %p8598_p13 = scmp.lt.u32.totalorder %s8596_s10, %s8592_s28  ;;  %p8600_p7 = scmp.lt.u32.totalorder %s8592_s28, %s10202_s3 }
0x139a   : > { %p8594_p2 = pnand %p8593_p8, %p10369_p1 }
0x139b   : > { %p8599_p5 = por %p8598_p13, %p8597_p12 }
0x139c   : > { %p8595_p10 = pneg %p8594_p2 }
0x139d   : > { %p8601_p3 = por %p8600_p7, %p8599_p5 }
0x139f   : > { %p8602_p6 = pnand %p8601_p3, %p8595_p10 }
0x13a1   : > { %8605 = shalt.err (!%p8602_p6)
}
0x13a2   : > { %s8750_s12 = smov 128   ;;  %s8751_s23 = smov 8  }
0x13a3   : > { %7588 = dma.vmem_to_hbm [thread:$0]  (%p10369_p1), %s10204_s22, 256, %s10202_s3, %s6306_s8, %s8750_s12, %s8750_s12, %s8751_s23  }
0x13a4 PF: > { %s6334_s17 = sand.u32 1, %s8672_s15   ;;  %p10370_p11 = scmp.ne.s32.totalorder %s10329_s6, 0 }
0x13a5   : > { %p10371_p4 = scmp.ge.s32.totalorder %s8684_s18, 2  ;;  %s6335_s4 = scalar_lea.sflag [#allocation8], %s6334_s17 }
0x13a7   : > { %p7650_p9 = pnand %p10371_p4, %p10370_p11 }
0x13a9   : > { %8667 = dma.done.wait (!%p7650_p9), %s6335_s4, 256  }
0x13aa   : > { %8669 = vsyncadd (!%p7650_p9), %s6335_s4, 4294967040  ;;  %p85_p0 = scmp.ge.s32.totalorder %s9179_s7, 4   ;;  %s10372_s15 = smov %s8676_s16 }
0x13ab   : > { %s10373_s16 = smov %s8680_s0  ;;  %s10374_s0 = smov %s9191_s11 }
0x13ac   : > { %s10375_s18 = smov %s9179_s7  ;;  %87 = sbr.rel (!%p85_p0) target bundleno = 82 (0x52), region = 323 }
0x13b3   :  { %6340 = vsyncpa [#allocation7], 1 }
0x13b4   :  { %6342 = vsyncpa [#allocation7 + $0x1], 1 }
0x13b5   :  { %6343 = vsyncpa [#allocation10], 1 }
0x13b6   :  { %6345 = vsyncpa [#allocation10 + $0x1], 1 }
0x13b7   :  { %6346 = vsyncpa [#allocation13], 1 }
0x13b8   :  { %6347 = vsyncpa [#allocation16], 1 }
0x13b9   :  { %6348 = vsyncpa [#allocation19], 1 }
0x13ba   :  { %6349 = vsyncpa [#allocation22], 1 }
0x13bb   :  { %6350 = vsyncpa [#allocation25], 1 }
0x13bc   :  { %6351 = vsyncpa [#allocation28], 1 }
0x13bd   :  { %6352 = vsyncpa [#allocation31], 1 }
0x13be   :  { %6353 = vsyncpa [#allocation34], 1 }
0x13bf   :  { %6354 = vsyncpa [#allocation8], 1 }
0x13c0   :  { %6356 = vsyncpa [#allocation8 + $0x1], 1 }

</bundles_post_ra>
